<compile_context>
chip_gen: v7x
topology: tpu7x:2x2x1
jax: 0.10.0
libtpu: 0.0.40
codegen_flags: <defaults>
</compile_context>

<pallas_src>
from functools import partial

import jax
import jax.numpy as jnp
from jax.experimental import pallas as pl
from jax.experimental.pallas import tpu as pltpu

NEG_SLOPE = 0.01  # F.leaky_relu default


# ---------------------------------------------------------------------------
# Fused forward kernel (one grid step = block_n samples, everything in VMEM)
# ---------------------------------------------------------------------------
def _fused_forward_kernel(x_ref, w1_ref, w2_ref, w3_ref, m1_ref, wf2_ref,
                          wfd_ref, b_ref, o_ref, scr1, scr2, scr3):
    dot = lambda a, b: jnp.dot(a, b, preferred_element_type=jnp.float32)
    lrelu = lambda v: jnp.where(v >= 0.0, v, NEG_SLOPE * v)

    nb = o_ref.shape[0]          # samples in this grid step
    r1 = nb * 16                 # conv1 output rows  (sample-major, position-minor)
    r2 = nb * 8                  # conv2 output rows
    r3 = nb * 4                  # conv3 output rows (= torch view rows)

    # ---- conv1 (k=1, s=1): one channel matmul over all (sample, position) rows
    y1 = lrelu(dot(x_ref[...], w1_ref[...]) + b_ref[0:1, 0:64])        # (r1, 64)
    scr1[pl.ds(0, 8), :] = jnp.zeros((8, 64), jnp.float32)             # conv zero-pad rows
    scr1[pl.ds(8, r1), :] = y1

    def strided_conv(scr, w_ref, n_out, l_out, bias):
        # Output row r = n*l_out + o needs input rows 2r + t - 1 (t = tap 0..2),
        # i.e. scratch rows (7+t) + 2r -> three stride-2 sublane reads.
        # Only (t=0, o=0) refers to the conv's zero padding; for samples n > 0
        # that row would alias the previous sample, so mask it to zero.
        t0 = scr[pl.ds(7, n_out, 2), :]
        t1 = scr[pl.ds(8, n_out, 2), :]
        t2 = scr[pl.ds(9, n_out, 2), :]
        o_ids = jax.lax.broadcasted_iota(jnp.int32, (n_out, 1), 0)
        t0 = jnp.where((o_ids & (l_out - 1)) != 0, t0, 0.0)            # o == 0 rows -> 0
        # three independent dots, tree-added (no serialized MXU chain)
        acc = (dot(t0, w_ref[0]) + dot(t1, w_ref[1])) + dot(t2, w_ref[2])
        return lrelu(acc + bias)

    # ---- conv2 (k=3, s=2, p=1)
    y2 = strided_conv(scr1, w2_ref, r2, 8, b_ref[1:2, 0:64])           # (r2, 64)
    scr2[pl.ds(0, 8), :] = jnp.zeros((8, 64), jnp.float32)
    scr2[pl.ds(8, r2), :] = y2

    # ---- conv3 (k=3, s=2, p=1)
    y3 = strided_conv(scr2, w3_ref, r3, 4, b_ref[2:3, 0:128])          # (r3, 128)
    scr3[...] = y3

    # ---- fc1 fused with torch view(-1,128): stride-4 row pick per conv3
    # position o; the view permutation lives in the precomputed m1[o] weights.
    # h1 is packed per sample: lanes [k*128, (k+1)*128) = fc1 output of view row k.
    h1 = (dot(scr3[pl.ds(0, nb, 4), :], m1_ref[0]) +
          dot(scr3[pl.ds(1, nb, 4), :], m1_ref[1])) + \
         (dot(scr3[pl.ds(2, nb, 4), :], m1_ref[2]) +
          dot(scr3[pl.ds(3, nb, 4), :], m1_ref[3]))
    h1 = lrelu(h1 + b_ref[3:4, :])                                     # (nb, 512)

    # ---- fc2: single block-diagonal (512,512) matmul (dropout = eval identity)
    h2 = lrelu(dot(h1, wf2_ref[...]) + b_ref[4:5, :])                  # (nb, 512)

    # ---- fc3 + 2-class softmax: softmax([l0,l1]) == sigmoid(l0-l1).
    # wfd columns produce the logit differences directly:
    #   lane 2k   -> l0-l1 of view row k,  lane 2k+1 -> l1-l0.
    d = dot(h2, wfd_ref[...]) + b_ref[5:6, 0:128]                      # (nb, 128)
    o_ref[...] = (1.0 / (1.0 + jnp.exp(-d))).astype(o_ref.dtype)


def _fused_call(xin, ops, nb, n_pad):
    L, L2, L3 = 16, 8, 4
    const2 = lambda i: (0, 0)
    const3 = lambda i: (0, 0, 0)
    operands = (xin, ops["w1"], ops["w2"], ops["w3"], ops["m1"],
                ops["wf2bd"], ops["wfd"], ops["bias"])
    in_specs = [
        pl.BlockSpec((nb * L, 12), lambda i: (i, 0)),        # streamed per step
        pl.BlockSpec(ops["w1"].shape, const2),               # weights: constant
        pl.BlockSpec(ops["w2"].shape, const3),               # index_map => loaded
        pl.BlockSpec(ops["w3"].shape, const3),               # once, VMEM-resident
        pl.BlockSpec(ops["m1"].shape, const3),
        pl.BlockSpec(ops["wf2bd"].shape, const2),
        pl.BlockSpec(ops["wfd"].shape, const2),
        pl.BlockSpec(ops["bias"].shape, const2),
    ]
    return pl.pallas_call(
        _fused_forward_kernel,
        grid=(n_pad // nb,),
        in_specs=in_specs,
        out_specs=pl.BlockSpec((nb, 128), lambda i: (i, 0)),
        out_shape=jax.ShapeDtypeStruct((n_pad, 128), jnp.float32),
        scratch_shapes=[
            pltpu.VMEM((nb * L + 8, 64), jnp.float32),       # padded conv1 acts
            pltpu.VMEM((nb * L2 + 8, 64), jnp.float32),      # padded conv2 acts
            pltpu.VMEM((nb * L3, 128), jnp.float32),         # conv3 acts
        ],
        compiler_params=pltpu.CompilerParams(
            dimension_semantics=("parallel",)),               # v7x: both TCs
    )(*operands)


# ---------------------------------------------------------------------------
# Parameters (deterministic synthetic init, PyTorch-default-like uniform)
# ---------------------------------------------------------------------------
def init_params(key):
    def uni(k, shape, fan_in):
        bound = 1.0 / jnp.sqrt(float(fan_in))
        return jax.random.uniform(k, shape, jnp.float32, -bound, bound)

    ks = jax.random.split(key, 12)
    p = {}
    p["w1"] = uni(ks[0], (12, 64), 12)            # conv1 (C_in, C_out), k=1
    p["b1"] = uni(ks[1], (64,), 12)
    p["w2"] = uni(ks[2], (3, 64, 64), 64 * 3)     # conv2 per-tap (t, C_in, C_out)
    p["b2"] = uni(ks[3], (64,), 64 * 3)
    p["w3"] = uni(ks[4], (3, 64, 128), 64 * 3)    # conv3 per-tap
    p["b3"] = uni(ks[5], (128,), 64 * 3)
    p["wf1"] = uni(ks[6], (128, 128), 128)        # fc1 (in, out)
    p["bf1"] = uni(ks[7], (128,), 128)
    p["wf2"] = uni(ks[8], (128, 100), 128)        # fc2 (in, out)
    p["bf2"] = uni(ks[9], (100,), 128)
    p["wf3"] = uni(ks[10], (100, 2), 100)         # fc3 (in, out)
    p["bf3"] = uni(ks[11], (2,), 100)
    return p


def pack_operands(p):
    """Batch-independent, MXU-friendly operands (built once, host side)."""
    f32 = jnp.float32
    ops = {"w1": p["w1"], "w2": p["w2"], "w3": p["w3"]}

    # fc1 with the torch view(-1,128) permutation absorbed, split per conv3
    # output position o:  m1[o, 32k + c, k*128 + d] = wf1[4c + o, d]
    m1 = jnp.zeros((4, 128, 512), f32)
    for o in range(4):
        blk = p["wf1"][o::4, :]                       # (32, 128)
        for k in range(4):
            m1 = m1.at[o, 32 * k:32 * (k + 1), 128 * k:128 * (k + 1)].set(blk)
    ops["m1"] = m1

    # fc2 block-diagonal over the 4 packed view rows (cols padded 100 -> 128)
    w2bd = jnp.zeros((512, 512), f32)
    for k in range(4):
        w2bd = w2bd.at[128 * k:128 * k + 128, 128 * k:128 * k + 100].set(p["wf2"])
    ops["wf2bd"] = w2bd

    # fc3 folded with the 2-class softmax: columns output logit differences.
    dcol = p["wf3"][:, 0] - p["wf3"][:, 1]            # (100,)
    wd = jnp.zeros((512, 128), f32)
    for k in range(4):
        wd = wd.at[128 * k:128 * k + 100, 2 * k].set(dcol)
        wd = wd.at[128 * k:128 * k + 100, 2 * k + 1].set(-dcol)
    ops["wfd"] = wd

    # all biases packed into ONE (8, 512) buffer (single small DMA)
    bias = jnp.zeros((8, 512), f32)
    bias = bias.at[0, :64].set(p["b1"])
    bias = bias.at[1, :64].set(p["b2"])
    bias = bias.at[2, :128].set(p["b3"])
    bias = bias.at[3, :].set(jnp.tile(p["bf1"], 4))
    bf2p = jnp.zeros((128,), f32).at[:100].set(p["bf2"])
    bias = bias.at[4, :].set(jnp.tile(bf2p, 4))
    db = p["bf3"][0] - p["bf3"][1]
    row5 = jnp.zeros((512,), f32)
    for k in range(4):
        row5 = row5.at[2 * k].set(db).at[2 * k + 1].set(-db)
    bias = bias.at[5, :].set(row5)
    ops["bias"] = bias
    return ops


# ---------------------------------------------------------------------------
# Forward pass (mirrors classify_conv_model.forward) — one pallas_call
# ---------------------------------------------------------------------------
@partial(jax.jit, static_argnames=("block_n",))
def forward(x, ops, block_n=8):
    # For large batches pass block_n=32/64 to fill the 256-row MXUs (v6e/v7x).
    N, C, L = x.shape                                 # NCL (PyTorch layout)
    assert C == 12 and L == 16, "packing assumes Conv1d(12,...) with L=16"
    nb = block_n
    n_pad = -(-N // nb) * nb

    # tiny input prep (1.5 KB): NCL -> (N*L, C), pad batch to a block multiple
    xin = jnp.transpose(x, (0, 2, 1)).reshape(N * L, C)
    if n_pad != N:
        xin = jnp.pad(xin, ((0, (n_pad - N) * L), (0, 0)))

    out = _fused_call(xin, ops, nb, n_pad)            # (n_pad, 128) dense slab
    # lanes 2k / 2k+1 = class 0 / 1 of view row k  ->  (N*4, 2) in torch order
    return out[:N, :8].reshape(N * 4, 2)


# ---------------------------------------------------------------------------
# Pure-JAX reference (same logical weights) for correctness checking
# ---------------------------------------------------------------------------
def reference_forward(x, p):
    lrelu = lambda v: jnp.where(v >= 0.0, v, NEG_SLOPE * v)
    N, C, L = x.shape
    a = jnp.transpose(x, (0, 2, 1))                                   # (N, L, 12)
    y1 = lrelu(jnp.einsum("nlc,cd->nld", a, p["w1"]) + p["b1"])       # (N, L, 64)

    def conv(y, w, b, l_out):
        yp = jnp.pad(y, ((0, 0), (1, 1), (0, 0)))
        acc = 0.0
        for t in range(3):
            acc = acc + jnp.einsum("nld,de->nle", yp[:, t:t + 2 * l_out:2, :], w[t])
        return lrelu(acc + b)

    l2 = (L + 2 - 3) // 2 + 1
    l3 = (l2 + 2 - 3) // 2 + 1
    y2 = conv(y1, p["w2"], p["b2"], l2)                               # (N, l2, 64)
    y3 = conv(y2, p["w3"], p["b3"], l3)                               # (N, l3, 128)
    f = jnp.transpose(y3, (0, 2, 1)).reshape(-1, 128)                 # torch view
    h1 = lrelu(f @ p["wf1"] + p["bf1"])
    h2 = lrelu(h1 @ p["wf2"] + p["bf2"])
    logits = h2 @ p["wf3"] + p["bf3"]
    return jax.nn.softmax(logits, axis=-1)


if __name__ == "__main__":
    key = jax.random.PRNGKey(0)
    k_x, k_p = jax.random.split(key)

    # Input consistent with Conv1d(12, ...): (batch=2, channels=12, length=16)
    x = jax.random.normal(k_x, (2, 12, 16), jnp.float32)
    params = init_params(k_p)
    ops = pack_operands(params)

    out = jax.block_until_ready(forward(x, ops))
    ref = jax.block_until_ready(reference_forward(x, params))

    assert out.shape == (2 * 4, 2)                          # L=16 -> L2=8 -> L3=4
    assert jnp.allclose(jnp.sum(out, axis=-1), 1.0, atol=1e-5)
    assert jnp.allclose(out, ref, atol=2e-3), float(jnp.max(jnp.abs(out - ref)))
    print("KERNEL_OK")
</pallas_src>

<mosaic_0001>
module attributes {stable_mosaic.version = 11 : i64} {
  func.func @_fused_forward_kernel(%arg0: i32, %arg1: memref<128x12xf32, #tpu.memory_space<vmem>>, %arg2: memref<12x64xf32, #tpu.memory_space<vmem>>, %arg3: memref<3x64x64xf32, #tpu.memory_space<vmem>>, %arg4: memref<3x64x128xf32, #tpu.memory_space<vmem>>, %arg5: memref<4x128x512xf32, #tpu.memory_space<vmem>>, %arg6: memref<512x512xf32, #tpu.memory_space<vmem>>, %arg7: memref<512x128xf32, #tpu.memory_space<vmem>>, %arg8: memref<8x512xf32, #tpu.memory_space<vmem>>, %arg9: memref<8x128xf32, #tpu.memory_space<vmem>>, %arg10: memref<136x64xf32, #tpu.memory_space<vmem>>, %arg11: memref<72x64xf32, #tpu.memory_space<vmem>>, %arg12: memref<32x128xf32, #tpu.memory_space<vmem>>) attributes {dimension_semantics = [#tpu.dimension_semantics<parallel>], iteration_bounds = array<i64: 1>, scalar_prefetch = 0 : i64, scratch_operands = 3 : i64, tpu.core_type = #tpu.core_type<tc>, window_params = [{transform_indices = @transform_0, window_bounds = array<i64: 128, 12>}, {pipeline_mode = #tpu.pipeline_mode<synchronous>, transform_indices = @transform_1, window_bounds = array<i64: 12, 64>}, {pipeline_mode = #tpu.pipeline_mode<synchronous>, transform_indices = @transform_2, window_bounds = array<i64: 3, 64, 64>}, {pipeline_mode = #tpu.pipeline_mode<synchronous>, transform_indices = @transform_3, window_bounds = array<i64: 3, 64, 128>}, {pipeline_mode = #tpu.pipeline_mode<synchronous>, transform_indices = @transform_4, window_bounds = array<i64: 4, 128, 512>}, {pipeline_mode = #tpu.pipeline_mode<synchronous>, transform_indices = @transform_5, window_bounds = array<i64: 512, 512>}, {pipeline_mode = #tpu.pipeline_mode<synchronous>, transform_indices = @transform_6, window_bounds = array<i64: 512, 128>}, {pipeline_mode = #tpu.pipeline_mode<synchronous>, transform_indices = @transform_7, window_bounds = array<i64: 8, 512>}, {transform_indices = @transform_8, window_bounds = array<i64: 8, 128>}]} {
    %c0 = arith.constant 0 : index
    %c0_0 = arith.constant 0 : index
    %0 = vector.load %arg1[%c0, %c0_0] : memref<128x12xf32, #tpu.memory_space<vmem>>, vector<128x12xf32>
    %c0_1 = arith.constant 0 : index
    %c0_2 = arith.constant 0 : index
    %1 = vector.load %arg2[%c0_1, %c0_2] : memref<12x64xf32, #tpu.memory_space<vmem>>, vector<12x64xf32>
    %cst = arith.constant dense<0.000000e+00> : vector<128x64xf32>
    %2 = tpu.matmul %0, %1, %cst {dimension_numbers = #tpu.dot_dimension_numbers<[1], [0], [0], [1], [0, 0, 1, 1], [], []>} : vector<128x12xf32>, vector<12x64xf32>, vector<128x64xf32> -> vector<128x64xf32>
    %c0_3 = arith.constant 0 : index
    %c0_4 = arith.constant 0 : index
    %3 = vector.load %arg8[%c0_3, %c0_4] : memref<8x512xf32, #tpu.memory_space<vmem>>, vector<1x64xf32>
    %4 = vector.broadcast %3 : vector<1x64xf32> to vector<128x64xf32>
    %5 = arith.addf %2, %4 : vector<128x64xf32>
    %cst_5 = arith.constant 0.000000e+00 : f32
    %6 = vector.broadcast %cst_5 : f32 to vector<128x64xf32>
    %7 = arith.cmpf oge, %5, %6 : vector<128x64xf32>
    %cst_6 = arith.constant 0.00999999977 : f32
    %8 = vector.broadcast %cst_6 : f32 to vector<128x64xf32>
    %9 = arith.mulf %8, %5 : vector<128x64xf32>
    %10 = arith.select %7, %5, %9 : vector<128x64xi1>, vector<128x64xf32>
    %cst_7 = arith.constant 0.000000e+00 : f32
    %11 = vector.broadcast %cst_7 : f32 to vector<8x64xf32>
    %c0_8 = arith.constant 0 : index
    %c0_9 = arith.constant 0 : index
    %12 = vector.load %arg10[%c0_8, %c0_9] : memref<136x64xf32, #tpu.memory_space<vmem>>, vector<8x64xf32>
    tpu.vector_store %arg10[%c0_8, %c0_9], %11 {strides = array<i32>} : memref<136x64xf32, #tpu.memory_space<vmem>>, vector<8x64xf32>,
    %c8 = arith.constant 8 : index
    %c0_10 = arith.constant 0 : index
    %13 = vector.load %arg10[%c8, %c0_10] : memref<136x64xf32, #tpu.memory_space<vmem>>, vector<128x64xf32>
    tpu.vector_store %arg10[%c8, %c0_10], %10 {strides = array<i32>} : memref<136x64xf32, #tpu.memory_space<vmem>>, vector<128x64xf32>,
    %c1 = arith.constant 1 : index
    %c0_11 = arith.constant 0 : index
    %14 = vector.load %arg8[%c1, %c0_11] : memref<8x512xf32, #tpu.memory_space<vmem>>, vector<1x64xf32>
    %c7 = arith.constant 7 : index
    %c0_12 = arith.constant 0 : index
    %15 = tpu.strided_load %arg10[%c7, %c0_12] {strides = array<i32: 2, 1>} : memref<136x64xf32, #tpu.memory_space<vmem>>, vector<64x64xf32>
    %c8_13 = arith.constant 8 : index
    %c0_14 = arith.constant 0 : index
    %16 = tpu.strided_load %arg10[%c8_13, %c0_14] {strides = array<i32: 2, 1>} : memref<136x64xf32, #tpu.memory_space<vmem>>, vector<64x64xf32>
    %c9 = arith.constant 9 : index
    %c0_15 = arith.constant 0 : index
    %17 = tpu.strided_load %arg10[%c9, %c0_15] {strides = array<i32: 2, 1>} : memref<136x64xf32, #tpu.memory_space<vmem>>, vector<64x64xf32>
    %18 = tpu.iota {dimensions = array<i32: 0>} : vector<64x1xi32>
    %c7_i32 = arith.constant 7 : i32
    %19 = vector.broadcast %c7_i32 : i32 to vector<64x1xi32>
    %20 = arith.andi %18, %19 : vector<64x1xi32>
    %c0_i32 = arith.constant 0 : i32
    %21 = vector.broadcast %c0_i32 : i32 to vector<64x1xi32>
    %22 = arith.cmpi ne, %20, %21 : vector<64x1xi32>
    %cst_16 = arith.constant 0.000000e+00 : f32
    %23 = vector.shape_cast %22 : vector<64x1xi1> to vector<64x1xi1>
    %24 = vector.broadcast %23 : vector<64x1xi1> to vector<64x64xi1>
    %25 = vector.broadcast %cst_16 : f32 to vector<64x64xf32>
    %26 = arith.select %24, %15, %25 : vector<64x64xi1>, vector<64x64xf32>
    %c0_17 = arith.constant 0 : index
    %c0_18 = arith.constant 0 : index
    %c0_19 = arith.constant 0 : index
    %27 = vector.load %arg3[%c0_17, %c0_18, %c0_19] : memref<3x64x64xf32, #tpu.memory_space<vmem>>, vector<1x64x64xf32>
    %28 = vector.shape_cast %27 : vector<1x64x64xf32> to vector<64x64xf32>
    %cst_20 = arith.constant dense<0.000000e+00> : vector<64x64xf32>
    %29 = tpu.matmul %26, %28, %cst_20 {dimension_numbers = #tpu.dot_dimension_numbers<[1], [0], [0], [1], [0, 0, 1, 1], [], []>} : vector<64x64xf32>, vector<64x64xf32>, vector<64x64xf32> -> vector<64x64xf32>
    %c1_21 = arith.constant 1 : index
    %c0_22 = arith.constant 0 : index
    %c0_23 = arith.constant 0 : index
    %30 = vector.load %arg3[%c1_21, %c0_22, %c0_23] : memref<3x64x64xf32, #tpu.memory_space<vmem>>, vector<1x64x64xf32>
    %31 = vector.shape_cast %30 : vector<1x64x64xf32> to vector<64x64xf32>
    %cst_24 = arith.constant dense<0.000000e+00> : vector<64x64xf32>
    %32 = tpu.matmul %16, %31, %cst_24 {dimension_numbers = #tpu.dot_dimension_numbers<[1], [0], [0], [1], [0, 0, 1, 1], [], []>} : vector<64x64xf32>, vector<64x64xf32>, vector<64x64xf32> -> vector<64x64xf32>
    %33 = arith.addf %29, %32 : vector<64x64xf32>
    %c2 = arith.constant 2 : index
    %c0_25 = arith.constant 0 : index
    %c0_26 = arith.constant 0 : index
    %34 = vector.load %arg3[%c2, %c0_25, %c0_26] : memref<3x64x64xf32, #tpu.memory_space<vmem>>, vector<1x64x64xf32>
    %35 = vector.shape_cast %34 : vector<1x64x64xf32> to vector<64x64xf32>
    %cst_27 = arith.constant dense<0.000000e+00> : vector<64x64xf32>
    %36 = tpu.matmul %17, %35, %cst_27 {dimension_numbers = #tpu.dot_dimension_numbers<[1], [0], [0], [1], [0, 0, 1, 1], [], []>} : vector<64x64xf32>, vector<64x64xf32>, vector<64x64xf32> -> vector<64x64xf32>
    %37 = arith.addf %33, %36 : vector<64x64xf32>
    %38 = vector.broadcast %14 : vector<1x64xf32> to vector<64x64xf32>
    %39 = arith.addf %37, %38 : vector<64x64xf32>
    %cst_28 = arith.constant 0.000000e+00 : f32
    %40 = vector.broadcast %cst_28 : f32 to vector<64x64xf32>
    %41 = arith.cmpf oge, %39, %40 : vector<64x64xf32>
    %cst_29 = arith.constant 0.00999999977 : f32
    %42 = vector.broadcast %cst_29 : f32 to vector<64x64xf32>
    %43 = arith.mulf %42, %39 : vector<64x64xf32>
    %44 = arith.select %41, %39, %43 : vector<64x64xi1>, vector<64x64xf32>
    %cst_30 = arith.constant 0.000000e+00 : f32
    %45 = vector.broadcast %cst_30 : f32 to vector<8x64xf32>
    %c0_31 = arith.constant 0 : index
    %c0_32 = arith.constant 0 : index
    %46 = vector.load %arg11[%c0_31, %c0_32] : memref<72x64xf32, #tpu.memory_space<vmem>>, vector<8x64xf32>
    tpu.vector_store %arg11[%c0_31, %c0_32], %45 {strides = array<i32>} : memref<72x64xf32, #tpu.memory_space<vmem>>, vector<8x64xf32>,
    %c8_33 = arith.constant 8 : index
    %c0_34 = arith.constant 0 : index
    %47 = vector.load %arg11[%c8_33, %c0_34] : memref<72x64xf32, #tpu.memory_space<vmem>>, vector<64x64xf32>
    tpu.vector_store %arg11[%c8_33, %c0_34], %44 {strides = array<i32>} : memref<72x64xf32, #tpu.memory_space<vmem>>, vector<64x64xf32>,
    %c2_35 = arith.constant 2 : index
    %c0_36 = arith.constant 0 : index
    %48 = vector.load %arg8[%c2_35, %c0_36] : memref<8x512xf32, #tpu.memory_space<vmem>>, vector<1x128xf32>
    %c7_37 = arith.constant 7 : index
    %c0_38 = arith.constant 0 : index
    %49 = tpu.strided_load %arg11[%c7_37, %c0_38] {strides = array<i32: 2, 1>} : memref<72x64xf32, #tpu.memory_space<vmem>>, vector<32x64xf32>
    %c8_39 = arith.constant 8 : index
    %c0_40 = arith.constant 0 : index
    %50 = tpu.strided_load %arg11[%c8_39, %c0_40] {strides = array<i32: 2, 1>} : memref<72x64xf32, #tpu.memory_space<vmem>>, vector<32x64xf32>
    %c9_41 = arith.constant 9 : index
    %c0_42 = arith.constant 0 : index
    %51 = tpu.strided_load %arg11[%c9_41, %c0_42] {strides = array<i32: 2, 1>} : memref<72x64xf32, #tpu.memory_space<vmem>>, vector<32x64xf32>
    %52 = tpu.iota {dimensions = array<i32: 0>} : vector<32x1xi32>
    %c3_i32 = arith.constant 3 : i32
    %53 = vector.broadcast %c3_i32 : i32 to vector<32x1xi32>
    %54 = arith.andi %52, %53 : vector<32x1xi32>
    %c0_i32_43 = arith.constant 0 : i32
    %55 = vector.broadcast %c0_i32_43 : i32 to vector<32x1xi32>
    %56 = arith.cmpi ne, %54, %55 : vector<32x1xi32>
    %cst_44 = arith.constant 0.000000e+00 : f32
    %57 = vector.shape_cast %56 : vector<32x1xi1> to vector<32x1xi1>
    %58 = vector.broadcast %57 : vector<32x1xi1> to vector<32x64xi1>
    %59 = vector.broadcast %cst_44 : f32 to vector<32x64xf32>
    %60 = arith.select %58, %49, %59 : vector<32x64xi1>, vector<32x64xf32>
    %c0_45 = arith.constant 0 : index
    %c0_46 = arith.constant 0 : index
    %c0_47 = arith.constant 0 : index
    %61 = vector.load %arg4[%c0_45, %c0_46, %c0_47] : memref<3x64x128xf32, #tpu.memory_space<vmem>>, vector<1x64x128xf32>
    %62 = vector.shape_cast %61 : vector<1x64x128xf32> to vector<64x128xf32>
    %cst_48 = arith.constant dense<0.000000e+00> : vector<32x128xf32>
    %63 = tpu.matmul %60, %62, %cst_48 {dimension_numbers = #tpu.dot_dimension_numbers<[1], [0], [0], [1], [0, 0, 1, 1], [], []>} : vector<32x64xf32>, vector<64x128xf32>, vector<32x128xf32> -> vector<32x128xf32>
    %c1_49 = arith.constant 1 : index
    %c0_50 = arith.constant 0 : index
    %c0_51 = arith.constant 0 : index
    %64 = vector.load %arg4[%c1_49, %c0_50, %c0_51] : memref<3x64x128xf32, #tpu.memory_space<vmem>>, vector<1x64x128xf32>
    %65 = vector.shape_cast %64 : vector<1x64x128xf32> to vector<64x128xf32>
    %cst_52 = arith.constant dense<0.000000e+00> : vector<32x128xf32>
    %66 = tpu.matmul %50, %65, %cst_52 {dimension_numbers = #tpu.dot_dimension_numbers<[1], [0], [0], [1], [0, 0, 1, 1], [], []>} : vector<32x64xf32>, vector<64x128xf32>, vector<32x128xf32> -> vector<32x128xf32>
    %67 = arith.addf %63, %66 : vector<32x128xf32>
    %c2_53 = arith.constant 2 : index
    %c0_54 = arith.constant 0 : index
    %c0_55 = arith.constant 0 : index
    %68 = vector.load %arg4[%c2_53, %c0_54, %c0_55] : memref<3x64x128xf32, #tpu.memory_space<vmem>>, vector<1x64x128xf32>
    %69 = vector.shape_cast %68 : vector<1x64x128xf32> to vector<64x128xf32>
    %cst_56 = arith.constant dense<0.000000e+00> : vector<32x128xf32>
    %70 = tpu.matmul %51, %69, %cst_56 {dimension_numbers = #tpu.dot_dimension_numbers<[1], [0], [0], [1], [0, 0, 1, 1], [], []>} : vector<32x64xf32>, vector<64x128xf32>, vector<32x128xf32> -> vector<32x128xf32>
    %71 = arith.addf %67, %70 : vector<32x128xf32>
    %72 = vector.broadcast %48 : vector<1x128xf32> to vector<32x128xf32>
    %73 = arith.addf %71, %72 : vector<32x128xf32>
    %cst_57 = arith.constant 0.000000e+00 : f32
    %74 = vector.broadcast %cst_57 : f32 to vector<32x128xf32>
    %75 = arith.cmpf oge, %73, %74 : vector<32x128xf32>
    %cst_58 = arith.constant 0.00999999977 : f32
    %76 = vector.broadcast %cst_58 : f32 to vector<32x128xf32>
    %77 = arith.mulf %76, %73 : vector<32x128xf32>
    %78 = arith.select %75, %73, %77 : vector<32x128xi1>, vector<32x128xf32>
    %c0_59 = arith.constant 0 : index
    %c0_60 = arith.constant 0 : index
    %79 = vector.load %arg12[%c0_59, %c0_60] : memref<32x128xf32, #tpu.memory_space<vmem>>, vector<32x128xf32>
    tpu.vector_store %arg12[%c0_59, %c0_60], %78 {strides = array<i32>} : memref<32x128xf32, #tpu.memory_space<vmem>>, vector<32x128xf32>,
    %c0_61 = arith.constant 0 : index
    %c0_62 = arith.constant 0 : index
    %80 = tpu.strided_load %arg12[%c0_61, %c0_62] {strides = array<i32: 4, 1>} : memref<32x128xf32, #tpu.memory_space<vmem>>, vector<8x128xf32>
    %c0_63 = arith.constant 0 : index
    %c0_64 = arith.constant 0 : index
    %c0_65 = arith.constant 0 : index
    %81 = vector.load %arg5[%c0_63, %c0_64, %c0_65] : memref<4x128x512xf32, #tpu.memory_space<vmem>>, vector<1x128x512xf32>
    %82 = vector.shape_cast %81 : vector<1x128x512xf32> to vector<128x512xf32>
    %cst_66 = arith.constant dense<0.000000e+00> : vector<8x512xf32>
    %83 = tpu.matmul %80, %82, %cst_66 {dimension_numbers = #tpu.dot_dimension_numbers<[1], [0], [0], [1], [0, 0, 1, 1], [], []>} : vector<8x128xf32>, vector<128x512xf32>, vector<8x512xf32> -> vector<8x512xf32>
    %c1_67 = arith.constant 1 : index
    %c0_68 = arith.constant 0 : index
    %84 = tpu.strided_load %arg12[%c1_67, %c0_68] {strides = array<i32: 4, 1>} : memref<32x128xf32, #tpu.memory_space<vmem>>, vector<8x128xf32>
    %c1_69 = arith.constant 1 : index
    %c0_70 = arith.constant 0 : index
    %c0_71 = arith.constant 0 : index
    %85 = vector.load %arg5[%c1_69, %c0_70, %c0_71] : memref<4x128x512xf32, #tpu.memory_space<vmem>>, vector<1x128x512xf32>
    %86 = vector.shape_cast %85 : vector<1x128x512xf32> to vector<128x512xf32>
    %cst_72 = arith.constant dense<0.000000e+00> : vector<8x512xf32>
    %87 = tpu.matmul %84, %86, %cst_72 {dimension_numbers = #tpu.dot_dimension_numbers<[1], [0], [0], [1], [0, 0, 1, 1], [], []>} : vector<8x128xf32>, vector<128x512xf32>, vector<8x512xf32> -> vector<8x512xf32>
    %88 = arith.addf %83, %87 : vector<8x512xf32>
    %c2_73 = arith.constant 2 : index
    %c0_74 = arith.constant 0 : index
    %89 = tpu.strided_load %arg12[%c2_73, %c0_74] {strides = array<i32: 4, 1>} : memref<32x128xf32, #tpu.memory_space<vmem>>, vector<8x128xf32>
    %c2_75 = arith.constant 2 : index
    %c0_76 = arith.constant 0 : index
    %c0_77 = arith.constant 0 : index
    %90 = vector.load %arg5[%c2_75, %c0_76, %c0_77] : memref<4x128x512xf32, #tpu.memory_space<vmem>>, vector<1x128x512xf32>
    %91 = vector.shape_cast %90 : vector<1x128x512xf32> to vector<128x512xf32>
    %cst_78 = arith.constant dense<0.000000e+00> : vector<8x512xf32>
    %92 = tpu.matmul %89, %91, %cst_78 {dimension_numbers = #tpu.dot_dimension_numbers<[1], [0], [0], [1], [0, 0, 1, 1], [], []>} : vector<8x128xf32>, vector<128x512xf32>, vector<8x512xf32> -> vector<8x512xf32>
    %c3 = arith.constant 3 : index
    %c0_79 = arith.constant 0 : index
    %93 = tpu.strided_load %arg12[%c3, %c0_79] {strides = array<i32: 4, 1>} : memref<32x128xf32, #tpu.memory_space<vmem>>, vector<8x128xf32>
    %c3_80 = arith.constant 3 : index
    %c0_81 = arith.constant 0 : index
    %c0_82 = arith.constant 0 : index
    %94 = vector.load %arg5[%c3_80, %c0_81, %c0_82] : memref<4x128x512xf32, #tpu.memory_space<vmem>>, vector<1x128x512xf32>
    %95 = vector.shape_cast %94 : vector<1x128x512xf32> to vector<128x512xf32>
    %cst_83 = arith.constant dense<0.000000e+00> : vector<8x512xf32>
    %96 = tpu.matmul %93, %95, %cst_83 {dimension_numbers = #tpu.dot_dimension_numbers<[1], [0], [0], [1], [0, 0, 1, 1], [], []>} : vector<8x128xf32>, vector<128x512xf32>, vector<8x512xf32> -> vector<8x512xf32>
    %97 = arith.addf %92, %96 : vector<8x512xf32>
    %98 = arith.addf %88, %97 : vector<8x512xf32>
    %c3_84 = arith.constant 3 : index
    %c0_85 = arith.constant 0 : index
    %99 = vector.load %arg8[%c3_84, %c0_85] : memref<8x512xf32, #tpu.memory_space<vmem>>, vector<1x512xf32>
    %100 = vector.broadcast %99 : vector<1x512xf32> to vector<8x512xf32>
    %101 = arith.addf %98, %100 : vector<8x512xf32>
    %cst_86 = arith.constant 0.000000e+00 : f32
    %102 = vector.broadcast %cst_86 : f32 to vector<8x512xf32>
    %103 = arith.cmpf oge, %101, %102 : vector<8x512xf32>
    %cst_87 = arith.constant 0.00999999977 : f32
    %104 = vector.broadcast %cst_87 : f32 to vector<8x512xf32>
    %105 = arith.mulf %104, %101 : vector<8x512xf32>
    %106 = arith.select %103, %101, %105 : vector<8x512xi1>, vector<8x512xf32>
    %c0_88 = arith.constant 0 : index
    %c0_89 = arith.constant 0 : index
    %107 = vector.load %arg6[%c0_88, %c0_89] : memref<512x512xf32, #tpu.memory_space<vmem>>, vector<512x512xf32>
    %cst_90 = arith.constant dense<0.000000e+00> : vector<8x512xf32>
    %108 = tpu.matmul %106, %107, %cst_90 {dimension_numbers = #tpu.dot_dimension_numbers<[1], [0], [0], [1], [0, 0, 1, 1], [], []>} : vector<8x512xf32>, vector<512x512xf32>, vector<8x512xf32> -> vector<8x512xf32>
    %c4 = arith.constant 4 : index
    %c0_91 = arith.constant 0 : index
    %109 = vector.load %arg8[%c4, %c0_91] : memref<8x512xf32, #tpu.memory_space<vmem>>, vector<1x512xf32>
    %110 = vector.broadcast %109 : vector<1x512xf32> to vector<8x512xf32>
    %111 = arith.addf %108, %110 : vector<8x512xf32>
    %cst_92 = arith.constant 0.000000e+00 : f32
    %112 = vector.broadcast %cst_92 : f32 to vector<8x512xf32>
    %113 = arith.cmpf oge, %111, %112 : vector<8x512xf32>
    %cst_93 = arith.constant 0.00999999977 : f32
    %114 = vector.broadcast %cst_93 : f32 to vector<8x512xf32>
    %115 = arith.mulf %114, %111 : vector<8x512xf32>
    %116 = arith.select %113, %111, %115 : vector<8x512xi1>, vector<8x512xf32>
    %c0_94 = arith.constant 0 : index
    %c0_95 = arith.constant 0 : index
    %117 = vector.load %arg7[%c0_94, %c0_95] : memref<512x128xf32, #tpu.memory_space<vmem>>, vector<512x128xf32>
    %cst_96 = arith.constant dense<0.000000e+00> : vector<8x128xf32>
    %118 = tpu.matmul %116, %117, %cst_96 {dimension_numbers = #tpu.dot_dimension_numbers<[1], [0], [0], [1], [0, 0, 1, 1], [], []>} : vector<8x512xf32>, vector<512x128xf32>, vector<8x128xf32> -> vector<8x128xf32>
    %c5 = arith.constant 5 : index
    %c0_97 = arith.constant 0 : index
    %119 = vector.load %arg8[%c5, %c0_97] : memref<8x512xf32, #tpu.memory_space<vmem>>, vector<1x128xf32>
    %120 = vector.broadcast %119 : vector<1x128xf32> to vector<8x128xf32>
    %121 = arith.addf %118, %120 : vector<8x128xf32>
    %cst_98 = arith.constant 0.000000e+00 : f32
    %122 = vector.broadcast %cst_98 : f32 to vector<8x128xf32>
    %123 = arith.subf %122, %121 : vector<8x128xf32>
    %124 = math.exp %123 : vector<8x128xf32>
    %cst_99 = arith.constant 1.000000e+00 : f32
    %125 = vector.broadcast %cst_99 : f32 to vector<8x128xf32>
    %126 = arith.addf %125, %124 : vector<8x128xf32>
    %cst_100 = arith.constant 1.000000e+00 : f32
    %127 = vector.broadcast %cst_100 : f32 to vector<8x128xf32>
    %128 = arith.divf %127, %126 : vector<8x128xf32>
    %c0_101 = arith.constant 0 : index
    %c0_102 = arith.constant 0 : index
    %129 = vector.load %arg9[%c0_101, %c0_102] : memref<8x128xf32, #tpu.memory_space<vmem>>, vector<8x128xf32>
    tpu.vector_store %arg9[%c0_101, %c0_102], %128 {strides = array<i32>} : memref<8x128xf32, #tpu.memory_space<vmem>>, vector<8x128xf32>,
    return
  }
  func.func @transform_0(%arg0: i32) -> (i32, i32) {
    %c0_i32 = arith.constant 0 : i32
    %c0_i32_0 = arith.constant 0 : i32
    return %arg0, %c0_i32 : i32, i32
  }
  func.func @transform_1(%arg0: i32) -> (i32, i32) {
    %c0_i32 = arith.constant 0 : i32
    %c0_i32_0 = arith.constant 0 : i32
    %c0_i32_1 = arith.constant 0 : i32
    return %c0_i32, %c0_i32_0 : i32, i32
  }
  func.func @transform_2(%arg0: i32) -> (i32, i32, i32) {
    %c0_i32 = arith.constant 0 : i32
    %c0_i32_0 = arith.constant 0 : i32
    %c0_i32_1 = arith.constant 0 : i32
    %c0_i32_2 = arith.constant 0 : i32
    return %c0_i32, %c0_i32_0, %c0_i32_1 : i32, i32, i32
  }
  func.func @transform_3(%arg0: i32) -> (i32, i32, i32) {
    %c0_i32 = arith.constant 0 : i32
    %c0_i32_0 = arith.constant 0 : i32
    %c0_i32_1 = arith.constant 0 : i32
    %c0_i32_2 = arith.constant 0 : i32
    return %c0_i32, %c0_i32_0, %c0_i32_1 : i32, i32, i32
  }
  func.func @transform_4(%arg0: i32) -> (i32, i32, i32) {
    %c0_i32 = arith.constant 0 : i32
    %c0_i32_0 = arith.constant 0 : i32
    %c0_i32_1 = arith.constant 0 : i32
    %c0_i32_2 = arith.constant 0 : i32
    return %c0_i32, %c0_i32_0, %c0_i32_1 : i32, i32, i32
  }
  func.func @transform_5(%arg0: i32) -> (i32, i32) {
    %c0_i32 = arith.constant 0 : i32
    %c0_i32_0 = arith.constant 0 : i32
    %c0_i32_1 = arith.constant 0 : i32
    return %c0_i32, %c0_i32_0 : i32, i32
  }
  func.func @transform_6(%arg0: i32) -> (i32, i32) {
    %c0_i32 = arith.constant 0 : i32
    %c0_i32_0 = arith.constant 0 : i32
    %c0_i32_1 = arith.constant 0 : i32
    return %c0_i32, %c0_i32_0 : i32, i32
  }
  func.func @transform_7(%arg0: i32) -> (i32, i32) {
    %c0_i32 = arith.constant 0 : i32
    %c0_i32_0 = arith.constant 0 : i32
    %c0_i32_1 = arith.constant 0 : i32
    return %c0_i32, %c0_i32_0 : i32, i32
  }
  func.func @transform_8(%arg0: i32) -> (i32, i32) {
    %c0_i32 = arith.constant 0 : i32
    %c0_i32_0 = arith.constant 0 : i32
    return %arg0, %c0_i32 : i32, i32
  }
}

</mosaic_0001>

<bundles_post_ra>
// kernel: forward.1
= control target key start
LH: loop header
LB: loop body
LE: loop exit
PB: predicated region body
PF: predicated region fallthrough
CT: control target
= control target key end

     0   :  { %13 = vsyncpa [#allocation6], 0  ;;  %s4710_s0 = inlined_call_operand.vmem [shape: f32[128,12], index: 0, kind: input, shape index: {}]   ;;  %s4711_s1 = inlined_call_operand.hbm [shape: f32[12,64], index: 1, kind: input, shape index: {}]   ;;  %s4712_s2 = inlined_call_operand.vmem [shape: f32[3,64,64], index: 2, kind: input, shape index: {}]   ;;  %s4713_s3 = inlined_call_operand.hbm [shape: f32[3,64,128], index: 3, kind: input, shape index: {}]   ;;  %s4714_s4 = inlined_call_operand.hbm [shape: f32[4,128,512], index: 4, kind: input, shape index: {}]   ;;  %s4715_s5 = inlined_call_operand.hbm [shape: f32[512,512], index: 5, kind: input, shape index: {}]   ;;  %s4716_s6 = inlined_call_operand.hbm [shape: f32[512,128], index: 6, kind: input, shape index: {}]   ;;  %s4717_s7 = inlined_call_operand.vmem [shape: f32[8,512], index: 7, kind: input, shape index: {}]   ;;  %s4718_s8 = inlined_call_operand.vmem [shape: f32[8,128], index: 8, kind: output, shape index: {}]  }
   0x1   :  { %14 = vsyncpa [#allocation8], 0 }
   0x2   :  { %15 = vsyncpa [#allocation11], 0  ;;  %s4273_s27 = smov [#allocation7]   ;;  %s4157_s9 = scalar_lea.hbm %s4713_s3, 3072 }
   0x3   :  { %s37_s28 = sshll.u32 %s4273_s27, 4  ;;  %p4158_p0 = scmp.ne.s32.totalorder %s4713_s3, %s4157_s9  ;;  %s38_s28 = int_to_ptr.vmem [resolvable:$true] %s37_s28 }
   0x4   :  { %p4161_p1 = scmp.lt.u32.totalorder %s4157_s9, %s4713_s3 }
   0x6   :  { %p4163_p2 = pnand %p4161_p1, %p4158_p0 }
   0x8   :  { %4166 = shalt.err (!%p4163_p2)
}
   0x9   :  { %s4167_s14 = scalar_lea.vmem %s38_s28, 3072  ;;  %p4172_p4 = scmp.lt.s32.totalorder %s38_s28, %s38_s28 }
   0xa   :  { %p4168_p3 = scmp.ne.s32.totalorder %s38_s28, %s4167_s14  ;;  %p4173_p5 = scmp.lt.s32.totalorder %s4167_s14, %s4167_s14 }
   0xc   :  { %p4174_p6 = por %p4173_p5, %p4172_p4 }
   0xe   :  { %p4175_p7 = pnand %p4174_p6, %p4168_p3 }
  0x10   :  { %4178 = shalt.err (!%p4175_p7)
}
  0x11   :  { %s4274_s15 = smov 128   ;;  %s4275_s16 = smov 8  }
  0x12   :  { %43 = dma.hbm_to_vmem [thread:$0]  %s4713_s3, 3072, %s38_s28, [#allocation8], %s4274_s15, %s4274_s15, %s4275_s16  }
  0x13   :  { %s4276_s19 = smov [#allocation10]   ;;  %s4277_s21 = smov [#allocation5]  }
  0x14   :  { %s61_s20 = sshll.u32 %s4276_s19, 4  ;;  %s23_s22 = sshll.u32 %s4277_s21, 4  ;;  %s62_s20 = int_to_ptr.vmem [resolvable:$true] %s61_s20  ;;  %s24_s22 = int_to_ptr.vmem [resolvable:$true] %s23_s22 }
  0x15   :  { %s4179_s25 = scalar_lea.hbm %s4715_s5, 32768 }
  0x16   :  { %p4180_p8 = scmp.ne.s32.totalorder %s4715_s5, %s4179_s25  ;;  %p4183_p9 = scmp.lt.u32.totalorder %s4179_s25, %s4715_s5 }
  0x18   :  { %p4185_p10 = pnand %p4183_p9, %p4180_p8 }
  0x1a   :  { %4188 = shalt.err (!%p4185_p10)
}
  0x1b   :  { %s4189_s3 = scalar_lea.vmem %s62_s20, 32768  ;;  %p4194_p12 = scmp.lt.s32.totalorder %s62_s20, %s62_s20 }
  0x1c   :  { %p4190_p11 = scmp.ne.s32.totalorder %s62_s20, %s4189_s3  ;;  %p4195_p13 = scmp.lt.s32.totalorder %s4189_s3, %s4189_s3 }
  0x1e   :  { %p4196_p0 = por %p4195_p13, %p4194_p12 }
  0x20   :  { %p4197_p1 = pnand %p4196_p0, %p4190_p11 }
  0x22   :  { %4200 = shalt.err (!%p4197_p1)
}
  0x23   :  { %s4278_s28 = smov 512   ;;  %s4279_s9 = smov 32  }
  0x24   :  { %67 = dma.hbm_to_vmem [thread:$0]  %s4715_s5, 32768, %s62_s20, [#allocation11], %s4278_s28, %s4278_s28, %s4279_s9  }
  0x25   :  { %s4201_s14 = scalar_lea.hbm %s4711_s1, 256 }
  0x26   :  { %p4202_p2 = scmp.ne.s32.totalorder %s4711_s1, %s4201_s14  ;;  %p4205_p3 = scmp.lt.u32.totalorder %s4201_s14, %s4711_s1 }
  0x28   :  { %p4207_p4 = pnand %p4205_p3, %p4202_p2 }
  0x2a   :  { %4210 = shalt.err (!%p4207_p4)
}
  0x2b   :  { %s4211_s23 = scalar_lea.vmem %s24_s22, 256  ;;  %p4216_p6 = scmp.lt.s32.totalorder %s24_s22, %s24_s22 }
  0x2c   :  { %p4212_p5 = scmp.ne.s32.totalorder %s24_s22, %s4211_s23  ;;  %p4217_p7 = scmp.lt.s32.totalorder %s4211_s23, %s4211_s23 }
  0x2e   :  { %p4218_p8 = por %p4217_p7, %p4216_p6 }
  0x30   :  { %p4219_p9 = pnand %p4218_p8, %p4212_p5 }
  0x32   :  { %4222 = shalt.err (!%p4219_p9)
}
  0x33   :  { %29 = dma.hbm_to_vmem [thread:$0]  %s4711_s1, 256, %s24_s22, [#allocation6], %s4274_s15, %s4274_s15, %s4275_s16  }
  0x34   :  { %s4280_s24 = smov [#allocation9]   ;;  %s4281_s26 = smov [#allocation12]  }
  0x35   :  { %s49_s25 = sshll.u32 %s4280_s24, 4  ;;  %s73_s27 = sshll.u32 %s4281_s26, 4  ;;  %s50_s25 = int_to_ptr.vmem [resolvable:$true] %s49_s25  ;;  %s74_s27 = int_to_ptr.vmem [resolvable:$true] %s73_s27 }
  0x36   :  { %s4223_s3 = scalar_lea.hbm %s4714_s4, 32768 }
  0x37   :  { %p4224_p10 = scmp.ne.s32.totalorder %s4714_s4, %s4223_s3  ;;  %p4227_p11 = scmp.lt.u32.totalorder %s4223_s3, %s4714_s4 }
  0x39   :  { %p4229_p12 = pnand %p4227_p11, %p4224_p10 }
  0x3b   :  { %4232 = shalt.err (!%p4229_p12)
}
  0x3c   :  { %s4233_s1 = scalar_lea.vmem %s50_s25, 32768  ;;  %p4238_p0 = scmp.lt.s32.totalorder %s50_s25, %s50_s25 }
  0x3d   :  { %p4234_p13 = scmp.ne.s32.totalorder %s50_s25, %s4233_s1  ;;  %p4239_p1 = scmp.lt.s32.totalorder %s4233_s1, %s4233_s1 }
  0x3f   :  { %p4240_p2 = por %p4239_p1, %p4238_p0 }
  0x41   :  { %p4241_p3 = pnand %p4240_p2, %p4234_p13 }
  0x43   :  { %4244 = shalt.err (!%p4241_p3)
}
  0x44   :  { %55 = dma.hbm_to_vmem [thread:$0]  %s4714_s4, 32768, %s50_s25, [#allocation8], %s4278_s28, %s4278_s28, %s4279_s9  }
  0x45   :  { %s4245_s19 = scalar_lea.hbm %s4716_s6, 8192 }
  0x46   :  { %p4246_p4 = scmp.ne.s32.totalorder %s4716_s6, %s4245_s19  ;;  %p4249_p5 = scmp.lt.u32.totalorder %s4245_s19, %s4716_s6 }
  0x48   :  { %p4251_p6 = pnand %p4249_p5, %p4246_p4 }
  0x4a   :  { %4254 = shalt.err (!%p4251_p6)
}
  0x4b   :  { %s4255_s24 = scalar_lea.vmem %s74_s27, 8192  ;;  %p4260_p8 = scmp.lt.s32.totalorder %s74_s27, %s74_s27 }
  0x4c   :  { %p4256_p7 = scmp.ne.s32.totalorder %s74_s27, %s4255_s24  ;;  %p4261_p9 = scmp.lt.s32.totalorder %s4255_s24, %s4255_s24 }
  0x4e   :  { %p4262_p10 = por %p4261_p9, %p4260_p8 }
  0x50   :  { %p4263_p11 = pnand %p4262_p10, %p4256_p7 }
  0x52   :  { %4266 = shalt.err (!%p4263_p11)
}
  0x53   :  { %79 = dma.hbm_to_vmem [thread:$0]  %s4716_s6, 8192, %s74_s27, [#allocation11], %s4274_s15, %s4274_s15, %s4275_s16  }
  0x54   :  { %4267 = dma.done.wait [#allocation6], 256  }
  0x55   :  { %4268 = vsyncadd [#allocation6], 4294967040 }
  0x56   :  { %4269 = dma.done.wait [#allocation8], 35840  }
  0x57   :  { %4270 = vsyncadd [#allocation8], 4294931456 }
  0x58   :  { %4271 = dma.done.wait [#allocation11], 40960  }
  0x59   :  { %4272 = vsyncadd [#allocation11], 4294926336  ;;  %vm165_vm0 = vcmask 1043456   ;;  %vm116_vm1 = vcmask 97280   ;;  %vm4282_vm2 = vmmov 1   ;;  %v113_v0 = vld [vmem:[#allocation5] sm:$0xff] }
  0x5a   :  { %vm3419_vm3 = vmpackc.low %vm165_vm0, %vm4282_vm2  ;;  %v114_v1 = vld [vmem:[#allocation5 + $0x8] sm:$0xf]  ;;  %v97_v2 = vld [vmem:[%s4710_s0] sm:$0xff]  ;;  %vm362_vm4 = vcmask 523264   ;;  %v4283_v27 = vmov 0.0  }
  0x5b   :  { %v3418_v3 = vpack.c.bf16 %v114_v1, %v113_v0  ;;  %3244 = vmatprep.mubr.msk.f32.mxu0 %vm116_vm1, %v97_v2  ;;  %v105_v4 = vld [vmem:[%s4710_s0 + $0x40] sm:$0xff]  ;;  %v98_v5 = vld [vmem:[%s4710_s0 + $0x8] sm:$0xff]  ;;  %v99_v7 = vld [vmem:[%s4710_s0 + $0x10] sm:$0xff]  ;;  %363 = vst.msk [vmem:[#allocation2] sm:$0xff] %vm362_vm4, %v4283_v27 }
  0x5c   :  { %3256 = vmatprep.mubr.msk.f32.mxu1 %vm116_vm1, %v105_v4  ;;  %v106_v6 = vld [vmem:[%s4710_s0 + $0x48] sm:$0xff]  ;;  %v107_v8 = vld [vmem:[%s4710_s0 + $0x50] sm:$0xff]  ;;  %v100_v9 = vld [vmem:[%s4710_s0 + $0x18] sm:$0xff]  ;;  %931 = vst.msk [vmem:[#allocation3] sm:$0xff] %vm362_vm4, %v4283_v27 }
  0x5d   :  { %3420 = vmatprep.subr.msk.bf16.mxu0 %vm3419_vm3, %v3418_v3  ;;  %4096 = vmatprep.subr.msk.bf16.mxu1 %vm3419_vm3, %v3418_v3  ;;  %v108_v10 = vld [vmem:[%s4710_s0 + $0x58] sm:$0xff]  ;;  %v101_v11 = vld [vmem:[%s4710_s0 + $0x20] sm:$0xff]  ;;  %v102_v13 = vld [vmem:[%s4710_s0 + $0x28] sm:$0xff] }
  0x5e   :  { %3423 = vmatpush3.bf16.msk.msra.mxu0 %vm3419_vm3, %v3418_v3  ;;  %4097 = vmatpush3.bf16.msk.msra.mxu1 %vm3419_vm3, %v3418_v3  ;;  %v109_v12 = vld [vmem:[%s4710_s0 + $0x60] sm:$0xff]  ;;  %v110_v14 = vld [vmem:[%s4710_s0 + $0x68] sm:$0xff]  ;;  %v103_v15 = vld [vmem:[%s4710_s0 + $0x30] sm:$0xff] }
  0x5f   :  { %v111_v16 = vld [vmem:[%s4710_s0 + $0x70] sm:$0xff]  ;;  %v104_v17 = vld [vmem:[%s4710_s0 + $0x38] sm:$0xff]  ;;  %v3014_v19 = vld [vmem:[%s4712_s2 + $0x40] sm:$0xff] }
  0x60   :  { %v112_v18 = vld [vmem:[%s4710_s0 + $0x78] sm:$0xff]  ;;  %v3015_v20 = vld [vmem:[%s4712_s2 + $0x48] sm:$0xff]  ;;  %v3016_v22 = vld [vmem:[%s4712_s2 + $0x50] sm:$0xff] }
  0x61   :  { %3245 = vmatmul.mubr.msk.f32.vlgmr.msra.gmra.mrb[0].mxu0 %vm116_vm1, %v98_v5  ;;  %3257 = vmatmul.mubr.msk.f32.vlgmr.msra.gmra.mrb[0].mxu1 %vm116_vm1, %v106_v6  ;;  %v3424_v21 = vpack.c.bf16 %v3015_v20, %v3014_v19  ;;  %v3017_v23 = vld [vmem:[%s4712_s2 + $0x58] sm:$0xff]  ;;  %v3018_v25 = vld [vmem:[%s4712_s2 + $0x60] sm:$0xff]  ;;  %v3019_v26 = vld [vmem:[%s4712_s2 + $0x68] sm:$0xff] }
  0x62   :  { %3247 = vmatprep.mubr.msk.f32.mxu0 %vm116_vm1, %v99_v7  ;;  %3259 = vmatprep.mubr.msk.f32.mxu1 %vm116_vm1, %v107_v8  ;;  %v3428_v24 = vpack.c.bf16 %v3017_v23, %v3016_v22  ;;  %v3432_v28 = vpack.c.bf16 %v3019_v26, %v3018_v25  ;;  %v3020_v29 = vld [vmem:[%s4712_s2 + $0x70] sm:$0xff]  ;;  %v3021_v30 = vld [vmem:[%s4712_s2 + $0x78] sm:$0xff]  ;;  %v478_v32 = vld [vmem:[%s4712_s2] sm:$0xff] }
  0x63   :  { %3425 = vmatprep.subr.bf16.mxu1 %v3424_v21  ;;  %v3436_v31 = vpack.c.bf16 %v3021_v30, %v3020_v29  ;;  %v479_v33 = vld [vmem:[%s4712_s2 + $0x8] sm:$0xff]  ;;  %v4508_v35 = vld [vmem:[%s4717_s7] ss:$0 sm:$0xff] }
  0x64   :  { %3427 = vmatpush3.bf16.msra.mxu1 %v3424_v21  ;;  %v4502_v34 = vpack.c.bf16 %v479_v33, %v478_v32 }
  0x65   :  { %3248 = vmatmul.mubr.msk.f32.gmra.mrb[2].mxu0 %vm116_vm1, %v100_v9  ;;  %3260 = vmatmul.mubr.msk.f32.gmra.mrb[2].mxu1 %vm116_vm1, %v108_v10 }
  0x66   :  { %3250 = vmatprep.mubr.msk.f32.mxu0 %vm116_vm1, %v101_v11  ;;  %3262 = vmatprep.mubr.msk.f32.mxu1 %vm116_vm1, %v109_v12  ;;  %v480_v12 = vld [vmem:[%s4712_s2 + $0x10] sm:$0xff] }
  0x67   :  { %3429 = vmatprep.subr.bf16.mxu1 %v3428_v24 }
  0x68   :  { %3431 = vmatpush3.bf16.msra.mxu1 %v3428_v24 }
  0x69   :  { %3251 = vmatmul.mubr.msk.f32.gmra.mrb[4].mxu0 %vm116_vm1, %v102_v13  ;;  %3263 = vmatmul.mubr.msk.f32.gmra.mrb[4].mxu1 %vm116_vm1, %v110_v14  ;;  %v481_v13 = vld [vmem:[%s4712_s2 + $0x18] sm:$0xff] }
  0x6a   :  { %3253 = vmatprep.mubr.msk.f32.mxu0 %vm116_vm1, %v103_v15  ;;  %3265 = vmatprep.mubr.msk.f32.mxu1 %vm116_vm1, %v111_v16  ;;  %v3444_v32 = vpack.c.bf16 %v481_v13, %v480_v12 }
  0x6b   :  { %3433 = vmatprep.subr.bf16.mxu1 %v3432_v28 }
  0x6c   :  { %3435 = vmatpush3.bf16.msra.mxu1 %v3432_v28 }
  0x6d   :  { %3254 = vmatmul.mubr.msk.f32.gmra.mrb[6].mxu0 %vm116_vm1, %v104_v17  ;;  %3266 = vmatmul.mubr.msk.f32.gmra.mrb[6].mxu1 %vm116_vm1, %v112_v18 }
  0x6e   :  { %3437 = vmatprep.subr.bf16.mxu1 %v3436_v31 }
  0x70   :  { %3439 = vmatpush3.bf16.msra.mxu1 %v3436_v31 }
  0x71   :  { %3441 = vmatprep.subr.bf16.mxu1 %v4502_v34 }
 0x134   :  { %v3246_v36 = vpop.f32.mrb[0].mxu0  ;;  %v3258_v37 = vpop.f32.mrb[0].mxu1 }
 0x135   :  { %v241_v38 = vadd.f32 %v3246_v36, %v4508_v35  ;;  %v235_v39 = vpop.f32.mrb[1].mxu0  ;;  %v281_v40 = vadd.f32 %v3258_v37, %v4508_v35  ;;  %v275_v41 = vpop.f32.mrb[1].mxu1 }
 0x136   :  { %v236_v42 = vadd.f32 %v235_v39, %v4508_v35  ;;  %v276_v43 = vadd.f32 %v275_v41, %v4508_v35 }
 0x137   :  { %vm315_vm5 = vcmp.ge.f32.partialorder %v241_v38, 0.0  ;;  %v331_v44 = vmul.f32 0.01, %v241_v38  ;;  %vm323_vm6 = vcmp.ge.f32.partialorder %v281_v40, 0.0  ;;  %v339_v45 = vmul.f32 0.01, %v281_v40 }
 0x138   :  { %vm314_vm7 = vcmp.ge.f32.partialorder %v236_v42, 0.0  ;;  %v330_v46 = vmul.f32 0.01, %v236_v42  ;;  %v3249_v47 = vpop.f32.mrb[2].mxu0  ;;  %vm322_vm8 = vcmp.ge.f32.partialorder %v276_v43, 0.0  ;;  %v3261_v48 = vpop.f32.mrb[2].mxu1 }
 0x139   :  { %v347_v49 = vsel %vm315_vm5, %v241_v38, %v331_v44  ;;  %v355_v50 = vsel %vm323_vm6, %v281_v40, %v339_v45  ;;  %v251_v51 = vadd.f32 %v3249_v47, %v4508_v35  ;;  %v338_v52 = vmul.f32 0.01, %v276_v43  ;;  %v245_v53 = vpop.f32.mrb[3].mxu0  ;;  %v285_v54 = vpop.f32.mrb[3].mxu1 }
 0x13a   :  { %365 = vst.msk [vmem:[#allocation2 + $0x10] sm:$0xff] %vm362_vm4, %v347_v49  ;;  %v346_v55 = vsel %vm314_vm7, %v236_v42, %v330_v46  ;;  %373 = vst.msk [vmem:[#allocation2 + $0x50] sm:$0xff] %vm362_vm4, %v355_v50  ;;  %v246_v56 = vadd.f32 %v245_v53, %v4508_v35  ;;  %v291_v57 = vadd.f32 %v3261_v48, %v4508_v35  ;;  %v482_v42 = vld [vmem:[%s4712_s2 + $0x20] sm:$0xff]  ;;  %v429_v46 = vlaneseq  ;;  %v484_v48 = vld [vmem:[%s4712_s2 + $0x30] sm:$0xff] }
 0x13b   :  { %v286_v58 = vadd.f32 %v285_v54, %v4508_v35  ;;  %364 = vst.msk [vmem:[#allocation2 + $0x8] sm:$0xff] %vm362_vm4, %v346_v55  ;;  %vm317_vm9 = vcmp.ge.f32.partialorder %v251_v51, 0.0  ;;  %v333_v59 = vmul.f32 0.01, %v251_v51  ;;  %v354_v60 = vsel %vm322_vm8, %v276_v43, %v338_v52  ;;  %v485_v49 = vld [vmem:[%s4712_s2 + $0x38] sm:$0xff]  ;;  %v3038_v52 = vld [vmem:[%s4712_s2 + $0x80] sm:$0xff] }
 0x13c   :  { %372 = vst.msk [vmem:[#allocation2 + $0x48] sm:$0xff] %vm362_vm4, %v354_v60  ;;  %vm316_vm10 = vcmp.ge.f32.partialorder %v246_v56, 0.0  ;;  %v332_v61 = vmul.f32 0.01, %v246_v56  ;;  %vm325_vm11 = vcmp.ge.f32.partialorder %v291_v57, 0.0  ;;  %v3252_v1 = vpop.f32.mrb[4].mxu0 }
 0x13d   :  { %v341_v62 = vmul.f32 0.01, %v291_v57  ;;  %v349_v63 = vsel %vm317_vm9, %v251_v51, %v333_v59  ;;  %vm324_vm12 = vcmp.ge.f32.partialorder %v286_v58, 0.0  ;;  %v340_v0 = vmul.f32 0.01, %v286_v58  ;;  %v3264_v2 = vpop.f32.mrb[4].mxu1 }
 0x13e   :  { %367 = vst.msk [vmem:[#allocation2 + $0x20] sm:$0xff] %vm362_vm4, %v349_v63  ;;  %v348_v3 = vsel %vm316_vm10, %v246_v56, %v332_v61  ;;  %v261_v5 = vadd.f32 %v3252_v1, %v4508_v35  ;;  %v255_v6 = vpop.f32.mrb[5].mxu0  ;;  %v301_v7 = vadd.f32 %v3264_v2, %v4508_v35  ;;  %v295_v8 = vpop.f32.mrb[5].mxu1  ;;  %v4565_v50 = vshrl.u32 %v429_v46, 7  ;;  %v3039_v53 = vld [vmem:[%s4712_s2 + $0x88] sm:$0xff] }
 0x13f   :  { %v357_v4 = vsel %vm325_vm11, %v291_v57, %v341_v62  ;;  %366 = vst.msk [vmem:[#allocation2 + $0x18] sm:$0xff] %vm362_vm4, %v348_v3  ;;  %v356_v9 = vsel %vm324_vm12, %v286_v58, %v340_v0  ;;  %v256_v10 = vadd.f32 %v255_v6, %v4508_v35  ;;  %v296_v11 = vadd.f32 %v295_v8, %v4508_v35  ;;  %v3040_v3 = vld [vmem:[%s4712_s2 + $0x90] sm:$0xff]  ;;  %v995_v46 = vld [vmem:[#allocation7 + $0x48] sm:$0xff] }
 0x140   :  { %375 = vst.msk [vmem:[#allocation2 + $0x60] sm:$0xff] %vm362_vm4, %v357_v4  ;;  %374 = vst.msk [vmem:[#allocation2 + $0x58] sm:$0xff] %vm362_vm4, %v356_v9  ;;  %vm319_vm13 = vcmp.ge.f32.partialorder %v261_v5, 0.0  ;;  %v335_v14 = vmul.f32 0.01, %v261_v5  ;;  %vm327_vm14 = vcmp.ge.f32.partialorder %v301_v7, 0.0  ;;  %v3452_v51 = vpack.c.bf16 %v485_v49, %v484_v48 }
 0x141   :  { %v343_v15 = vmul.f32 0.01, %v301_v7  ;;  %vm318_vm15 = vcmp.ge.f32.partialorder %v256_v10, 0.0  ;;  %v334_v16 = vmul.f32 0.01, %v256_v10  ;;  %vm326_vm0 = vcmp.ge.f32.partialorder %v296_v11, 0.0 }
 0x142   :  { %v342_v17 = vmul.f32 0.01, %v296_v11  ;;  %v351_v18 = vsel %vm319_vm13, %v261_v5, %v335_v14  ;;  %v3255_v20 = vpop.f32.mrb[6].mxu0  ;;  %v3267_v21 = vpop.f32.mrb[6].mxu1  ;;  %v398_v22 = vld [vmem:[#allocation2 + $0x8] ss:$2 sm:$0xff]  ;;  %v3456_v58 = vpack.c.bf16 %v3039_v53, %v3038_v52 }
 0x143   :  { %v359_v19 = vsel %vm327_vm14, %v301_v7, %v343_v15  ;;  %369 = vst.msk [vmem:[#allocation2 + $0x30] sm:$0xff] %vm362_vm4, %v351_v18  ;;  %v350_v23 = vsel %vm318_vm15, %v256_v10, %v334_v16  ;;  %v271_v25 = vadd.f32 %v3255_v20, %v4508_v35  ;;  %v265_v26 = vpop.f32.mrb[7].mxu0  ;;  %v311_v28 = vadd.f32 %v3267_v21, %v4508_v35  ;;  %v305_v29 = vpop.f32.mrb[7].mxu1  ;;  %v406_v54 = vld [vmem:[#allocation2 + $0x48] ss:$2 sm:$0xff]  ;;  %v3041_v4 = vld [vmem:[%s4712_s2 + $0x98] sm:$0xff] }
 0x144   :  { %377 = vst.msk [vmem:[#allocation2 + $0x70] sm:$0xff] %vm362_vm4, %v359_v19  ;;  %v358_v24 = vsel %vm326_vm0, %v296_v11, %v342_v17  ;;  %3284 = vmatprep.mubr.msk.f32.mxu1 %vm362_vm4, %v398_v22  ;;  %368 = vst.msk [vmem:[#allocation2 + $0x28] sm:$0xff] %vm362_vm4, %v350_v23  ;;  %v266_v30 = vadd.f32 %v265_v26, %v4508_v35  ;;  %v306_v31 = vadd.f32 %v305_v29, %v4508_v35  ;;  %v483_v35 = vld [vmem:[%s4712_s2 + $0x28] sm:$0xff]  ;;  %v3042_v14 = vld [vmem:[%s4712_s2 + $0xa0] sm:$0xff] }
 0x145   :  { %376 = vst.msk [vmem:[#allocation2 + $0x68] sm:$0xff] %vm362_vm4, %v358_v24  ;;  %vm321_vm1 = vcmp.ge.f32.partialorder %v271_v25, 0.0  ;;  %v337_v33 = vmul.f32 0.01, %v271_v25  ;;  %vm329_vm2 = vcmp.ge.f32.partialorder %v311_v28, 0.0  ;;  %v3448_v45 = vpack.c.bf16 %v483_v35, %v482_v42  ;;  %v3043_v15 = vld [vmem:[%s4712_s2 + $0xa8] sm:$0xff] }
 0x146   :  { %v345_v36 = vmul.f32 0.01, %v311_v28  ;;  %vm320_vm3 = vcmp.ge.f32.partialorder %v266_v30, 0.0  ;;  %v336_v37 = vmul.f32 0.01, %v266_v30  ;;  %vm328_vm5 = vcmp.ge.f32.partialorder %v306_v31, 0.0 }
 0x147   :  { %v344_v38 = vmul.f32 0.01, %v306_v31  ;;  %v353_v39 = vsel %vm321_vm1, %v271_v25, %v337_v33  ;;  %v400_v41 = vld [vmem:[#allocation2 + $0x18] ss:$2 sm:$0xff]  ;;  %v4575_v55 = vadd.s32 8, %v4565_v50  ;;  %v438_v56 = vand.u32 7, %v4565_v50 }
 0x148   :  { %v361_v40 = vsel %vm329_vm2, %v311_v28, %v345_v36  ;;  %371 = vst.msk [vmem:[#allocation2 + $0x40] sm:$0xff] %vm362_vm4, %v353_v39  ;;  %v352_v43 = vsel %vm320_vm3, %v266_v30, %v336_v37  ;;  %3285 = vmatmul.mubr.msk.f32.vlgmr.msra.gmra.mrb[8].mxu1 %vm362_vm4, %v400_v41  ;;  %v4580_v57 = vadd.s32 16, %v4565_v50  ;;  %v408_v59 = vld [vmem:[#allocation2 + $0x58] ss:$2 sm:$0xff]  ;;  %v4585_v62 = vadd.s32 24, %v4565_v50  ;;  %v3044_v24 = vld [vmem:[%s4712_s2 + $0xb0] sm:$0xff] }
 0x149   :  { %379 = vst.msk [vmem:[#allocation2 + $0x80] sm:$0xff] %vm362_vm4, %v361_v40  ;;  %v360_v44 = vsel %vm328_vm5, %v306_v31, %v344_v38  ;;  %370 = vst.msk [vmem:[#allocation2 + $0x38] sm:$0xff] %vm362_vm4, %v352_v43  ;;  %3443 = vmatpush3.bf16.msra.mxu1 %v4502_v34  ;;  %v439_v61 = vand.u32 7, %v4575_v55  ;;  %v382_v63 = vld [vmem:[#allocation2 + $0x7] ss:$2 sm:$0xff]  ;;  %vm446_vm6 = vcmp.ne.s32.totalorder %v438_v56, 0  ;;  %v3460_v12 = vpack.c.bf16 %v3041_v4, %v3040_v3 }
 0x14a   :  { %378 = vst.msk [vmem:[#allocation2 + $0x78] sm:$0xff] %vm362_vm4, %v360_v44  ;;  %3445 = vmatprep.subr.bf16.mxu1 %v3444_v32  ;;  %v440_v0 = vand.u32 7, %v4580_v57  ;;  %v434_v1 = vadd.s32 32, %v4565_v50  ;;  %v470_v5 = vsel %vm446_vm6, %v382_v63, 0.0  ;;  %v384_v6 = vld [vmem:[#allocation2 + $0x17] ss:$2 sm:$0xff]  ;;  %v3464_v22 = vpack.c.bf16 %v3043_v15, %v3042_v14 }
 0x14b   :  { %v402_v47 = vld [vmem:[#allocation2 + $0x28] ss:$2 sm:$0xff]  ;;  %vm447_vm7 = vcmp.ne.s32.totalorder %v439_v61, 0  ;;  %v441_v7 = vand.u32 7, %v4585_v62  ;;  %v435_v8 = vadd.s32 40, %v4565_v50  ;;  %v436_v11 = vadd.s32 48, %v4565_v50 }
 0x14c   :  { %3287 = vmatprep.mubr.msk.f32.mxu1 %vm362_vm4, %v402_v47  ;;  %v410_v60 = vld [vmem:[#allocation2 + $0x68] ss:$2 sm:$0xff]  ;;  %v386_v9 = vld [vmem:[#allocation2 + $0x27] ss:$2 sm:$0xff]  ;;  %vm448_vm8 = vcmp.ne.s32.totalorder %v440_v0, 0  ;;  %v442_v10 = vand.u32 7, %v434_v1 }
 0x14d   :  { %3447 = vmatpush3.bf16.msra.mxu1 %v3444_v32  ;;  %v471_v13 = vsel %vm447_vm7, %v384_v6, 0.0  ;;  %v472_v16 = vsel %vm448_vm8, %v386_v9, 0.0  ;;  %vm449_vm9 = vcmp.ne.s32.totalorder %v441_v7, 0  ;;  %v443_v18 = vand.u32 7, %v435_v8  ;;  %v3045_v25 = vld [vmem:[%s4712_s2 + $0xb8] sm:$0xff]  ;;  %v996_v48 = vld [vmem:[#allocation7 + $0x50] sm:$0xff] }
 0x14e   :  { %3449 = vmatprep.subr.bf16.mxu1 %v3448_v45  ;;  %v437_v19 = vadd.s32 56, %v4565_v50  ;;  %vm450_vm10 = vcmp.ne.s32.totalorder %v442_v10, 0  ;;  %v444_v21 = vand.u32 7, %v436_v11  ;;  %v392_v28 = vld [vmem:[#allocation2 + $0x57] ss:$2 sm:$0xff]  ;;  %v3468_v31 = vpack.c.bf16 %v3045_v25, %v3044_v24  ;;  %v999_v52 = vld [vmem:[#allocation7 + $0x68] sm:$0xff] }
 0x14f   :  { %v390_v20 = vld [vmem:[#allocation2 + $0x47] ss:$2 sm:$0xff]  ;;  %vm451_vm11 = vcmp.ne.s32.totalorder %v443_v18, 0  ;;  %v997_v49 = vld [vmem:[#allocation7 + $0x58] sm:$0xff] }
 0x150   :  { %v404_v34 = vld [vmem:[#allocation2 + $0x38] ss:$2 sm:$0xff]  ;;  %v388_v17 = vld [vmem:[#allocation2 + $0x37] ss:$2 sm:$0xff]  ;;  %v474_v26 = vsel %vm450_vm10, %v390_v20, 0.0  ;;  %v445_v29 = vand.u32 7, %v437_v19 }
 0x151   :  { %3288 = vmatmul.mubr.msk.f32.gmra.mrb[10].mxu1 %vm362_vm4, %v404_v34  ;;  %v412_v2 = vld [vmem:[#allocation2 + $0x78] ss:$2 sm:$0xff]  ;;  %v473_v23 = vsel %vm449_vm9, %v388_v17, 0.0  ;;  %v394_v30 = vld [vmem:[#allocation2 + $0x67] ss:$2 sm:$0xff]  ;;  %vm452_vm12 = vcmp.ne.s32.totalorder %v444_v21, 0 }
 0x152   :  { %3290 = vmatprep.mubr.msk.f32.mxu1 %vm362_vm4, %v406_v54  ;;  %3451 = vmatpush3.bf16.msra.mxu1 %v3448_v45  ;;  %v475_v32 = vsel %vm451_vm11, %v392_v28, 0.0  ;;  %v476_v33 = vsel %vm452_vm12, %v394_v30, 0.0  ;;  %v396_v36 = vld [vmem:[#allocation2 + $0x77] ss:$2 sm:$0xff]  ;;  %vm453_vm13 = vcmp.ne.s32.totalorder %v445_v29, 0  ;;  %v1395_v63 = vld [vmem:[#allocation9 + $0x208] sm:$0xff] }
 0x153   :  { %3453 = vmatprep.subr.bf16.mxu1 %v3452_v51  ;;  %v477_v37 = vsel %vm453_vm13, %v396_v36, 0.0  ;;  %v414_v38 = vld [vmem:[#allocation2 + $0x9] ss:$2 sm:$0xff]  ;;  %v416_v39 = vld [vmem:[#allocation2 + $0x19] ss:$2 sm:$0xff] }
 0x154   :  { %v418_v40 = vld [vmem:[#allocation2 + $0x29] ss:$2 sm:$0xff]  ;;  %v420_v41 = vld [vmem:[#allocation2 + $0x39] ss:$2 sm:$0xff] }
 0x155   :  { %3291 = vmatmul.mubr.msk.f32.gmra.mrb[12].mxu1 %vm362_vm4, %v408_v59  ;;  %v422_v42 = vld [vmem:[#allocation2 + $0x49] ss:$2 sm:$0xff]  ;;  %v424_v35 = vld [vmem:[#allocation2 + $0x59] ss:$2 sm:$0xff] }
 0x156   :  { %3293 = vmatprep.mubr.msk.f32.mxu1 %vm362_vm4, %v410_v60  ;;  %3455 = vmatpush3.bf16.msra.mxu1 %v3452_v51  ;;  %v426_v43 = vld [vmem:[#allocation2 + $0x69] ss:$2 sm:$0xff]  ;;  %v428_v44 = vld [vmem:[#allocation2 + $0x79] ss:$2 sm:$0xff]  ;;  %v3476_v51 = vpack.c.bf16 %v997_v49, %v996_v48 }
 0x157   :  { %3457 = vmatprep.subr.bf16.mxu1 %v3456_v58  ;;  %v994_v45 = vld [vmem:[#allocation7 + $0x40] sm:$0xff]  ;;  %v1000_v54 = vld [vmem:[#allocation7 + $0x70] sm:$0xff]  ;;  %v1001_v56 = vld [vmem:[#allocation7 + $0x78] sm:$0xff] }
 0x158   :  { %v3472_v47 = vpack.c.bf16 %v995_v46, %v994_v45  ;;  %v998_v34 = vld [vmem:[#allocation7 + $0x60] sm:$0xff]  ;;  %v986_v60 = vld [vmem:[#allocation7 + $0x8] sm:$0xff] }
 0x159   :  { %3294 = vmatmul.mubr.msk.f32.gmra.mrb[14].mxu1 %vm362_vm4, %v412_v2  ;;  %v3480_v53 = vpack.c.bf16 %v999_v52, %v998_v34  ;;  %v985_v59 = vld [vmem:[#allocation7] sm:$0xff]  ;;  %v1399_v0 = vld [vmem:[#allocation9 + $0x228] sm:$0xff] }
 0x15a   :  { %3312 = vmatprep.mubr.msk.f32.mxu1 %vm362_vm4, %v470_v5  ;;  %3473 = vmatprep.subr.bf16.mxu0 %v3472_v47  ;;  %v4630_v61 = vpack.c.bf16 %v986_v60, %v985_v59  ;;  %v3520_v1 = vpack.c.bf16 %v1399_v0, %v1395_v63  ;;  %v1394_v2 = vld [vmem:[#allocation9 + $0x200] sm:$0xff]  ;;  %v1403_v5 = vld [vmem:[#allocation9 + $0x248] sm:$0xff] }
 0x15b   :  { %3475 = vmatpush3.bf16.msra.mxu0 %v3472_v47  ;;  %v1398_v3 = vld [vmem:[#allocation9 + $0x220] sm:$0xff]  ;;  %v1407_v6 = vld [vmem:[#allocation9 + $0x268] sm:$0xff] }
 0x15c   :  { %3477 = vmatprep.subr.bf16.mxu0 %v3476_v51  ;;  %v3522_v4 = vpack.c.bf16 %v1398_v3, %v1394_v2  ;;  %v3524_v7 = vpack.c.bf16 %v1407_v6, %v1403_v5  ;;  %v1402_v8 = vld [vmem:[#allocation9 + $0x240] sm:$0xff]  ;;  %v1411_v11 = vld [vmem:[#allocation9 + $0x288] sm:$0xff]  ;;  %v965_v5 = vand.u32 3, %v4565_v50 }
 0x15d   :  { %3313 = vmatmul.mubr.msk.f32.vlgmr.msra.gmra.mrb[8].mxu1 %vm362_vm4, %v471_v13  ;;  %v1406_v9 = vld [vmem:[#allocation9 + $0x260] sm:$0xff]  ;;  %v1419_v17 = vld [vmem:[#allocation9 + $0x2c8] sm:$0xff] }
 0x15e   :  { %3459 = vmatpush3.bf16.msra.mxu1 %v3456_v58  ;;  %3315 = vmatprep.mubr.msk.f32.mxu1 %vm362_vm4, %v472_v16  ;;  %v3484_v58 = vpack.c.bf16 %v1001_v56, %v1000_v54  ;;  %v3526_v10 = vpack.c.bf16 %v1406_v9, %v1402_v8  ;;  %v1410_v14 = vld [vmem:[#allocation9 + $0x280] sm:$0xff]  ;;  %v1423_v18 = vld [vmem:[#allocation9 + $0x2e8] sm:$0xff]  ;;  %v987_v56 = vld [vmem:[#allocation7 + $0x10] sm:$0xff]  ;;  %vm969_vm7 = vcmp.ne.s32.totalorder %v965_v5, 0 }
 0x15f   :  { %3461 = vmatprep.subr.bf16.mxu1 %v3460_v12  ;;  %3479 = vmatpush3.bf16.msra.mxu0 %v3476_v51  ;;  %v1414_v15 = vld [vmem:[#allocation9 + $0x2a0] sm:$0xff]  ;;  %v3532_v19 = vpack.c.bf16 %v1423_v18, %v1419_v17  ;;  %v991_v8 = vld [vmem:[#allocation7 + $0x30] sm:$0xff]  ;;  %v992_v9 = vld [vmem:[#allocation7 + $0x38] sm:$0xff] }
 0x160   :  { %3481 = vmatprep.subr.bf16.mxu0 %v3480_v53  ;;  %v3530_v16 = vpack.c.bf16 %v1414_v15, %v1410_v14  ;;  %v1418_v20 = vld [vmem:[#allocation9 + $0x2c0] sm:$0xff]  ;;  %v1198_v14 = vld [vmem:[#allocation7 + $0x88] sm:$0xff]  ;;  %v966_v15 = vand.u32 3, %v4575_v55  ;;  %v1199_v18 = vld [vmem:[#allocation7 + $0x90] sm:$0xff] }
 0x161   :  { %3316 = vmatmul.mubr.msk.f32.gmra.mrb[10].mxu1 %vm362_vm4, %v473_v23  ;;  %v1422_v21 = vld [vmem:[#allocation9 + $0x2e0] sm:$0xff]  ;;  %v1433_v5 = vld [vmem:[#allocation9 + $0x338] sm:$0xff] }
 0x162   :  { %3463 = vmatpush3.bf16.msra.mxu1 %v3460_v12  ;;  %3318 = vmatprep.mubr.msk.f32.mxu1 %vm362_vm4, %v474_v26  ;;  %v1415_v12 = vld [vmem:[#allocation9 + $0x2a8] sm:$0xff]  ;;  %v380_v23 = vld [vmem:[%s4717_s7 + $0x1] ss:$0 sm:$0xff]  ;;  %vm970_vm8 = vcmp.ne.s32.totalorder %v966_v15, 0 }
 0x163   :  { %3465 = vmatprep.subr.bf16.mxu1 %v3464_v22  ;;  %3483 = vmatpush3.bf16.msra.mxu0 %v3480_v53  ;;  %v3528_v13 = vpack.c.bf16 %v1415_v12, %v1411_v11  ;;  %v989_v3 = vld [vmem:[#allocation7 + $0x20] sm:$0xff]  ;;  %v3500_v11 = vpack.c.bf16 %v992_v9, %v991_v8 }
 0x164   :  { %3485 = vmatprep.subr.bf16.mxu0 %v3484_v58  ;;  %v1201_v55 = vld [vmem:[#allocation7 + $0xa0] sm:$0xff] }
 0x165   :  { %3319 = vmatmul.mubr.msk.f32.gmra.mrb[12].mxu1 %vm362_vm4, %v475_v32 }
 0x166   :  { %3467 = vmatpush3.bf16.msra.mxu1 %v3464_v22  ;;  %3321 = vmatprep.mubr.msk.f32.mxu1 %vm362_vm4, %v476_v33  ;;  %v3534_v22 = vpack.c.bf16 %v1422_v21, %v1418_v20  ;;  %v968_v21 = vand.u32 3, %v4585_v62  ;;  %v1203_v62 = vld [vmem:[#allocation7 + $0xb0] sm:$0xff] }
 0x167   :  { %3469 = vmatprep.subr.bf16.mxu1 %v3468_v31  ;;  %3487 = vmatpush3.bf16.msra.mxu0 %v3484_v58  ;;  %v988_v58 = vld [vmem:[#allocation7 + $0x18] sm:$0xff] }
 0x168   :  { %3489 = vmatprep.subr.bf16.mxu0 %v4630_v61  ;;  %v3492_v0 = vpack.c.bf16 %v988_v58, %v987_v56  ;;  %vm972_vm10 = vcmp.ne.s32.totalorder %v968_v21, 0  ;;  %v1425_v56 = vld [vmem:[#allocation9 + $0x2f8] sm:$0xff]  ;;  %v1436_v21 = vld [vmem:[#allocation9 + $0x350] sm:$0xff] }
 0x169   :  { %3322 = vmatmul.mubr.msk.f32.gmra.mrb[14].mxu1 %vm362_vm4, %v477_v37 }
 0x16a   :  { %3471 = vmatpush3.bf16.msra.mxu1 %v3468_v31  ;;  %3340 = vmatprep.mubr.msk.f32.mxu1 %vm362_vm4, %v414_v38 }
 0x16b   :  { %3521 = vmatprep.subr.bf16.mxu1 %v3520_v1 }
 0x16d   :  { %3341 = vmatmul.mubr.msk.f32.vlgmr.msra.gmra.mrb[8].mxu1 %vm362_vm4, %v416_v39 }
 0x16e   :  { %3343 = vmatprep.mubr.msk.f32.mxu1 %vm362_vm4, %v418_v40  ;;  %3523 = vmatpush1.bf16.msra.mxu1 %v3522_v4  ;;  %v990_v4 = vld [vmem:[#allocation7 + $0x28] sm:$0xff] }
 0x16f   :  { %3525 = vmatprep.subr.bf16.mxu1 %v3524_v7  ;;  %v3496_v6 = vpack.c.bf16 %v990_v4, %v989_v3  ;;  %v1429_v3 = vld [vmem:[#allocation9 + $0x318] sm:$0xff] }
 0x170   :  { %v3568_v8 = vpack.c.bf16 %v1433_v5, %v1429_v3 }
 0x171   :  { %3344 = vmatmul.mubr.msk.f32.gmra.mrb[10].mxu1 %vm362_vm4, %v420_v41 }
 0x172   :  { %3346 = vmatprep.mubr.msk.f32.mxu1 %vm362_vm4, %v422_v42  ;;  %3527 = vmatpush1.bf16.msra.mxu1 %v3526_v10 }
 0x173   :  { %3529 = vmatprep.subr.bf16.mxu1 %v3528_v13  ;;  %v1197_v13 = vld [vmem:[#allocation7 + $0x80] sm:$0xff] }
 0x174   :  { %v3504_v17 = vpack.c.bf16 %v1198_v14, %v1197_v13  ;;  %v1435_v13 = vld [vmem:[#allocation9 + $0x348] sm:$0xff] }
 0x175   :  { %3347 = vmatmul.mubr.msk.f32.gmra.mrb[12].mxu1 %vm362_vm4, %v424_v35  ;;  %v1439_v14 = vld [vmem:[#allocation9 + $0x368] sm:$0xff] }
 0x176   :  { %3349 = vmatprep.mubr.msk.f32.mxu1 %vm362_vm4, %v426_v43  ;;  %3531 = vmatpush1.bf16.msra.mxu1 %v3530_v16  ;;  %v967_v16 = vand.u32 3, %v4580_v57  ;;  %v3540_v15 = vpack.c.bf16 %v1439_v14, %v1435_v13  ;;  %v1333_v13 = vld [vmem:[#allocation9 + $0x30] sm:$0xff]  ;;  %v1336_v14 = vld [vmem:[#allocation9 + $0x48] sm:$0xff] }
 0x177   :  { %3533 = vmatprep.subr.bf16.mxu1 %v3532_v19  ;;  %v1200_v19 = vld [vmem:[#allocation7 + $0x98] sm:$0xff] }
 0x178   :  { %vm971_vm9 = vcmp.ne.s32.totalorder %v967_v16, 0  ;;  %v1441_v16 = vld [vmem:[#allocation9 + $0x378] sm:$0xff] }
 0x179   :  { %3350 = vmatmul.mubr.msk.f32.gmra.mrb[14].mxu1 %vm362_vm4, %v428_v44 }
 0x17a   :  { %1522 = vmatprep.mubr.f32.mxu1 %v4283_v27  ;;  %3535 = vmatpush1.bf16.msra.mxu1 %v3534_v22 }
 0x240   :  { %v3342_v24 = vpop.f32.mrb[8].mxu1 }
 0x241   :  { %v900_v25 = vadd.f32 %v3342_v24, %v380_v23  ;;  %v852_v26 = vpop.f32.mrb[9].mxu1 }
 0x242   :  { %v899_v28 = vadd.f32 %v852_v26, %v380_v23 }
 0x243   :  { %vm908_vm14 = vcmp.ge.f32.partialorder %v900_v25, 0.0  ;;  %v916_v29 = vmul.f32 0.01, %v900_v25 }
 0x244   :  { %vm907_vm15 = vcmp.ge.f32.partialorder %v899_v28, 0.0  ;;  %v915_v30 = vmul.f32 0.01, %v899_v28  ;;  %v3345_v31 = vpop.f32.mrb[10].mxu1 }
 0x245   :  { %v924_v32 = vsel %vm908_vm14, %v900_v25, %v916_v29  ;;  %v902_v33 = vadd.f32 %v3345_v31, %v380_v23  ;;  %v862_v36 = vpop.f32.mrb[11].mxu1  ;;  %v1202_v25 = vld [vmem:[#allocation7 + $0xa8] sm:$0xff] }
 0x246   :  { %933 = vst.msk [vmem:[#allocation3 + $0x10] sm:$0xff] %vm362_vm4, %v924_v32  ;;  %v923_v37 = vsel %vm907_vm15, %v899_v28, %v915_v30  ;;  %v901_v38 = vadd.f32 %v862_v36, %v380_v23  ;;  %v3512_v28 = vpack.c.bf16 %v1202_v25, %v1201_v55  ;;  %v1204_v30 = vld [vmem:[#allocation7 + $0xb8] sm:$0xff]  ;;  %v1447_v55 = vld [vmem:[#allocation9 + $0x3a8] sm:$0xff] }
 0x247   :  { %932 = vst.msk [vmem:[#allocation3 + $0x8] sm:$0xff] %vm362_vm4, %v923_v37  ;;  %vm910_vm0 = vcmp.ge.f32.partialorder %v902_v33, 0.0  ;;  %v918_v39 = vmul.f32 0.01, %v902_v33  ;;  %v3516_v32 = vpack.c.bf16 %v1204_v30, %v1203_v62  ;;  %v1401_v36 = vld [vmem:[#allocation9 + $0x238] sm:$0xff] }
 0x248   :  { %vm909_vm1 = vcmp.ge.f32.partialorder %v901_v38, 0.0  ;;  %v917_v40 = vmul.f32 0.01, %v901_v38  ;;  %v3348_v41 = vpop.f32.mrb[12].mxu1  ;;  %v1445_v25 = vld [vmem:[#allocation9 + $0x398] sm:$0xff] }
 0x249   :  { %v926_v42 = vsel %vm910_vm0, %v902_v33, %v918_v39  ;;  %v904_v35 = vadd.f32 %v3348_v41, %v380_v23  ;;  %v872_v43 = vpop.f32.mrb[13].mxu1  ;;  %v1397_v33 = vld [vmem:[#allocation9 + $0x218] sm:$0xff]  ;;  %v1400_v39 = vld [vmem:[#allocation9 + $0x230] sm:$0xff] }
 0x24a   :  { %935 = vst.msk [vmem:[#allocation3 + $0x20] sm:$0xff] %vm362_vm4, %v926_v42  ;;  %v925_v44 = vsel %vm909_vm1, %v901_v38, %v917_v40  ;;  %v903_v45 = vadd.f32 %v872_v43, %v380_v23  ;;  %v3552_v37 = vpack.c.bf16 %v1401_v36, %v1397_v33  ;;  %v1396_v38 = vld [vmem:[#allocation9 + $0x210] sm:$0xff]  ;;  %v1405_v40 = vld [vmem:[#allocation9 + $0x258] sm:$0xff]  ;;  %v1451_v36 = vld [vmem:[#allocation9 + $0x3c8] sm:$0xff] }
 0x24b   :  { %934 = vst.msk [vmem:[#allocation3 + $0x18] sm:$0xff] %vm362_vm4, %v925_v44  ;;  %vm912_vm2 = vcmp.ge.f32.partialorder %v904_v35, 0.0  ;;  %v920_v46 = vmul.f32 0.01, %v904_v35  ;;  %v1409_v41 = vld [vmem:[#allocation9 + $0x278] sm:$0xff]  ;;  %v3554_v42 = vpack.c.bf16 %v1400_v39, %v1396_v38  ;;  %v1404_v43 = vld [vmem:[#allocation9 + $0x250] sm:$0xff] }
 0x24c   :  { %vm911_vm3 = vcmp.ge.f32.partialorder %v903_v45, 0.0  ;;  %v919_v47 = vmul.f32 0.01, %v903_v45  ;;  %v3351_v48 = vpop.f32.mrb[14].mxu1  ;;  %v1408_v44 = vld [vmem:[#allocation9 + $0x270] sm:$0xff]  ;;  %v1453_v38 = vld [vmem:[#allocation9 + $0x3d8] sm:$0xff] }
 0x24d   :  { %v928_v49 = vsel %vm912_vm2, %v904_v35, %v920_v46  ;;  %v906_v51 = vadd.f32 %v3351_v48, %v380_v23  ;;  %v882_v34 = vpop.f32.mrb[15].mxu1  ;;  %v3556_v35 = vpack.c.bf16 %v1409_v41, %v1405_v40  ;;  %v1413_v46 = vld [vmem:[#allocation9 + $0x298] sm:$0xff]  ;;  %v1450_v41 = vld [vmem:[#allocation9 + $0x3c0] sm:$0xff] }
 0x24e   :  { %937 = vst.msk [vmem:[#allocation3 + $0x30] sm:$0xff] %vm362_vm4, %v928_v49  ;;  %v927_v52 = vsel %vm911_vm3, %v903_v45, %v919_v47  ;;  %v905_v53 = vadd.f32 %v882_v34, %v380_v23  ;;  %v950_v54 = vld [vmem:[#allocation3 + $0x8] ss:$2 sm:$0xff]  ;;  %v942_v10 = vld [vmem:[#allocation3 + $0x7] ss:$2 sm:$0xff]  ;;  %v3508_v23 = vpack.c.bf16 %v1200_v19, %v1199_v18  ;;  %v3558_v49 = vpack.c.bf16 %v1408_v44, %v1404_v43  ;;  %v1438_v18 = vld [vmem:[#allocation9 + $0x360] sm:$0xff] }
 0x24f   :  { %936 = vst.msk [vmem:[#allocation3 + $0x28] sm:$0xff] %vm362_vm4, %v927_v52  ;;  %vm914_vm5 = vcmp.ge.f32.partialorder %v906_v51, 0.0  ;;  %v922_v59 = vmul.f32 0.01, %v906_v51  ;;  %3368 = vmatprep.mubr.msk.f32.mxu0 %vm362_vm4, %v950_v54  ;;  %v958_v31 = vld [vmem:[#allocation3 + $0x9] ss:$2 sm:$0xff] }
 0x250   :  { %vm913_vm6 = vcmp.ge.f32.partialorder %v905_v53, 0.0  ;;  %v921_v60 = vmul.f32 0.01, %v905_v53  ;;  %v1417_v47 = vld [vmem:[#allocation9 + $0x2b8] sm:$0xff]  ;;  %v1412_v34 = vld [vmem:[#allocation9 + $0x290] sm:$0xff] }
 0x251   :  { %v930_v63 = vsel %vm914_vm5, %v906_v51, %v922_v59  ;;  %v3560_v51 = vpack.c.bf16 %v1417_v47, %v1413_v46  ;;  %v1416_v52 = vld [vmem:[#allocation9 + $0x2b0] sm:$0xff]  ;;  %v1421_v54 = vld [vmem:[#allocation9 + $0x2d8] sm:$0xff]  ;;  %v1328_v46 = vld [vmem:[#allocation9 + $0x8] sm:$0xff] }
 0x252   :  { %939 = vst.msk [vmem:[#allocation3 + $0x40] sm:$0xff] %vm362_vm4, %v930_v63  ;;  %v929_v1 = vsel %vm913_vm6, %v905_v53, %v921_v60  ;;  %v952_v2 = vld [vmem:[#allocation3 + $0x18] ss:$2 sm:$0xff]  ;;  %v944_v20 = vld [vmem:[#allocation3 + $0x17] ss:$2 sm:$0xff]  ;;  %v3562_v58 = vpack.c.bf16 %v1416_v52, %v1412_v34  ;;  %v3564_v59 = vpack.c.bf16 %v1425_v56, %v1421_v54  ;;  %v1420_v60 = vld [vmem:[#allocation9 + $0x2d0] sm:$0xff] }
 0x253   :  { %938 = vst.msk [vmem:[#allocation3 + $0x38] sm:$0xff] %vm362_vm4, %v929_v1  ;;  %3369 = vmatmul.mubr.msk.f32.vlgmr.msra.gmra.mrb[8].mxu0 %vm362_vm4, %v952_v2  ;;  %v982_v24 = vsel %vm970_vm8, %v944_v20, 0.0  ;;  %v960_v45 = vld [vmem:[#allocation3 + $0x19] ss:$2 sm:$0xff]  ;;  %v1424_v63 = vld [vmem:[#allocation9 + $0x2f0] sm:$0xff]  ;;  %v1457_v40 = vld [vmem:[#allocation9 + $0x3f8] sm:$0xff] }
 0x254   :  { %3491 = vmatpush3.bf16.msra.mxu0 %v4630_v61  ;;  %v981_v61 = vsel %vm969_vm7, %v942_v10, 0.0  ;;  %v1427_v1 = vld [vmem:[#allocation9 + $0x308] sm:$0xff]  ;;  %v1428_v10 = vld [vmem:[#allocation9 + $0x310] sm:$0xff] }
 0x255   :  { %3493 = vmatprep.subr.bf16.mxu0 %v3492_v0  ;;  %v1431_v2 = vld [vmem:[#allocation9 + $0x328] sm:$0xff]  ;;  %v1452_v44 = vld [vmem:[#allocation9 + $0x3d0] sm:$0xff] }
 0x256   :  { %v954_v7 = vld [vmem:[#allocation3 + $0x28] ss:$2 sm:$0xff]  ;;  %v946_v22 = vld [vmem:[#allocation3 + $0x27] ss:$2 sm:$0xff]  ;;  %v3536_v4 = vpack.c.bf16 %v1431_v2, %v1427_v1 }
 0x257   :  { %3371 = vmatprep.mubr.msk.f32.mxu0 %vm362_vm4, %v954_v7  ;;  %v983_v26 = vsel %vm971_vm9, %v946_v22, 0.0  ;;  %v962_v48 = vld [vmem:[#allocation3 + $0x29] ss:$2 sm:$0xff]  ;;  %v1430_v7 = vld [vmem:[#allocation9 + $0x320] sm:$0xff] }
 0x258   :  { %3495 = vmatpush3.bf16.msra.mxu0 %v3492_v0  ;;  %v3566_v0 = vpack.c.bf16 %v1424_v63, %v1420_v60  ;;  %3537 = vmatprep.subr.bf16.mxu1 %v3536_v4  ;;  %v1440_v22 = vld [vmem:[#allocation9 + $0x370] sm:$0xff] }
 0x259   :  { %3497 = vmatprep.subr.bf16.mxu0 %v3496_v6 }
 0x25a   :  { %v956_v12 = vld [vmem:[#allocation3 + $0x38] ss:$2 sm:$0xff]  ;;  %v948_v57 = vld [vmem:[#allocation3 + $0x37] ss:$2 sm:$0xff] }
 0x25b   :  { %3372 = vmatmul.mubr.msk.f32.gmra.mrb[10].mxu0 %vm362_vm4, %v956_v12  ;;  %v984_v29 = vsel %vm972_vm10, %v948_v57, 0.0  ;;  %v964_v53 = vld [vmem:[#allocation3 + $0x39] ss:$2 sm:$0xff]  ;;  %v1449_v57 = vld [vmem:[#allocation9 + $0x3b8] sm:$0xff] }
 0x25c   :  { %3499 = vmatpush3.bf16.msra.mxu0 %v3496_v6  ;;  %3390 = vmatprep.mubr.msk.f32.mxu0 %vm362_vm4, %v981_v61  ;;  %v1426_v6 = vld [vmem:[#allocation9 + $0x300] sm:$0xff]  ;;  %v1437_v61 = vld [vmem:[#allocation9 + $0x358] sm:$0xff]  ;;  %v3576_v62 = vpack.c.bf16 %v1449_v57, %v1445_v25  ;;  %v1348_v25 = vld [vmem:[#allocation9 + $0xa8] sm:$0xff] }
 0x25d   :  { %3501 = vmatprep.subr.bf16.mxu0 %v3500_v11  ;;  %v3538_v9 = vpack.c.bf16 %v1430_v7, %v1426_v6  ;;  %v3572_v19 = vpack.c.bf16 %v1441_v16, %v1437_v61  ;;  %v1340_v61 = vld [vmem:[#allocation9 + $0x68] sm:$0xff]  ;;  %v1342_v16 = vld [vmem:[#allocation9 + $0x78] sm:$0xff] }
 0x25e   :  { %v1346_v57 = vld [vmem:[#allocation9 + $0x98] sm:$0xff] }
 0x25f   :  { %3539 = vmatpush1.bf16.msra.mxu1 %v3538_v9 }
 0x260   :  { %3503 = vmatpush3.bf16.msra.mxu0 %v3500_v11  ;;  %v1432_v11 = vld [vmem:[#allocation9 + $0x330] sm:$0xff]  ;;  %3541 = vmatprep.subr.bf16.mxu1 %v3540_v15  ;;  %v1338_v15 = vld [vmem:[#allocation9 + $0x58] sm:$0xff] }
 0x261   :  { %3505 = vmatprep.subr.bf16.mxu0 %v3504_v17  ;;  %v3570_v12 = vpack.c.bf16 %v1432_v11, %v1428_v10  ;;  %v1327_v10 = vld [vmem:[#allocation9] sm:$0xff] }
 0x262   :  { %v1331_v11 = vld [vmem:[#allocation9 + $0x20] sm:$0xff] }
 0x263   :  { %3391 = vmatmul.mubr.msk.f32.vlgmr.msra.gmra.mrb[8].mxu0 %vm362_vm4, %v982_v24  ;;  %v1443_v24 = vld [vmem:[#allocation9 + $0x388] sm:$0xff] }
 0x264   :  { %3393 = vmatprep.mubr.msk.f32.mxu0 %vm362_vm4, %v983_v26  ;;  %3507 = vmatpush3.bf16.msra.mxu0 %v3504_v17  ;;  %v1434_v17 = vld [vmem:[#allocation9 + $0x340] sm:$0xff]  ;;  %v3544_v26 = vpack.c.bf16 %v1447_v55, %v1443_v24  ;;  %v1341_v24 = vld [vmem:[#allocation9 + $0x70] sm:$0xff]  ;;  %v1344_v55 = vld [vmem:[#allocation9 + $0x88] sm:$0xff] }
 0x265   :  { %3509 = vmatprep.subr.bf16.mxu0 %v3508_v23  ;;  %v3542_v20 = vpack.c.bf16 %v1438_v18, %v1434_v17  ;;  %v3586_v17 = vpack.c.bf16 %v1331_v11, %v1327_v10  ;;  %v1369_v11 = vld [vmem:[#allocation9 + $0x150] sm:$0xff] }
 0x267   :  { %3394 = vmatmul.mubr.msk.f32.gmra.mrb[10].mxu0 %vm362_vm4, %v984_v29  ;;  %3543 = vmatpush1.bf16.msra.mxu1 %v3542_v20  ;;  %v1446_v29 = vld [vmem:[#allocation9 + $0x3a0] sm:$0xff] }
 0x268   :  { %3511 = vmatpush3.bf16.msra.mxu0 %v3508_v23  ;;  %3412 = vmatprep.mubr.msk.f32.mxu0 %vm362_vm4, %v958_v31  ;;  %v3574_v23 = vpack.c.bf16 %v1440_v22, %v1436_v21  ;;  %v1444_v31 = vld [vmem:[#allocation9 + $0x390] sm:$0xff]  ;;  %v1339_v20 = vld [vmem:[#allocation9 + $0x60] sm:$0xff]  ;;  %v3588_v22 = vpack.c.bf16 %v1340_v61, %v1336_v14  ;;  %v1380_v14 = vld [vmem:[#allocation9 + $0x1a8] sm:$0xff] }
 0x269   :  { %3513 = vmatprep.subr.bf16.mxu0 %v3512_v28  ;;  %3545 = vmatprep.subr.bf16.mxu1 %v3544_v26  ;;  %v1337_v21 = vld [vmem:[#allocation9 + $0x50] sm:$0xff]  ;;  %v1378_v61 = vld [vmem:[#allocation9 + $0x198] sm:$0xff] }
 0x26c   :  { %3515 = vmatpush3.bf16.msra.mxu0 %v3512_v28  ;;  %v1442_v28 = vld [vmem:[#allocation9 + $0x380] sm:$0xff] }
 0x26d   :  { %3517 = vmatprep.subr.bf16.mxu0 %v3516_v32  ;;  %v3546_v30 = vpack.c.bf16 %v1446_v29, %v1442_v28  ;;  %v1350_v28 = vld [vmem:[#allocation9 + $0xb8] sm:$0xff] }
 0x26f   :  { %3547 = vmatpush1.bf16.msra.mxu1 %v3546_v30  ;;  %v1343_v30 = vld [vmem:[#allocation9 + $0x80] sm:$0xff] }
 0x270   :  { %3519 = vmatpush3.bf16.msra.mxu0 %v3516_v32  ;;  %v1448_v32 = vld [vmem:[#allocation9 + $0x3b0] sm:$0xff] }
 0x271   :  { %3553 = vmatprep.subr.bf16.mxu0 %v3552_v37  ;;  %v3578_v33 = vpack.c.bf16 %v1448_v32, %v1444_v31  ;;  %v1455_v37 = vld [vmem:[#allocation9 + $0x3e8] sm:$0xff]  ;;  %v1347_v31 = vld [vmem:[#allocation9 + $0xa0] sm:$0xff]  ;;  %v3592_v32 = vpack.c.bf16 %v1348_v25, %v1344_v55  ;;  %v1386_v25 = vld [vmem:[#allocation9 + $0x1d8] sm:$0xff] }
 0x272   :  { %v3548_v39 = vpack.c.bf16 %v1455_v37, %v1451_v36  ;;  %v1345_v36 = vld [vmem:[#allocation9 + $0x90] sm:$0xff]  ;;  %v1388_v55 = vld [vmem:[#allocation9 + $0x1e8] sm:$0xff] }
 0x273   :  { %3413 = vmatmul.mubr.msk.f32.vlgmr.msra.gmra.mrb[8].mxu0 %vm362_vm4, %v960_v45  ;;  %v1456_v45 = vld [vmem:[#allocation9 + $0x3f0] sm:$0xff] }
 0x274   :  { %3415 = vmatprep.mubr.msk.f32.mxu0 %vm362_vm4, %v962_v48  ;;  %3555 = vmatpush1.bf16.msra.mxu0 %v3554_v42  ;;  %v1454_v42 = vld [vmem:[#allocation9 + $0x3e0] sm:$0xff]  ;;  %v3582_v47 = vpack.c.bf16 %v1456_v45, %v1452_v44  ;;  %v1332_v48 = vld [vmem:[#allocation9 + $0x28] sm:$0xff]  ;;  %v1349_v37 = vld [vmem:[#allocation9 + $0xb0] sm:$0xff] }
 0x275   :  { %3557 = vmatprep.subr.bf16.mxu0 %v3556_v35  ;;  %v3580_v35 = vpack.c.bf16 %v1457_v40, %v1453_v38  ;;  %v3550_v43 = vpack.c.bf16 %v1454_v42, %v1450_v41  ;;  %3549 = vmatprep.subr.bf16.mxu1 %v3548_v39  ;;  %v3584_v34 = vpack.c.bf16 %v1332_v48, %v1328_v46  ;;  %v1352_v38 = vld [vmem:[#allocation9 + $0xc8] sm:$0xff]  ;;  %v1354_v40 = vld [vmem:[#allocation9 + $0xd8] sm:$0xff]  ;;  %v1355_v44 = vld [vmem:[#allocation9 + $0xe0] sm:$0xff] }
 0x276   :  { %v1356_v39 = vld [vmem:[#allocation9 + $0xe8] sm:$0xff]  ;;  %v1358_v41 = vld [vmem:[#allocation9 + $0xf8] sm:$0xff]  ;;  %v3594_v42 = vpack.c.bf16 %v1347_v31, %v1343_v30  ;;  %v1357_v48 = vld [vmem:[#allocation9 + $0xf0] sm:$0xff] }
 0x277   :  { %3416 = vmatmul.mubr.msk.f32.gmra.mrb[10].mxu0 %vm362_vm4, %v964_v53  ;;  %3551 = vmatpush1.bf16.msra.mxu1 %v3550_v43  ;;  %v940_v53 = vld [vmem:[%s4717_s7 + $0x2] ss:$0 sm:$0xff]  ;;  %v3596_v45 = vpack.c.bf16 %v1356_v39, %v1352_v38  ;;  %v3628_v46 = vpack.c.bf16 %v1358_v41, %v1354_v40  ;;  %v1815_v38 = vld [vmem:[#allocation9 + $0x618] sm:$0xff] }
 0x278   :  { %3559 = vmatpush1.bf16.msra.mxu0 %v3558_v49  ;;  %1593 = vmatprep.mubr.f32.mxu0 %v4283_v27  ;;  %v1330_v49 = vld [vmem:[#allocation9 + $0x18] sm:$0xff]  ;;  %v1351_v43 = vld [vmem:[#allocation9 + $0xc0] sm:$0xff] }
 0x279   :  { %3561 = vmatprep.subr.bf16.mxu0 %v3560_v51  ;;  %v1334_v51 = vld [vmem:[#allocation9 + $0x38] sm:$0xff]  ;;  %3585 = vmatprep.subr.bf16.mxu1 %v3584_v34 }
 0x27a   :  { %v3616_v52 = vpack.c.bf16 %v1334_v51, %v1330_v49  ;;  %v1360_v49 = vld [vmem:[#allocation9 + $0x108] sm:$0xff]  ;;  %v1362_v34 = vld [vmem:[#allocation9 + $0x118] sm:$0xff] }
 0x27b   :  { %v1364_v51 = vld [vmem:[#allocation9 + $0x128] sm:$0xff]  ;;  %v1819_v39 = vld [vmem:[#allocation9 + $0x638] sm:$0xff] }
 0x27c   :  { %3563 = vmatpush1.bf16.msra.mxu0 %v3562_v58 }
 0x27d   :  { %3565 = vmatprep.subr.bf16.mxu0 %v3564_v59 }
 0x280   :  { %3567 = vmatpush1.bf16.msra.mxu0 %v3566_v0 }
 0x281   :  { %3569 = vmatprep.subr.bf16.mxu0 %v3568_v8 }
 0x284   :  { %3571 = vmatpush1.bf16.msra.mxu0 %v3570_v12  ;;  %v1329_v12 = vld [vmem:[#allocation9 + $0x10] sm:$0xff] }
 0x285   :  { %3573 = vmatprep.subr.bf16.mxu0 %v3572_v19  ;;  %v3618_v18 = vpack.c.bf16 %v1333_v13, %v1329_v12  ;;  %v1335_v19 = vld [vmem:[#allocation9 + $0x40] sm:$0xff]  ;;  %v1373_v12 = vld [vmem:[#allocation9 + $0x170] sm:$0xff]  ;;  %v1376_v13 = vld [vmem:[#allocation9 + $0x188] sm:$0xff] }
 0x286   :  { %v3590_v29 = vpack.c.bf16 %v1339_v20, %v1335_v19  ;;  %v1379_v19 = vld [vmem:[#allocation9 + $0x1a0] sm:$0xff]  ;;  %v3608_v20 = vpack.c.bf16 %v1380_v14, %v1376_v13  ;;  %v1841_v13 = vld [vmem:[#allocation9 + $0x6e8] sm:$0xff]  ;;  %v1839_v14 = vld [vmem:[#allocation9 + $0x6d8] sm:$0xff] }
 0x288   :  { %3575 = vmatpush1.bf16.msra.mxu0 %v3574_v23  ;;  %v3620_v23 = vpack.c.bf16 %v1342_v16, %v1338_v15  ;;  %v1382_v15 = vld [vmem:[#allocation9 + $0x1b8] sm:$0xff] }
 0x289   :  { %3577 = vmatprep.subr.bf16.mxu0 %v3576_v62  ;;  %v3622_v62 = vpack.c.bf16 %v1341_v24, %v1337_v21  ;;  %v3640_v21 = vpack.c.bf16 %v1382_v15, %v1378_v61  ;;  %v1384_v24 = vld [vmem:[#allocation9 + $0x1c8] sm:$0xff]  ;;  %v1843_v61 = vld [vmem:[#allocation9 + $0x6f8] sm:$0xff] }
 0x28a   :  { %v3612_v30 = vpack.c.bf16 %v1388_v55, %v1384_v24  ;;  %v1849_v24 = vld [vmem:[#allocation9 + $0x728] sm:$0xff]  ;;  %v1847_v55 = vld [vmem:[#allocation9 + $0x718] sm:$0xff] }
 0x28c   :  { %3579 = vmatpush1.bf16.msra.mxu0 %v3578_v33  ;;  %v3624_v33 = vpack.c.bf16 %v1350_v28, %v1346_v57 }
 0x28d   :  { %3581 = vmatprep.subr.bf16.mxu0 %v3580_v35  ;;  %v3626_v35 = vpack.c.bf16 %v1349_v37, %v1345_v36  ;;  %v1813_v36 = vld [vmem:[#allocation9 + $0x608] sm:$0xff] }
 0x28e   :  { %v1817_v37 = vld [vmem:[#allocation9 + $0x628] sm:$0xff] }
 0x290   :  { %3583 = vmatpush1.bf16.msra.mxu0 %v3582_v47  ;;  %v1353_v47 = vld [vmem:[#allocation9 + $0xd0] sm:$0xff] }
 0x291   :  { %3617 = vmatprep.subr.bf16.mxu0 %v3616_v52  ;;  %v1366_v52 = vld [vmem:[#allocation9 + $0x138] sm:$0xff] }
 0x346   :  { %v3414_v54 = vpop.f32.mrb[8].mxu0 }
 0x347   :  { %v1307_v56 = vadd.f32 %v3414_v54, %v940_v53  ;;  %v1283_v58 = vpop.f32.mrb[9].mxu0  ;;  %v3630_v54 = vpack.c.bf16 %v1357_v48, %v1353_v47  ;;  %v1821_v47 = vld [vmem:[#allocation9 + $0x648] sm:$0xff] }
 0x348   :  { %v1306_v59 = vadd.f32 %v1283_v58, %v940_v53  ;;  %v1363_v58 = vld [vmem:[#allocation9 + $0x120] sm:$0xff]  ;;  %v1825_v48 = vld [vmem:[#allocation9 + $0x668] sm:$0xff] }
 0x349   :  { %vm1311_vm4 = vcmp.ge.f32.partialorder %v1307_v56, 0.0  ;;  %v1315_v60 = vmul.f32 0.01, %v1307_v56 }
 0x34a   :  { %vm1310_vm11 = vcmp.ge.f32.partialorder %v1306_v59, 0.0  ;;  %v1314_v63 = vmul.f32 0.01, %v1306_v59  ;;  %v3417_v0 = vpop.f32.mrb[10].mxu0 }
 0x34b   :  { %v1319_v1 = vsel %vm1311_vm4, %v1307_v56, %v1315_v60  ;;  %v1309_v2 = vadd.f32 %v3417_v0, %v940_v53  ;;  %v1293_v3 = vpop.f32.mrb[11].mxu0  ;;  %v1359_v56 = vld [vmem:[#allocation9 + $0x100] sm:$0xff]  ;;  %v3632_v60 = vpack.c.bf16 %v1366_v52, %v1362_v34  ;;  %v1365_v0 = vld [vmem:[#allocation9 + $0x130] sm:$0xff] }
 0x34c   :  { %1323 = vst [vmem:[#allocation4 + $0x8] sm:$0xff] %v1319_v1  ;;  %v1318_v4 = vsel %vm1310_vm11, %v1306_v59, %v1314_v63  ;;  %v1308_v5 = vadd.f32 %v1293_v3, %v940_v53  ;;  %v3598_v53 = vpack.c.bf16 %v1355_v44, %v1351_v43  ;;  %v3600_v59 = vpack.c.bf16 %v1364_v51, %v1360_v49  ;;  %v1361_v63 = vld [vmem:[#allocation9 + $0x110] sm:$0xff]  ;;  %v1368_v1 = vld [vmem:[#allocation9 + $0x148] sm:$0xff]  ;;  %v1370_v3 = vld [vmem:[#allocation9 + $0x158] sm:$0xff] }
 0x34d   :  { %1322 = vst [vmem:[#allocation4] sm:$0xff] %v1318_v4  ;;  %vm1313_vm12 = vcmp.ge.f32.partialorder %v1309_v2, 0.0  ;;  %v1317_v6 = vmul.f32 0.01, %v1309_v2  ;;  %v1374_v4 = vld [vmem:[#allocation9 + $0x178] sm:$0xff]  ;;  %v3648_v43 = vpack.c.bf16 %v1817_v37, %v1813_v36  ;;  %v3680_v44 = vpack.c.bf16 %v1819_v39, %v1815_v38  ;;  %v1857_v36 = vld [vmem:[#allocation9 + $0x768] sm:$0xff] }
 0x34e   :  { %vm1312_vm13 = vcmp.ge.f32.partialorder %v1308_v5, 0.0  ;;  %v1316_v7 = vmul.f32 0.01, %v1308_v5  ;;  %v3636_v10 = vpack.c.bf16 %v1374_v4, %v1370_v3  ;;  %v1823_v49 = vld [vmem:[#allocation9 + $0x658] sm:$0xff] }
 0x34f   :  { %v1321_v8 = vsel %vm1313_vm12, %v1309_v2, %v1317_v6  ;;  %v1372_v2 = vld [vmem:[#allocation9 + $0x168] sm:$0xff]  ;;  %v3634_v6 = vpack.c.bf16 %v1365_v0, %v1361_v63  ;;  %v1827_v51 = vld [vmem:[#allocation9 + $0x678] sm:$0xff] }
 0x350   :  { %1325 = vst [vmem:[#allocation4 + $0x18] sm:$0xff] %v1321_v8  ;;  %v1320_v9 = vsel %vm1312_vm13, %v1308_v5, %v1316_v7  ;;  %v3602_v5 = vpack.c.bf16 %v1363_v58, %v1359_v56  ;;  %v1367_v7 = vld [vmem:[#allocation9 + $0x140] sm:$0xff]  ;;  %v1822_v56 = vld [vmem:[#allocation9 + $0x650] sm:$0xff]  ;;  %v3652_v58 = vpack.c.bf16 %v1825_v48, %v1821_v47  ;;  %v1829_v63 = vld [vmem:[#allocation9 + $0x688] sm:$0xff] }
 0x351   :  { %1324 = vst [vmem:[#allocation4 + $0x10] sm:$0xff] %v1320_v9  ;;  %v1371_v8 = vld [vmem:[#allocation9 + $0x160] sm:$0xff]  ;;  %v3604_v9 = vpack.c.bf16 %v1372_v2, %v1368_v1  ;;  %v1833_v0 = vld [vmem:[#allocation9 + $0x6a8] sm:$0xff]  ;;  %v1831_v2 = vld [vmem:[#allocation9 + $0x698] sm:$0xff] }
 0x352   :  { %v3606_v16 = vpack.c.bf16 %v1371_v8, %v1367_v7  ;;  %v1835_v3 = vld [vmem:[#allocation9 + $0x6b8] sm:$0xff]  ;;  %v1832_v7 = vld [vmem:[#allocation9 + $0x6a0] sm:$0xff]  ;;  %v3656_v8 = vpack.c.bf16 %v1833_v0, %v1829_v63  ;;  %v1865_v47 = vld [vmem:[#allocation9 + $0x7a8] sm:$0xff] }
 0x353   :  { %v1855_v37 = vld [vmem:[#allocation9 + $0x758] sm:$0xff]  ;;  %v1873_v63 = vld [vmem:[#allocation9 + $0x7e8] sm:$0xff] }
 0x354   :  { %v1859_v38 = vld [vmem:[#allocation9 + $0x778] sm:$0xff] }
 0x355   :  { %v1863_v48 = vld [vmem:[#allocation9 + $0x798] sm:$0xff] }
 0x356   :  { %v1871_v0 = vld [vmem:[#allocation9 + $0x7d8] sm:$0xff] }
 0x358   :  { %v1392_v26 = vld [vmem:[#allocation4 + $0x1] ss:$4 sm:$0xff]  ;;  %v1326_v1 = vld [vmem:[#allocation4] ss:$4 sm:$0xff] }
 0x359   :  { %1523 = vmatmul.mubr.f32.vlgmr.msra.gmra.mrb[16].mxu1 %v1392_v26  ;;  %1594 = vmatmul.mubr.f32.vlgmr.msra.gmra.mrb[12].mxu0 %v1392_v26  ;;  %v1390_v26 = vld [vmem:[#allocation9 + $0x1f8] sm:$0xff] }
 0x35a   :  { %3587 = vmatpush1.bf16.msra.mxu1 %v3586_v17  ;;  %3619 = vmatpush1.bf16.msra.mxu0 %v3618_v18  ;;  %v3638_v17 = vpack.c.bf16 %v1373_v12, %v1369_v11  ;;  %v1375_v18 = vld [vmem:[#allocation9 + $0x180] sm:$0xff]  ;;  %v3644_v31 = vpack.c.bf16 %v1390_v26, %v1386_v25  ;;  %v1834_v11 = vld [vmem:[#allocation9 + $0x6b0] sm:$0xff]  ;;  %v1837_v12 = vld [vmem:[#allocation9 + $0x6c8] sm:$0xff] }
 0x35b   :  { %3589 = vmatprep.subr.bf16.mxu1 %v3588_v22  ;;  %3621 = vmatprep.subr.bf16.mxu0 %v3620_v23  ;;  %v1377_v22 = vld [vmem:[#allocation9 + $0x190] sm:$0xff]  ;;  %v3610_v57 = vpack.c.bf16 %v1379_v19, %v1375_v18  ;;  %v1840_v18 = vld [vmem:[#allocation9 + $0x6e0] sm:$0xff]  ;;  %v3660_v19 = vpack.c.bf16 %v1841_v13, %v1837_v12  ;;  %v1851_v25 = vld [vmem:[#allocation9 + $0x738] sm:$0xff] }
 0x35c   :  { %1664 = vmatprep.mubr.f32.mxu1 %v4283_v27  ;;  %1735 = vmatprep.mubr.f32.mxu0 %v4283_v27  ;;  %v1381_v23 = vld [vmem:[#allocation9 + $0x1b0] sm:$0xff]  ;;  %v1748_v12 = vld [vmem:[#allocation9 + $0x418] sm:$0xff] }
 0x35d   :  { %v3642_v28 = vpack.c.bf16 %v1381_v23, %v1377_v22  ;;  %v1842_v22 = vld [vmem:[#allocation9 + $0x6f0] sm:$0xff]  ;;  %v1845_v23 = vld [vmem:[#allocation9 + $0x708] sm:$0xff]  ;;  %v1752_v13 = vld [vmem:[#allocation9 + $0x438] sm:$0xff] }
 0x35e   :  { %3591 = vmatpush1.bf16.msra.mxu1 %v3590_v29  ;;  %3623 = vmatpush1.bf16.msra.mxu0 %v3622_v62  ;;  %v1383_v29 = vld [vmem:[#allocation9 + $0x1c0] sm:$0xff] }
 0x35f   :  { %3593 = vmatprep.subr.bf16.mxu1 %v3592_v32  ;;  %3625 = vmatprep.subr.bf16.mxu0 %v3624_v33  ;;  %v1387_v62 = vld [vmem:[#allocation9 + $0x1e0] sm:$0xff]  ;;  %v1385_v32 = vld [vmem:[#allocation9 + $0x1d0] sm:$0xff] }
 0x360   :  { %v1389_v33 = vld [vmem:[#allocation9 + $0x1f0] sm:$0xff]  ;;  %v3614_v40 = vpack.c.bf16 %v1387_v62, %v1383_v29  ;;  %v1848_v29 = vld [vmem:[#allocation9 + $0x720] sm:$0xff]  ;;  %v3664_v62 = vpack.c.bf16 %v1849_v24, %v1845_v23  ;;  %v1756_v23 = vld [vmem:[#allocation9 + $0x458] sm:$0xff] }
 0x361   :  { %v3646_v41 = vpack.c.bf16 %v1389_v33, %v1385_v32  ;;  %v1850_v32 = vld [vmem:[#allocation9 + $0x730] sm:$0xff]  ;;  %v1853_v33 = vld [vmem:[#allocation9 + $0x748] sm:$0xff]  ;;  %v1760_v24 = vld [vmem:[#allocation9 + $0x478] sm:$0xff] }
 0x362   :  { %3595 = vmatpush1.bf16.msra.mxu1 %v3594_v42  ;;  %3627 = vmatpush1.bf16.msra.mxu0 %v3626_v35  ;;  %v1812_v42 = vld [vmem:[#allocation9 + $0x600] sm:$0xff] }
 0x363   :  { %3597 = vmatprep.subr.bf16.mxu1 %v3596_v45  ;;  %3629 = vmatprep.subr.bf16.mxu0 %v3628_v46  ;;  %v1816_v35 = vld [vmem:[#allocation9 + $0x620] sm:$0xff]  ;;  %v1814_v45 = vld [vmem:[#allocation9 + $0x610] sm:$0xff] }
 0x364   :  { %v1818_v46 = vld [vmem:[#allocation9 + $0x630] sm:$0xff]  ;;  %v3650_v34 = vpack.c.bf16 %v1816_v35, %v1812_v42  ;;  %v1856_v42 = vld [vmem:[#allocation9 + $0x760] sm:$0xff]  ;;  %v3668_v35 = vpack.c.bf16 %v1857_v36, %v1853_v33  ;;  %v1764_v36 = vld [vmem:[#allocation9 + $0x498] sm:$0xff] }
 0x365   :  { %v3682_v52 = vpack.c.bf16 %v1818_v46, %v1814_v45  ;;  %v1858_v45 = vld [vmem:[#allocation9 + $0x770] sm:$0xff]  ;;  %v1861_v46 = vld [vmem:[#allocation9 + $0x788] sm:$0xff] }
 0x366   :  { %3599 = vmatpush1.bf16.msra.mxu1 %v3598_v53  ;;  %3631 = vmatpush1.bf16.msra.mxu0 %v3630_v54  ;;  %v1820_v53 = vld [vmem:[#allocation9 + $0x640] sm:$0xff] }
 0x367   :  { %3601 = vmatprep.subr.bf16.mxu1 %v3600_v59  ;;  %3633 = vmatprep.subr.bf16.mxu0 %v3632_v60  ;;  %v1824_v54 = vld [vmem:[#allocation9 + $0x660] sm:$0xff]  ;;  %v3684_v59 = vpack.c.bf16 %v1827_v51, %v1823_v49  ;;  %v1826_v60 = vld [vmem:[#allocation9 + $0x670] sm:$0xff]  ;;  %v1867_v49 = vld [vmem:[#allocation9 + $0x7b8] sm:$0xff] }
 0x368   :  { %v3654_v4 = vpack.c.bf16 %v1824_v54, %v1820_v53  ;;  %v1864_v53 = vld [vmem:[#allocation9 + $0x7a0] sm:$0xff]  ;;  %v3672_v54 = vpack.c.bf16 %v1865_v47, %v1861_v46  ;;  %v1774_v46 = vld [vmem:[#allocation9 + $0x4e8] sm:$0xff]  ;;  %v1772_v47 = vld [vmem:[#allocation9 + $0x4d8] sm:$0xff] }
 0x369   :  { %v1810_v33 = vld [vmem:[#allocation4 + $0x3] ss:$4 sm:$0xff] }
 0x36a   :  { %3603 = vmatpush1.bf16.msra.mxu1 %v3602_v5  ;;  %3635 = vmatpush1.bf16.msra.mxu0 %v3634_v6  ;;  %v3686_v5 = vpack.c.bf16 %v1826_v60, %v1822_v56  ;;  %v1828_v6 = vld [vmem:[#allocation9 + $0x680] sm:$0xff]  ;;  %v3704_v56 = vpack.c.bf16 %v1867_v49, %v1863_v48  ;;  %v1869_v60 = vld [vmem:[#allocation9 + $0x7c8] sm:$0xff]  ;;  %v1776_v48 = vld [vmem:[#allocation9 + $0x4f8] sm:$0xff] }
 0x36b   :  { %3605 = vmatprep.subr.bf16.mxu1 %v3604_v9  ;;  %3637 = vmatprep.subr.bf16.mxu0 %v3636_v10  ;;  %v3688_v9 = vpack.c.bf16 %v1835_v3, %v1831_v2  ;;  %v1830_v10 = vld [vmem:[#allocation9 + $0x690] sm:$0xff]  ;;  %v3658_v15 = vpack.c.bf16 %v1832_v7, %v1828_v6  ;;  %v3676_v6 = vpack.c.bf16 %v1873_v63, %v1869_v60  ;;  %v1782_v60 = vld [vmem:[#allocation9 + $0x528] sm:$0xff]  ;;  %v1780_v63 = vld [vmem:[#allocation9 + $0x518] sm:$0xff] }
 0x36e   :  { %3607 = vmatpush1.bf16.msra.mxu1 %v3606_v16  ;;  %3639 = vmatpush1.bf16.msra.mxu0 %v3638_v17  ;;  %v3690_v16 = vpack.c.bf16 %v1834_v11, %v1830_v10  ;;  %v1836_v17 = vld [vmem:[#allocation9 + $0x6c0] sm:$0xff]  ;;  %v1746_v10 = vld [vmem:[#allocation9 + $0x408] sm:$0xff] }
 0x36f   :  { %3609 = vmatprep.subr.bf16.mxu1 %v3608_v20  ;;  %3641 = vmatprep.subr.bf16.mxu0 %v3640_v21  ;;  %v3692_v20 = vpack.c.bf16 %v1843_v61, %v1839_v14  ;;  %v1838_v21 = vld [vmem:[#allocation9 + $0x6d0] sm:$0xff]  ;;  %v3662_v26 = vpack.c.bf16 %v1840_v18, %v1836_v17  ;;  %v1750_v11 = vld [vmem:[#allocation9 + $0x428] sm:$0xff]  ;;  %v3744_v18 = vpack.c.bf16 %v1752_v13, %v1748_v12 }
 0x370   :  { %v3712_v17 = vpack.c.bf16 %v1750_v11, %v1746_v10  ;;  %v1788_v10 = vld [vmem:[#allocation9 + $0x558] sm:$0xff] }
 0x371   :  { %v1792_v11 = vld [vmem:[#allocation9 + $0x578] sm:$0xff] }
 0x372   :  { %3611 = vmatpush1.bf16.msra.mxu1 %v3610_v57  ;;  %3643 = vmatpush1.bf16.msra.mxu0 %v3642_v28  ;;  %v3694_v57 = vpack.c.bf16 %v1842_v22, %v1838_v21  ;;  %v1844_v28 = vld [vmem:[#allocation9 + $0x700] sm:$0xff]  ;;  %v1754_v21 = vld [vmem:[#allocation9 + $0x448] sm:$0xff] }
 0x373   :  { %3613 = vmatprep.subr.bf16.mxu1 %v3612_v30  ;;  %3645 = vmatprep.subr.bf16.mxu0 %v3644_v31  ;;  %v3696_v30 = vpack.c.bf16 %v1851_v25, %v1847_v55  ;;  %v1846_v31 = vld [vmem:[#allocation9 + $0x710] sm:$0xff]  ;;  %v3666_v39 = vpack.c.bf16 %v1848_v29, %v1844_v28  ;;  %v1758_v22 = vld [vmem:[#allocation9 + $0x468] sm:$0xff] }
 0x374   :  { %v1755_v28 = vld [vmem:[#allocation9 + $0x450] sm:$0xff]  ;;  %v3716_v29 = vpack.c.bf16 %v1758_v22, %v1754_v21  ;;  %v1796_v21 = vld [vmem:[#allocation9 + $0x598] sm:$0xff] }
 0x375   :  { %v1800_v22 = vld [vmem:[#allocation9 + $0x5b8] sm:$0xff] }
 0x376   :  { %3615 = vmatpush1.bf16.msra.mxu1 %v3614_v40  ;;  %3647 = vmatpush1.bf16.msra.mxu0 %v3646_v41  ;;  %v3698_v40 = vpack.c.bf16 %v1850_v32, %v1846_v31  ;;  %v1852_v41 = vld [vmem:[#allocation9 + $0x740] sm:$0xff]  ;;  %v1762_v31 = vld [vmem:[#allocation9 + $0x488] sm:$0xff] }
 0x377   :  { %3649 = vmatprep.subr.bf16.mxu1 %v3648_v43  ;;  %3681 = vmatprep.subr.bf16.mxu0 %v3680_v44  ;;  %v3700_v43 = vpack.c.bf16 %v1859_v38, %v1855_v37  ;;  %v1854_v44 = vld [vmem:[#allocation9 + $0x750] sm:$0xff]  ;;  %v3670_v51 = vpack.c.bf16 %v1856_v42, %v1852_v41  ;;  %v1766_v32 = vld [vmem:[#allocation9 + $0x4a8] sm:$0xff]  ;;  %v1768_v37 = vld [vmem:[#allocation9 + $0x4b8] sm:$0xff] }
 0x378   :  { %v1765_v41 = vld [vmem:[#allocation9 + $0x4a0] sm:$0xff]  ;;  %v3720_v42 = vpack.c.bf16 %v1766_v32, %v1762_v31  ;;  %v1804_v31 = vld [vmem:[#allocation9 + $0x5d8] sm:$0xff] }
 0x379   :  { %1665 = vmatmul.mubr.f32.vlgmr.msra.gmra.mrb[16].mxu1 %v1326_v1  ;;  %1736 = vmatmul.mubr.f32.vlgmr.msra.gmra.mrb[12].mxu0 %v1326_v1  ;;  %v1875_v1 = vld [vmem:[#allocation9 + $0x7f8] sm:$0xff] }
 0x37a   :  { %3651 = vmatpush1.bf16.msra.mxu1 %v3650_v34  ;;  %3683 = vmatpush1.bf16.msra.mxu0 %v3682_v52  ;;  %v3702_v34 = vpack.c.bf16 %v1858_v45, %v1854_v44  ;;  %v1860_v52 = vld [vmem:[#allocation9 + $0x780] sm:$0xff]  ;;  %v3708_v7 = vpack.c.bf16 %v1875_v1, %v1871_v0  ;;  %v1767_v44 = vld [vmem:[#allocation9 + $0x4b0] sm:$0xff]  ;;  %v1770_v45 = vld [vmem:[#allocation9 + $0x4c8] sm:$0xff] }
 0x37b   :  { %3653 = vmatprep.subr.bf16.mxu1 %v3652_v58  ;;  %3685 = vmatprep.subr.bf16.mxu0 %v3684_v59  ;;  %v1862_v58 = vld [vmem:[#allocation9 + $0x790] sm:$0xff]  ;;  %v3674_v2 = vpack.c.bf16 %v1864_v53, %v1860_v52  ;;  %v1773_v52 = vld [vmem:[#allocation9 + $0x4e0] sm:$0xff]  ;;  %v3724_v53 = vpack.c.bf16 %v1774_v46, %v1770_v45  ;;  %v1784_v0 = vld [vmem:[#allocation9 + $0x538] sm:$0xff] }
 0x37c   :  { %1940 = vmatprep.mubr.f32.mxu1 %v4283_v27  ;;  %2011 = vmatprep.mubr.f32.mxu0 %v4283_v27  ;;  %v1866_v59 = vld [vmem:[#allocation9 + $0x7b0] sm:$0xff]  ;;  %v1808_v32 = vld [vmem:[#allocation9 + $0x5f8] sm:$0xff] }
 0x37d   :  { %v3706_v3 = vpack.c.bf16 %v1866_v59, %v1862_v58  ;;  %v1775_v58 = vld [vmem:[#allocation9 + $0x4f0] sm:$0xff]  ;;  %v1778_v59 = vld [vmem:[#allocation9 + $0x508] sm:$0xff]  ;;  %v2210_v45 = vld [vmem:[#allocation10 + $0x38] sm:$0xff] }
 0x37e   :  { %3655 = vmatpush1.bf16.msra.mxu1 %v3654_v4  ;;  %3687 = vmatpush1.bf16.msra.mxu0 %v3686_v5  ;;  %v1868_v4 = vld [vmem:[#allocation9 + $0x7c0] sm:$0xff] }
 0x37f   :  { %3657 = vmatprep.subr.bf16.mxu1 %v3656_v8  ;;  %3689 = vmatprep.subr.bf16.mxu0 %v3688_v9  ;;  %v1872_v5 = vld [vmem:[#allocation9 + $0x7e0] sm:$0xff]  ;;  %v1870_v8 = vld [vmem:[#allocation9 + $0x7d0] sm:$0xff] }
 0x380   :  { %v1874_v9 = vld [vmem:[#allocation9 + $0x7f0] sm:$0xff]  ;;  %v3678_v14 = vpack.c.bf16 %v1872_v5, %v1868_v4  ;;  %v3728_v4 = vpack.c.bf16 %v1782_v60, %v1778_v59  ;;  %v3760_v5 = vpack.c.bf16 %v1784_v0, %v1780_v63  ;;  %v2218_v59 = vld [vmem:[#allocation10 + $0x78] sm:$0xff]  ;;  %v2211_v0 = vld [vmem:[#allocation10 + $0x40] sm:$0xff] }
 0x381   :  { %v3710_v61 = vpack.c.bf16 %v1874_v9, %v1870_v8  ;;  %v1786_v8 = vld [vmem:[#allocation9 + $0x548] sm:$0xff] }
 0x382   :  { %3659 = vmatpush1.bf16.msra.mxu1 %v3658_v15  ;;  %3691 = vmatpush1.bf16.msra.mxu0 %v3690_v16  ;;  %v1745_v15 = vld [vmem:[#allocation9 + $0x400] sm:$0xff]  ;;  %v1790_v9 = vld [vmem:[#allocation9 + $0x568] sm:$0xff] }
 0x383   :  { %3661 = vmatprep.subr.bf16.mxu1 %v3660_v19  ;;  %3693 = vmatprep.subr.bf16.mxu0 %v3692_v20  ;;  %v1749_v16 = vld [vmem:[#allocation9 + $0x420] sm:$0xff]  ;;  %v1747_v19 = vld [vmem:[#allocation9 + $0x410] sm:$0xff] }
 0x384   :  { %v1751_v20 = vld [vmem:[#allocation9 + $0x430] sm:$0xff]  ;;  %v3714_v55 = vpack.c.bf16 %v1749_v16, %v1745_v15  ;;  %v3732_v15 = vpack.c.bf16 %v1790_v9, %v1786_v8  ;;  %v3764_v16 = vpack.c.bf16 %v1792_v11, %v1788_v10  ;;  %v2222_v8 = vld [vmem:[#allocation10 + $0x98] sm:$0xff] }
 0x385   :  { %v3746_v25 = vpack.c.bf16 %v1751_v20, %v1747_v19  ;;  %v1794_v19 = vld [vmem:[#allocation9 + $0x588] sm:$0xff]  ;;  %v2226_v9 = vld [vmem:[#allocation10 + $0xb8] sm:$0xff] }
 0x386   :  { %3663 = vmatpush1.bf16.msra.mxu1 %v3662_v26  ;;  %3695 = vmatpush1.bf16.msra.mxu0 %v3694_v57  ;;  %v1753_v26 = vld [vmem:[#allocation9 + $0x440] sm:$0xff]  ;;  %v1798_v20 = vld [vmem:[#allocation9 + $0x5a8] sm:$0xff] }
 0x387   :  { %3665 = vmatprep.subr.bf16.mxu1 %v3664_v62  ;;  %3697 = vmatprep.subr.bf16.mxu0 %v3696_v30  ;;  %v1757_v57 = vld [vmem:[#allocation9 + $0x460] sm:$0xff]  ;;  %v3748_v62 = vpack.c.bf16 %v1760_v24, %v1756_v23  ;;  %v1759_v30 = vld [vmem:[#allocation9 + $0x470] sm:$0xff] }
 0x388   :  { %v3718_v38 = vpack.c.bf16 %v1757_v57, %v1753_v26  ;;  %v3736_v26 = vpack.c.bf16 %v1798_v20, %v1794_v19  ;;  %v3768_v57 = vpack.c.bf16 %v1800_v22, %v1796_v21  ;;  %v2230_v19 = vld [vmem:[#allocation10 + $0xd8] sm:$0xff] }
 0x389   :  { %v2234_v20 = vld [vmem:[#allocation10 + $0xf8] sm:$0xff] }
 0x38a   :  { %3667 = vmatpush1.bf16.msra.mxu1 %v3666_v39  ;;  %3699 = vmatpush1.bf16.msra.mxu0 %v3698_v40  ;;  %v3750_v39 = vpack.c.bf16 %v1759_v30, %v1755_v28  ;;  %v1761_v40 = vld [vmem:[#allocation9 + $0x480] sm:$0xff]  ;;  %v1795_v28 = vld [vmem:[#allocation9 + $0x590] sm:$0xff]  ;;  %v1806_v30 = vld [vmem:[#allocation9 + $0x5e8] sm:$0xff] }
 0x38b   :  { %3669 = vmatprep.subr.bf16.mxu1 %v3668_v35  ;;  %3701 = vmatprep.subr.bf16.mxu0 %v3700_v43  ;;  %v3752_v35 = vpack.c.bf16 %v1768_v37, %v1764_v36  ;;  %v1763_v43 = vld [vmem:[#allocation9 + $0x490] sm:$0xff]  ;;  %v3722_v49 = vpack.c.bf16 %v1765_v41, %v1761_v40  ;;  %v1801_v37 = vld [vmem:[#allocation9 + $0x5c0] sm:$0xff]  ;;  %v3772_v40 = vpack.c.bf16 %v1808_v32, %v1804_v31 }
 0x38c   :  { %v1803_v41 = vld [vmem:[#allocation9 + $0x5d0] sm:$0xff] }
 0x38e   :  { %3671 = vmatpush1.bf16.msra.mxu1 %v3670_v51  ;;  %3703 = vmatpush1.bf16.msra.mxu0 %v3702_v34  ;;  %v3754_v51 = vpack.c.bf16 %v1767_v44, %v1763_v43  ;;  %v1769_v34 = vld [vmem:[#allocation9 + $0x4c0] sm:$0xff]  ;;  %v2208_v43 = vld [vmem:[#allocation10 + $0x28] sm:$0xff]  ;;  %v2206_v44 = vld [vmem:[#allocation10 + $0x18] sm:$0xff] }
 0x38f   :  { %3673 = vmatprep.subr.bf16.mxu1 %v3672_v54  ;;  %3705 = vmatprep.subr.bf16.mxu0 %v3704_v56  ;;  %v3756_v54 = vpack.c.bf16 %v1776_v48, %v1772_v47  ;;  %v1771_v56 = vld [vmem:[#allocation9 + $0x4d0] sm:$0xff]  ;;  %v3726_v1 = vpack.c.bf16 %v1773_v52, %v1769_v34  ;;  %v2203_v48 = vld [vmem:[#allocation10] sm:$0xff]  ;;  %v3904_v34 = vpack.c.bf16 %v2210_v45, %v2206_v44 }
 0x390   :  { %v2205_v52 = vld [vmem:[#allocation10 + $0x10] sm:$0xff] }
 0x392   :  { %3675 = vmatpush1.bf16.msra.mxu1 %v3674_v2  ;;  %3707 = vmatpush1.bf16.msra.mxu0 %v3706_v3  ;;  %v1777_v2 = vld [vmem:[#allocation9 + $0x500] sm:$0xff] }
 0x393   :  { %3677 = vmatprep.subr.bf16.mxu1 %v3676_v6  ;;  %3709 = vmatprep.subr.bf16.mxu0 %v3708_v7  ;;  %v1781_v3 = vld [vmem:[#allocation9 + $0x520] sm:$0xff]  ;;  %v1779_v6 = vld [vmem:[#allocation9 + $0x510] sm:$0xff] }
 0x394   :  { %v1783_v7 = vld [vmem:[#allocation9 + $0x530] sm:$0xff]  ;;  %v3730_v12 = vpack.c.bf16 %v1781_v3, %v1777_v2 }
 0x395   :  { %v3762_v13 = vpack.c.bf16 %v1783_v7, %v1779_v6  ;;  %v2224_v6 = vld [vmem:[#allocation10 + $0xa8] sm:$0xff] }
 0x396   :  { %3679 = vmatpush1.bf16.msra.mxu1 %v3678_v14  ;;  %3711 = vmatpush1.bf16.msra.mxu0 %v3710_v61  ;;  %v1785_v14 = vld [vmem:[#allocation9 + $0x540] sm:$0xff] }
 0x397   :  { %3713 = vmatprep.subr.bf16.mxu1 %v3712_v17  ;;  %3745 = vmatprep.subr.bf16.mxu0 %v3744_v18  ;;  %v1789_v61 = vld [vmem:[#allocation9 + $0x560] sm:$0xff]  ;;  %v1787_v17 = vld [vmem:[#allocation9 + $0x550] sm:$0xff] }
 0x398   :  { %v1791_v18 = vld [vmem:[#allocation9 + $0x570] sm:$0xff]  ;;  %v3734_v23 = vpack.c.bf16 %v1789_v61, %v1785_v14  ;;  %v3912_v61 = vpack.c.bf16 %v2226_v9, %v2222_v8  ;;  %v2259_v9 = vld [vmem:[#allocation10 + $0x1c0] sm:$0xff] }
 0x399   :  { %1941 = vmatmul.mubr.f32.vlgmr.msra.gmra.mrb[16].mxu1 %v1810_v33  ;;  %2012 = vmatmul.mubr.f32.vlgmr.msra.gmra.mrb[12].mxu0 %v1810_v33  ;;  %v3766_v24 = vpack.c.bf16 %v1791_v18, %v1787_v17  ;;  %v1743_v7 = vld [vmem:[#allocation4 + $0x2] ss:$4 sm:$0xff] }
 0x39a   :  { %3715 = vmatpush1.bf16.msra.mxu1 %v3714_v55  ;;  %3747 = vmatpush1.bf16.msra.mxu0 %v3746_v25  ;;  %v1793_v55 = vld [vmem:[#allocation9 + $0x580] sm:$0xff]  ;;  %v2228_v17 = vld [vmem:[#allocation10 + $0xc8] sm:$0xff] }
 0x39b   :  { %3717 = vmatprep.subr.bf16.mxu1 %v3716_v29  ;;  %3749 = vmatprep.subr.bf16.mxu0 %v3748_v62  ;;  %v1797_v25 = vld [vmem:[#allocation9 + $0x5a0] sm:$0xff]  ;;  %v1799_v29 = vld [vmem:[#allocation9 + $0x5b0] sm:$0xff]  ;;  %v1802_v62 = vld [vmem:[#allocation9 + $0x5c8] sm:$0xff] }
 0x39c   :  { %2082 = vmatprep.mubr.f32.mxu1 %v4283_v27  ;;  %2153 = vmatprep.mubr.f32.mxu0 %v4283_v27  ;;  %v3758_v27 = vpack.c.bf16 %v1775_v58, %v1771_v56  ;;  %v3738_v33 = vpack.c.bf16 %v1797_v25, %v1793_v55  ;;  %v3770_v36 = vpack.c.bf16 %v1799_v29, %v1795_v28  ;;  %v2216_v56 = vld [vmem:[#allocation10 + $0x68] sm:$0xff]  ;;  %v2214_v58 = vld [vmem:[#allocation10 + $0x58] sm:$0xff] }
 0x39d   :  { %v3908_v3 = vpack.c.bf16 %v2218_v59, %v2214_v58  ;;  %v2232_v18 = vld [vmem:[#allocation10 + $0xe8] sm:$0xff]  ;;  %v3916_v25 = vpack.c.bf16 %v2234_v20, %v2230_v19  ;;  %v2267_v20 = vld [vmem:[#allocation10 + $0x200] sm:$0xff] }
 0x39e   :  { %3719 = vmatpush1.bf16.msra.mxu1 %v3718_v38  ;;  %3751 = vmatpush1.bf16.msra.mxu0 %v3750_v39  ;;  %v1805_v38 = vld [vmem:[#allocation9 + $0x5e0] sm:$0xff]  ;;  %v3740_v39 = vpack.c.bf16 %v1806_v30, %v1802_v62  ;;  %v3788_v55 = vpack.c.bf16 %v2232_v18, %v2228_v17  ;;  %v2236_v28 = vld [vmem:[#allocation10 + $0x108] sm:$0xff]  ;;  %v2238_v62 = vld [vmem:[#allocation10 + $0x118] sm:$0xff] }
 0x39f   :  { %3721 = vmatprep.subr.bf16.mxu1 %v3720_v42  ;;  %3753 = vmatprep.subr.bf16.mxu0 %v3752_v35  ;;  %v1807_v42 = vld [vmem:[#allocation9 + $0x5f0] sm:$0xff]  ;;  %v2204_v35 = vld [vmem:[#allocation10 + $0x8] sm:$0xff]  ;;  %v3742_v46 = vpack.c.bf16 %v1805_v38, %v1801_v37  ;;  %v2242_v30 = vld [vmem:[#allocation10 + $0x138] sm:$0xff] }
 0x3a0   :  { %v3774_v47 = vpack.c.bf16 %v1807_v42, %v1803_v41  ;;  %v2240_v29 = vld [vmem:[#allocation10 + $0x128] sm:$0xff]  ;;  %v3920_v38 = vpack.c.bf16 %v2242_v30, %v2238_v62  ;;  %v2274_v17 = vld [vmem:[#allocation10 + $0x238] sm:$0xff]  ;;  %v2275_v30 = vld [vmem:[#allocation10 + $0x240] sm:$0xff] }
 0x3a1   :  { %v3792_v37 = vpack.c.bf16 %v2240_v29, %v2236_v28  ;;  %v2244_v41 = vld [vmem:[#allocation10 + $0x148] sm:$0xff]  ;;  %v2282_v28 = vld [vmem:[#allocation10 + $0x278] sm:$0xff] }
 0x3a2   :  { %3723 = vmatpush1.bf16.msra.mxu1 %v3722_v49  ;;  %3755 = vmatpush1.bf16.msra.mxu0 %v3754_v51  ;;  %v2207_v49 = vld [vmem:[#allocation10 + $0x20] sm:$0xff]  ;;  %v3776_v51 = vpack.c.bf16 %v2208_v43, %v2204_v35  ;;  %v2248_v42 = vld [vmem:[#allocation10 + $0x168] sm:$0xff]  ;;  %v2246_v35 = vld [vmem:[#allocation10 + $0x158] sm:$0xff] }
 0x3a3   :  { %3725 = vmatprep.subr.bf16.mxu1 %v3724_v53  ;;  %3757 = vmatprep.subr.bf16.mxu0 %v3756_v54  ;;  %v2209_v53 = vld [vmem:[#allocation10 + $0x30] sm:$0xff]  ;;  %v2212_v54 = vld [vmem:[#allocation10 + $0x48] sm:$0xff]  ;;  %v3778_v60 = vpack.c.bf16 %v2207_v49, %v2203_v48  ;;  %v2250_v43 = vld [vmem:[#allocation10 + $0x178] sm:$0xff]  ;;  %v3796_v48 = vpack.c.bf16 %v2248_v42, %v2244_v41 }
 0x3a4   :  { %v3906_v63 = vpack.c.bf16 %v2209_v53, %v2205_v52  ;;  %v3780_v2 = vpack.c.bf16 %v2216_v56, %v2212_v54  ;;  %v3924_v49 = vpack.c.bf16 %v2250_v43, %v2246_v35  ;;  %v2252_v52 = vld [vmem:[#allocation10 + $0x188] sm:$0xff]  ;;  %v2254_v54 = vld [vmem:[#allocation10 + $0x198] sm:$0xff]  ;;  %v2283_v43 = vld [vmem:[#allocation10 + $0x280] sm:$0xff] }
 0x3a5   :  { %v2256_v53 = vld [vmem:[#allocation10 + $0x1a8] sm:$0xff]  ;;  %v2258_v56 = vld [vmem:[#allocation10 + $0x1b8] sm:$0xff] }
 0x3a6   :  { %3727 = vmatpush1.bf16.msra.mxu1 %v3726_v1  ;;  %3759 = vmatpush1.bf16.msra.mxu0 %v3758_v27  ;;  %v2215_v1 = vld [vmem:[#allocation10 + $0x60] sm:$0xff]  ;;  %v2213_v27 = vld [vmem:[#allocation10 + $0x50] sm:$0xff]  ;;  %v2290_v41 = vld [vmem:[#allocation10 + $0x2b8] sm:$0xff] }
 0x3a7   :  { %3729 = vmatprep.subr.bf16.mxu1 %v3728_v4  ;;  %3761 = vmatprep.subr.bf16.mxu0 %v3760_v5  ;;  %v2217_v4 = vld [vmem:[#allocation10 + $0x70] sm:$0xff]  ;;  %v2220_v5 = vld [vmem:[#allocation10 + $0x88] sm:$0xff]  ;;  %v3782_v10 = vpack.c.bf16 %v2215_v1, %v2211_v0  ;;  %v3800_v0 = vpack.c.bf16 %v2256_v53, %v2252_v52  ;;  %v3928_v1 = vpack.c.bf16 %v2258_v56, %v2254_v54  ;;  %v2298_v52 = vld [vmem:[#allocation10 + $0x2f8] sm:$0xff] }
 0x3a8   :  { %v3910_v11 = vpack.c.bf16 %v2217_v4, %v2213_v27  ;;  %v3784_v14 = vpack.c.bf16 %v2224_v6, %v2220_v5  ;;  %v2253_v27 = vld [vmem:[#allocation10 + $0x190] sm:$0xff]  ;;  %v2264_v4 = vld [vmem:[#allocation10 + $0x1e8] sm:$0xff]  ;;  %v2262_v5 = vld [vmem:[#allocation10 + $0x1d8] sm:$0xff] }
 0x3a9   :  { %v2266_v6 = vld [vmem:[#allocation10 + $0x1f8] sm:$0xff]  ;;  %v2291_v56 = vld [vmem:[#allocation10 + $0x2c0] sm:$0xff] }
 0x3aa   :  { %3731 = vmatpush1.bf16.msra.mxu1 %v3730_v12  ;;  %3763 = vmatpush1.bf16.msra.mxu0 %v3762_v13  ;;  %v2219_v12 = vld [vmem:[#allocation10 + $0x80] sm:$0xff] }
 0x3ab   :  { %3733 = vmatprep.subr.bf16.mxu1 %v3732_v15  ;;  %3765 = vmatprep.subr.bf16.mxu0 %v3764_v16  ;;  %v2223_v13 = vld [vmem:[#allocation10 + $0xa0] sm:$0xff]  ;;  %v2221_v15 = vld [vmem:[#allocation10 + $0x90] sm:$0xff] }
 0x3ac   :  { %v2225_v16 = vld [vmem:[#allocation10 + $0xb0] sm:$0xff]  ;;  %v3786_v21 = vpack.c.bf16 %v2223_v13, %v2219_v12  ;;  %v3932_v12 = vpack.c.bf16 %v2266_v6, %v2262_v5  ;;  %v2299_v6 = vld [vmem:[#allocation10 + $0x300] sm:$0xff] }
 0x3ad   :  { %v3914_v22 = vpack.c.bf16 %v2225_v16, %v2221_v15  ;;  %v2261_v13 = vld [vmem:[#allocation10 + $0x1d0] sm:$0xff]  ;;  %v2272_v15 = vld [vmem:[#allocation10 + $0x228] sm:$0xff]  ;;  %v2270_v16 = vld [vmem:[#allocation10 + $0x218] sm:$0xff] }
 0x3ae   :  { %3735 = vmatpush1.bf16.msra.mxu1 %v3734_v23  ;;  %3767 = vmatpush1.bf16.msra.mxu0 %v3766_v24  ;;  %v2227_v23 = vld [vmem:[#allocation10 + $0xc0] sm:$0xff] }
 0x3af   :  { %3737 = vmatprep.subr.bf16.mxu1 %v3736_v26  ;;  %3769 = vmatprep.subr.bf16.mxu0 %v3768_v57  ;;  %v2231_v24 = vld [vmem:[#allocation10 + $0xe0] sm:$0xff]  ;;  %v2229_v26 = vld [vmem:[#allocation10 + $0xd0] sm:$0xff] }
 0x3b0   :  { %v2233_v57 = vld [vmem:[#allocation10 + $0xf0] sm:$0xff]  ;;  %v3790_v31 = vpack.c.bf16 %v2231_v24, %v2227_v23  ;;  %v3936_v23 = vpack.c.bf16 %v2274_v17, %v2270_v16  ;;  %v2307_v17 = vld [vmem:[#allocation10 + $0x340] sm:$0xff] }
 0x3b1   :  { %v3918_v32 = vpack.c.bf16 %v2233_v57, %v2229_v26  ;;  %v2269_v24 = vld [vmem:[#allocation10 + $0x210] sm:$0xff]  ;;  %v2280_v26 = vld [vmem:[#allocation10 + $0x268] sm:$0xff]  ;;  %v2278_v57 = vld [vmem:[#allocation10 + $0x258] sm:$0xff] }
 0x3b2   :  { %3739 = vmatpush1.bf16.msra.mxu1 %v3738_v33  ;;  %3771 = vmatpush1.bf16.msra.mxu0 %v3770_v36  ;;  %v2235_v33 = vld [vmem:[#allocation10 + $0x100] sm:$0xff] }
 0x3b3   :  { %3741 = vmatprep.subr.bf16.mxu1 %v3740_v39  ;;  %3773 = vmatprep.subr.bf16.mxu0 %v3772_v40  ;;  %v2239_v36 = vld [vmem:[#allocation10 + $0x120] sm:$0xff]  ;;  %v2237_v39 = vld [vmem:[#allocation10 + $0x110] sm:$0xff] }
 0x3b4   :  { %v2241_v40 = vld [vmem:[#allocation10 + $0x130] sm:$0xff]  ;;  %v3794_v44 = vpack.c.bf16 %v2239_v36, %v2235_v33  ;;  %v3940_v33 = vpack.c.bf16 %v2282_v28, %v2278_v57 }
 0x3b5   :  { %v3922_v45 = vpack.c.bf16 %v2241_v40, %v2237_v39  ;;  %v2277_v36 = vld [vmem:[#allocation10 + $0x250] sm:$0xff]  ;;  %v2288_v39 = vld [vmem:[#allocation10 + $0x2a8] sm:$0xff]  ;;  %v2286_v40 = vld [vmem:[#allocation10 + $0x298] sm:$0xff] }
 0x3b6   :  { %3743 = vmatpush1.bf16.msra.mxu1 %v3742_v46  ;;  %3775 = vmatpush1.bf16.msra.mxu0 %v3774_v47  ;;  %v2243_v46 = vld [vmem:[#allocation10 + $0x140] sm:$0xff] }
 0x3b7   :  { %3777 = vmatprep.subr.bf16.mxu1 %v3776_v51  ;;  %3905 = vmatprep.subr.bf16.mxu0 %v3904_v34  ;;  %v2247_v47 = vld [vmem:[#allocation10 + $0x160] sm:$0xff]  ;;  %v2245_v51 = vld [vmem:[#allocation10 + $0x150] sm:$0xff] }
 0x3b8   :  { %v2249_v34 = vld [vmem:[#allocation10 + $0x170] sm:$0xff]  ;;  %v3798_v58 = vpack.c.bf16 %v2247_v47, %v2243_v46  ;;  %v3944_v46 = vpack.c.bf16 %v2290_v41, %v2286_v40  ;;  %v2330_v41 = vld [vmem:[#allocation10 + $0x3f8] sm:$0xff] }
 0x3b9   :  { %2083 = vmatmul.mubr.f32.vlgmr.msra.gmra.mrb[16].mxu1 %v1743_v7  ;;  %2154 = vmatmul.mubr.f32.vlgmr.msra.gmra.mrb[12].mxu0 %v1743_v7  ;;  %v3926_v59 = vpack.c.bf16 %v2249_v34, %v2245_v51  ;;  %v2285_v47 = vld [vmem:[#allocation10 + $0x290] sm:$0xff]  ;;  %v2296_v51 = vld [vmem:[#allocation10 + $0x2e8] sm:$0xff]  ;;  %v2294_v34 = vld [vmem:[#allocation10 + $0x2d8] sm:$0xff] }
 0x3ba   :  { %3779 = vmatpush1.bf16.msra.mxu1 %v3778_v60  ;;  %3907 = vmatpush1.bf16.msra.mxu0 %v3906_v63  ;;  %v2251_v60 = vld [vmem:[#allocation10 + $0x180] sm:$0xff] }
 0x3bb   :  { %3781 = vmatprep.subr.bf16.mxu1 %v3780_v2  ;;  %3909 = vmatprep.subr.bf16.mxu0 %v3908_v3  ;;  %v2255_v63 = vld [vmem:[#allocation10 + $0x1a0] sm:$0xff]  ;;  %v2257_v2 = vld [vmem:[#allocation10 + $0x1b0] sm:$0xff]  ;;  %v2260_v3 = vld [vmem:[#allocation10 + $0x1c8] sm:$0xff] }
 0x3bc   :  { %v3802_v7 = vpack.c.bf16 %v2255_v63, %v2251_v60  ;;  %v3930_v8 = vpack.c.bf16 %v2257_v2, %v2253_v27  ;;  %v3948_v60 = vpack.c.bf16 %v2298_v52, %v2294_v34  ;;  %v2293_v63 = vld [vmem:[#allocation10 + $0x2d0] sm:$0xff]  ;;  %v2304_v27 = vld [vmem:[#allocation10 + $0x328] sm:$0xff]  ;;  %v2302_v2 = vld [vmem:[#allocation10 + $0x318] sm:$0xff] }
 0x3bd   :  { %v2338_v52 = vld [vmem:[#allocation10 + $0x438] sm:$0xff] }
 0x3be   :  { %3783 = vmatpush1.bf16.msra.mxu1 %v3782_v10  ;;  %3911 = vmatpush1.bf16.msra.mxu0 %v3910_v11  ;;  %v2263_v10 = vld [vmem:[#allocation10 + $0x1e0] sm:$0xff]  ;;  %v3804_v11 = vpack.c.bf16 %v2264_v4, %v2260_v3  ;;  %v2306_v3 = vld [vmem:[#allocation10 + $0x338] sm:$0xff] }
 0x3bf   :  { %3785 = vmatprep.subr.bf16.mxu1 %v3784_v14  ;;  %3913 = vmatprep.subr.bf16.mxu0 %v3912_v61  ;;  %v2265_v14 = vld [vmem:[#allocation10 + $0x1f0] sm:$0xff]  ;;  %v2268_v61 = vld [vmem:[#allocation10 + $0x208] sm:$0xff]  ;;  %v3806_v18 = vpack.c.bf16 %v2263_v10, %v2259_v9  ;;  %v3952_v9 = vpack.c.bf16 %v2306_v3, %v2302_v2 }
 0x3c0   :  { %v3934_v19 = vpack.c.bf16 %v2265_v14, %v2261_v13  ;;  %v2301_v10 = vld [vmem:[#allocation10 + $0x310] sm:$0xff]  ;;  %v2312_v13 = vld [vmem:[#allocation10 + $0x368] sm:$0xff]  ;;  %v2310_v14 = vld [vmem:[#allocation10 + $0x358] sm:$0xff] }
 0x3c2   :  { %3787 = vmatpush1.bf16.msra.mxu1 %v3786_v21  ;;  %3915 = vmatpush1.bf16.msra.mxu0 %v3914_v22  ;;  %v2271_v21 = vld [vmem:[#allocation10 + $0x220] sm:$0xff]  ;;  %v3808_v22 = vpack.c.bf16 %v2272_v15, %v2268_v61  ;;  %v2314_v61 = vld [vmem:[#allocation10 + $0x378] sm:$0xff] }
 0x3c3   :  { %3789 = vmatprep.subr.bf16.mxu1 %v3788_v55  ;;  %3917 = vmatprep.subr.bf16.mxu0 %v3916_v25  ;;  %v2273_v55 = vld [vmem:[#allocation10 + $0x230] sm:$0xff]  ;;  %v2276_v25 = vld [vmem:[#allocation10 + $0x248] sm:$0xff]  ;;  %v3810_v29 = vpack.c.bf16 %v2271_v21, %v2267_v20  ;;  %v3956_v20 = vpack.c.bf16 %v2314_v61, %v2310_v14 }
 0x3c4   :  { %v3938_v62 = vpack.c.bf16 %v2273_v55, %v2269_v24  ;;  %v2309_v21 = vld [vmem:[#allocation10 + $0x350] sm:$0xff]  ;;  %v2320_v24 = vld [vmem:[#allocation10 + $0x3a8] sm:$0xff]  ;;  %v2318_v55 = vld [vmem:[#allocation10 + $0x398] sm:$0xff] }
 0x3c5   :  { %v2340_v61 = vld [vmem:[#allocation10 + $0x448] sm:$0xff] }
 0x3c6   :  { %3791 = vmatpush1.bf16.msra.mxu1 %v3790_v31  ;;  %3919 = vmatpush1.bf16.msra.mxu0 %v3918_v32  ;;  %v2279_v31 = vld [vmem:[#allocation10 + $0x260] sm:$0xff]  ;;  %v3812_v32 = vpack.c.bf16 %v2280_v26, %v2276_v25  ;;  %v2322_v25 = vld [vmem:[#allocation10 + $0x3b8] sm:$0xff] }
 0x3c7   :  { %3793 = vmatprep.subr.bf16.mxu1 %v3792_v37  ;;  %3921 = vmatprep.subr.bf16.mxu0 %v3920_v38  ;;  %v2281_v37 = vld [vmem:[#allocation10 + $0x270] sm:$0xff]  ;;  %v2284_v38 = vld [vmem:[#allocation10 + $0x288] sm:$0xff]  ;;  %v3814_v42 = vpack.c.bf16 %v2279_v31, %v2275_v30  ;;  %v2319_v30 = vld [vmem:[#allocation10 + $0x3a0] sm:$0xff] }
 0x3c8   :  { %v3942_v35 = vpack.c.bf16 %v2281_v37, %v2277_v36  ;;  %v2317_v31 = vld [vmem:[#allocation10 + $0x390] sm:$0xff]  ;;  %v2324_v37 = vld [vmem:[#allocation10 + $0x3c8] sm:$0xff] }
 0x3ca   :  { %3795 = vmatpush1.bf16.msra.mxu1 %v3794_v44  ;;  %3923 = vmatpush1.bf16.msra.mxu0 %v3922_v45  ;;  %v2287_v44 = vld [vmem:[#allocation10 + $0x2a0] sm:$0xff]  ;;  %v3816_v45 = vpack.c.bf16 %v2288_v39, %v2284_v38  ;;  %v2328_v38 = vld [vmem:[#allocation10 + $0x3e8] sm:$0xff]  ;;  %v2326_v39 = vld [vmem:[#allocation10 + $0x3d8] sm:$0xff] }
 0x3cb   :  { %3797 = vmatprep.subr.bf16.mxu1 %v3796_v48  ;;  %3925 = vmatprep.subr.bf16.mxu0 %v3924_v49  ;;  %v2289_v48 = vld [vmem:[#allocation10 + $0x2b0] sm:$0xff]  ;;  %v2292_v49 = vld [vmem:[#allocation10 + $0x2c8] sm:$0xff]  ;;  %v3818_v53 = vpack.c.bf16 %v2287_v44, %v2283_v43  ;;  %v3836_v40 = vpack.c.bf16 %v2328_v38, %v2324_v37  ;;  %v3964_v43 = vpack.c.bf16 %v2330_v41, %v2326_v39  ;;  %v2347_v37 = vld [vmem:[#allocation10 + $0x480] sm:$0xff] }
 0x3cc   :  { %v3946_v54 = vpack.c.bf16 %v2289_v48, %v2285_v47  ;;  %v2332_v48 = vld [vmem:[#allocation10 + $0x408] sm:$0xff]  ;;  %v2351_v38 = vld [vmem:[#allocation10 + $0x4a0] sm:$0xff]  ;;  %v2349_v41 = vld [vmem:[#allocation10 + $0x490] sm:$0xff] }
 0x3ce   :  { %3799 = vmatpush1.bf16.msra.mxu1 %v3798_v58  ;;  %3927 = vmatpush1.bf16.msra.mxu0 %v3926_v59  ;;  %v2295_v58 = vld [vmem:[#allocation10 + $0x2e0] sm:$0xff]  ;;  %v3820_v59 = vpack.c.bf16 %v2296_v51, %v2292_v49  ;;  %v2336_v49 = vld [vmem:[#allocation10 + $0x428] sm:$0xff]  ;;  %v2334_v51 = vld [vmem:[#allocation10 + $0x418] sm:$0xff] }
 0x3cf   :  { %3801 = vmatprep.subr.bf16.mxu1 %v3800_v0  ;;  %3929 = vmatprep.subr.bf16.mxu0 %v3928_v1  ;;  %v2297_v0 = vld [vmem:[#allocation10 + $0x2f0] sm:$0xff]  ;;  %v2300_v1 = vld [vmem:[#allocation10 + $0x308] sm:$0xff]  ;;  %v3822_v4 = vpack.c.bf16 %v2295_v58, %v2291_v56  ;;  %v3840_v34 = vpack.c.bf16 %v2336_v49, %v2332_v48  ;;  %v2177_v56 = vsub.s32 2, %v4565_v50  ;;  %v2355_v48 = vld [vmem:[#allocation10 + $0x4c0] sm:$0xff] }
 0x3d0   :  { %v3950_v5 = vpack.c.bf16 %v2297_v0, %v2293_v63  ;;  %v3066_v58 = vld [vmem:[%s4717_s7 + $0x3] ss:$8 sm:$0xf] }
 0x3d1   :  { %v2178_v0 = vrot.slane %v3066_v58, %v2177_v56  ;;  %v2359_v49 = vld [vmem:[#allocation10 + $0x4e0] sm:$0xff] }
 0x3d2   :  { %3803 = vmatpush1.bf16.msra.mxu1 %v3802_v7  ;;  %3931 = vmatpush1.bf16.msra.mxu0 %v3930_v8  ;;  %v2303_v7 = vld [vmem:[#allocation10 + $0x320] sm:$0xff]  ;;  %v3824_v8 = vpack.c.bf16 %v2304_v27, %v2300_v1 }
 0x3d3   :  { %3805 = vmatprep.subr.bf16.mxu1 %v3804_v11  ;;  %3933 = vmatprep.subr.bf16.mxu0 %v3932_v12  ;;  %v2305_v11 = vld [vmem:[#allocation10 + $0x330] sm:$0xff]  ;;  %v2308_v12 = vld [vmem:[#allocation10 + $0x348] sm:$0xff]  ;;  %v3826_v15 = vpack.c.bf16 %v2303_v7, %v2299_v6 }
 0x3d4   :  { %v3954_v16 = vpack.c.bf16 %v2305_v11, %v2301_v10  ;;  %v2335_v11 = vld [vmem:[#allocation10 + $0x420] sm:$0xff] }
 0x3d6   :  { %3807 = vmatpush1.bf16.msra.mxu1 %v3806_v18  ;;  %3935 = vmatpush1.bf16.msra.mxu0 %v3934_v19  ;;  %v2311_v18 = vld [vmem:[#allocation10 + $0x360] sm:$0xff]  ;;  %v3828_v19 = vpack.c.bf16 %v2312_v13, %v2308_v12  ;;  %v2333_v12 = vld [vmem:[#allocation10 + $0x410] sm:$0xff] }
 0x3d7   :  { %3809 = vmatprep.subr.bf16.mxu1 %v3808_v22  ;;  %3937 = vmatprep.subr.bf16.mxu0 %v3936_v23  ;;  %v2313_v22 = vld [vmem:[#allocation10 + $0x370] sm:$0xff]  ;;  %v2316_v23 = vld [vmem:[#allocation10 + $0x388] sm:$0xff]  ;;  %v3830_v26 = vpack.c.bf16 %v2311_v18, %v2307_v17  ;;  %v2342_v17 = vld [vmem:[#allocation10 + $0x458] sm:$0xff] }
 0x3d8   :  { %v3958_v57 = vpack.c.bf16 %v2313_v22, %v2309_v21  ;;  %v3832_v28 = vpack.c.bf16 %v2320_v24, %v2316_v23  ;;  %v2337_v13 = vld [vmem:[#allocation10 + $0x430] sm:$0xff]  ;;  %v2346_v18 = vld [vmem:[#allocation10 + $0x478] sm:$0xff]  ;;  %v2339_v22 = vld [vmem:[#allocation10 + $0x440] sm:$0xff] }
 0x3d9   :  { %v3970_v21 = vpack.c.bf16 %v2337_v13, %v2333_v12  ;;  %v2343_v23 = vld [vmem:[#allocation10 + $0x460] sm:$0xff]  ;;  %v2374_v12 = vld [vmem:[#allocation10 + $0x558] sm:$0xff] }
 0x3da   :  { %3811 = vmatpush1.bf16.msra.mxu1 %v3810_v29  ;;  %3939 = vmatpush1.bf16.msra.mxu0 %v3938_v62  ;;  %v3960_v29 = vpack.c.bf16 %v2322_v25, %v2318_v55  ;;  %v2315_v62 = vld [vmem:[#allocation10 + $0x380] sm:$0xff]  ;;  %v2341_v55 = vld [vmem:[#allocation10 + $0x450] sm:$0xff]  ;;  %v2378_v13 = vld [vmem:[#allocation10 + $0x578] sm:$0xff] }
 0x3db   :  { %3813 = vmatprep.subr.bf16.mxu1 %v3812_v32  ;;  %3941 = vmatprep.subr.bf16.mxu0 %v3940_v33  ;;  %v3834_v32 = vpack.c.bf16 %v2319_v30, %v2315_v62  ;;  %v2321_v33 = vld [vmem:[#allocation10 + $0x3b0] sm:$0xff]  ;;  %v2352_v62 = vld [vmem:[#allocation10 + $0x4a8] sm:$0xff]  ;;  %v2350_v30 = vld [vmem:[#allocation10 + $0x498] sm:$0xff] }
 0x3dc   :  { %v3962_v36 = vpack.c.bf16 %v2321_v33, %v2317_v31  ;;  %v2345_v25 = vld [vmem:[#allocation10 + $0x470] sm:$0xff]  ;;  %v2354_v31 = vld [vmem:[#allocation10 + $0x4b8] sm:$0xff]  ;;  %v3846_v33 = vpack.c.bf16 %v2343_v23, %v2339_v22  ;;  %v2384_v22 = vld [vmem:[#allocation10 + $0x5a8] sm:$0xff] }
 0x3dd   :  { %v2382_v23 = vld [vmem:[#allocation10 + $0x598] sm:$0xff] }
 0x3de   :  { %3815 = vmatpush1.bf16.msra.mxu1 %v3814_v42  ;;  %3943 = vmatpush1.bf16.msra.mxu0 %v3942_v35  ;;  %v2323_v42 = vld [vmem:[#allocation10 + $0x3c0] sm:$0xff] }
 0x3df   :  { %3817 = vmatprep.subr.bf16.mxu1 %v3816_v45  ;;  %3945 = vmatprep.subr.bf16.mxu0 %v3944_v46  ;;  %v2327_v35 = vld [vmem:[#allocation10 + $0x3e0] sm:$0xff]  ;;  %v2325_v45 = vld [vmem:[#allocation10 + $0x3d0] sm:$0xff] }
 0x3e0   :  { %v3838_v44 = vpack.c.bf16 %v2327_v35, %v2323_v42  ;;  %v2329_v46 = vld [vmem:[#allocation10 + $0x3f0] sm:$0xff]  ;;  %v2356_v35 = vld [vmem:[#allocation10 + $0x4c8] sm:$0xff] }
 0x3e1   :  { %v3966_v47 = vpack.c.bf16 %v2329_v46, %v2325_v45  ;;  %v2353_v42 = vld [vmem:[#allocation10 + $0x4b0] sm:$0xff]  ;;  %v2362_v45 = vld [vmem:[#allocation10 + $0x4f8] sm:$0xff]  ;;  %v3850_v46 = vpack.c.bf16 %v2351_v38, %v2347_v37 }
 0x3e2   :  { %3819 = vmatpush1.bf16.msra.mxu1 %v3818_v53  ;;  %3947 = vmatpush1.bf16.msra.mxu0 %v3946_v54  ;;  %v3968_v53 = vpack.c.bf16 %v2338_v52, %v2334_v51  ;;  %v2169_v54 = vsub.s32 0, %v4565_v50  ;;  %v2357_v52 = vld [vmem:[#allocation10 + $0x4d0] sm:$0xff] }
 0x3e3   :  { %3821 = vmatprep.subr.bf16.mxu1 %v3820_v59  ;;  %3949 = vmatprep.subr.bf16.mxu0 %v3948_v60  ;;  %v2173_v59 = vsub.s32 1, %v4565_v50  ;;  %v2181_v60 = vsub.s32 3, %v4565_v50 }
 0x3e4   :  { %v2170_v63 = vrot.slane %v3066_v58, %v2169_v54 }
 0x3e5   :  { %v2174_v1 = vrot.slane %v3066_v58, %v2173_v59  ;;  %v2182_v27 = vrot.slane %v3066_v58, %v2181_v60  ;;  %v2364_v58 = vld [vmem:[#allocation10 + $0x508] sm:$0xff] }
 0x3e6   :  { %3823 = vmatpush1.bf16.msra.mxu1 %v3822_v4  ;;  %3951 = vmatpush1.bf16.msra.mxu0 %v3950_v5 }
 0x3e7   :  { %3825 = vmatprep.subr.bf16.mxu1 %v3824_v8  ;;  %3953 = vmatprep.subr.bf16.mxu0 %v3952_v9  ;;  %v2331_v8 = vld [vmem:[#allocation10 + $0x400] sm:$0xff] }
 0x3ea   :  { %3827 = vmatpush1.bf16.msra.mxu1 %v3826_v15  ;;  %3955 = vmatpush1.bf16.msra.mxu0 %v3954_v16  ;;  %v2344_v15 = vld [vmem:[#allocation10 + $0x468] sm:$0xff] }
 0x3eb   :  { %3829 = vmatprep.subr.bf16.mxu1 %v3828_v19  ;;  %3957 = vmatprep.subr.bf16.mxu0 %v3956_v20  ;;  %v3842_v20 = vpack.c.bf16 %v2335_v11, %v2331_v8  ;;  %v2365_v8 = vld [vmem:[#allocation10 + $0x510] sm:$0xff]  ;;  %v2376_v11 = vld [vmem:[#allocation10 + $0x568] sm:$0xff] }
 0x3ee   :  { %3831 = vmatpush1.bf16.msra.mxu1 %v3830_v26  ;;  %3959 = vmatpush1.bf16.msra.mxu0 %v3958_v57  ;;  %v2348_v26 = vld [vmem:[#allocation10 + $0x488] sm:$0xff] }
 0x3ef   :  { %3833 = vmatprep.subr.bf16.mxu1 %v3832_v28  ;;  %3961 = vmatprep.subr.bf16.mxu0 %v3960_v29  ;;  %v3844_v28 = vpack.c.bf16 %v2344_v15, %v2340_v61  ;;  %v3972_v29 = vpack.c.bf16 %v2346_v18, %v2342_v17  ;;  %v3848_v39 = vpack.c.bf16 %v2352_v62, %v2348_v26  ;;  %v2371_v15 = vld [vmem:[#allocation10 + $0x540] sm:$0xff]  ;;  %v2381_v62 = vld [vmem:[#allocation10 + $0x590] sm:$0xff] }
 0x3f0   :  { %v3988_v18 = vpack.c.bf16 %v2378_v13, %v2374_v12  ;;  %v2379_v26 = vld [vmem:[#allocation10 + $0x580] sm:$0xff]  ;;  %v2412_v12 = vld [vmem:[#allocation10 + $0x688] sm:$0xff] }
 0x3f1   :  { %v2416_v13 = vld [vmem:[#allocation10 + $0x6a8] sm:$0xff] }
 0x3f2   :  { %3835 = vmatpush1.bf16.msra.mxu1 %v3834_v32  ;;  %3963 = vmatpush1.bf16.msra.mxu0 %v3962_v36  ;;  %v3974_v36 = vpack.c.bf16 %v2345_v25, %v2341_v55 }
 0x3f3   :  { %3837 = vmatprep.subr.bf16.mxu1 %v3836_v40  ;;  %3965 = vmatprep.subr.bf16.mxu0 %v3964_v43  ;;  %v3976_v40 = vpack.c.bf16 %v2354_v31, %v2350_v30  ;;  %v2360_v43 = vld [vmem:[#allocation10 + $0x4e8] sm:$0xff]  ;;  %v2385_v30 = vld [vmem:[#allocation10 + $0x5b0] sm:$0xff] }
 0x3f4   :  { %v3852_v51 = vpack.c.bf16 %v2360_v43, %v2356_v35  ;;  %v2388_v31 = vld [vmem:[#allocation10 + $0x5c8] sm:$0xff]  ;;  %v3994_v38 = vpack.c.bf16 %v2385_v30, %v2381_v62  ;;  %v2389_v35 = vld [vmem:[#allocation10 + $0x5d0] sm:$0xff] }
 0x3f5   :  { %v2393_v43 = vld [vmem:[#allocation10 + $0x5f0] sm:$0xff] }
 0x3f6   :  { %3839 = vmatpush1.bf16.msra.mxu1 %v3838_v44  ;;  %3967 = vmatpush1.bf16.msra.mxu0 %v3966_v47  ;;  %v2358_v44 = vld [vmem:[#allocation10 + $0x4d8] sm:$0xff]  ;;  %v3978_v47 = vpack.c.bf16 %v2353_v42, %v2349_v41 }
 0x3f7   :  { %3841 = vmatprep.subr.bf16.mxu1 %v3840_v34  ;;  %3969 = vmatprep.subr.bf16.mxu0 %v3968_v53  ;;  %v3980_v34 = vpack.c.bf16 %v2362_v45, %v2358_v44  ;;  %v2361_v53 = vld [vmem:[#allocation10 + $0x4f0] sm:$0xff]  ;;  %v2396_v44 = vld [vmem:[#allocation10 + $0x608] sm:$0xff] }
 0x3f8   :  { %v2400_v45 = vld [vmem:[#allocation10 + $0x628] sm:$0xff] }
 0x48c   :  { %v2084_v2 = vpop.f32.mrb[16].mxu1  ;;  %v2155_v3 = vpop.f32.mrb[12].mxu0 }
 0x48d   :  { %v2187_v4 = vadd.f32 %v2170_v63, %v2084_v2  ;;  %v4686_v5 = vadd.f32 %v2178_v0, %v2155_v3  ;;  %v2086_v6 = vpop.f32.mrb[17].mxu1  ;;  %v2157_v7 = vpop.f32.mrb[13].mxu0  ;;  %v2368_v63 = vld [vmem:[#allocation10 + $0x528] sm:$0xff]  ;;  %v2366_v0 = vld [vmem:[#allocation10 + $0x518] sm:$0xff]  ;;  %v3982_v2 = vpack.c.bf16 %v2361_v53, %v2357_v52  ;;  %v2363_v3 = vld [vmem:[#allocation10 + $0x500] sm:$0xff]  ;;  %v3872_v52 = vpack.c.bf16 %v2400_v45, %v2396_v44 }
 0x48e   :  { %v2188_v9 = vadd.f32 %v2174_v1, %v2086_v6  ;;  %v2190_v10 = vadd.f32 %v2182_v27, %v2157_v7  ;;  %v2370_v1 = vld [vmem:[#allocation10 + $0x538] sm:$0xff]  ;;  %v3854_v27 = vpack.c.bf16 %v2359_v49, %v2355_v48  ;;  %v3856_v6 = vpack.c.bf16 %v2368_v63, %v2364_v58  ;;  %v2397_v58 = vld [vmem:[#allocation10 + $0x610] sm:$0xff] }
 0x48f   :  { %v2195_v14 = vmul.f32 0.01, %v2187_v4  ;;  %vm2191_vm14 = vcmp.ge.f32.partialorder %v2187_v4, 0.0  ;;  %v3984_v7 = vpack.c.bf16 %v2370_v1, %v2366_v0  ;;  %v3998_v49 = vpack.c.bf16 %v2393_v43, %v2389_v35  ;;  %v2401_v63 = vld [vmem:[#allocation10 + $0x630] sm:$0xff]  ;;  %v2404_v0 = vld [vmem:[#allocation10 + $0x648] sm:$0xff] }
 0x490   :  { %v2196_v16 = vmul.f32 0.01, %v2188_v9  ;;  %vm2192_vm15 = vcmp.ge.f32.partialorder %v2188_v9, 0.0  ;;  %v2198_v19 = vmul.f32 0.01, %v2190_v10  ;;  %vm2194_vm0 = vcmp.ge.f32.partialorder %v2190_v10, 0.0 }
 0x491   :  { %v2199_v57 = vsel %vm2191_vm14, %v2187_v4, %v2195_v14  ;;  %v2367_v4 = vld [vmem:[#allocation10 + $0x520] sm:$0xff]  ;;  %v2408_v1 = vld [vmem:[#allocation10 + $0x668] sm:$0xff]  ;;  %v2429_v44 = vld [vmem:[#allocation10 + $0x710] sm:$0xff]  ;;  %vm2193_vm1 = vcmp.ge.f32.partialorder %v4686_v5, 0.0 }
 0x492   :  { %v2200_v24 = vsel %vm2192_vm15, %v2188_v9, %v2196_v16  ;;  %v2202_v32 = vsel %vm2194_vm0, %v2190_v10, %v2198_v19  ;;  %v2369_v9 = vld [vmem:[#allocation10 + $0x530] sm:$0xff]  ;;  %v2372_v10 = vld [vmem:[#allocation10 + $0x548] sm:$0xff]  ;;  %v3858_v14 = vpack.c.bf16 %v2367_v4, %v2363_v3  ;;  %v2375_v16 = vld [vmem:[#allocation10 + $0x560] sm:$0xff]  ;;  %v4002_v4 = vpack.c.bf16 %v2401_v63, %v2397_v58 }
 0x493   :  { %2546 = vmatprep.mubr.f32.mxu1 %v2200_v24  ;;  %2688 = vmatprep.mubr.f32.mxu0 %v2200_v24  ;;  %v3986_v61 = vpack.c.bf16 %v2369_v9, %v2365_v8  ;;  %v3860_v17 = vpack.c.bf16 %v2376_v11, %v2372_v10  ;;  %v2373_v19 = vld [vmem:[#allocation10 + $0x550] sm:$0xff]  ;;  %v2386_v24 = vld [vmem:[#allocation10 + $0x5b8] sm:$0xff]  ;;  %v3862_v55 = vpack.c.bf16 %v2375_v16, %v2371_v15 }
 0x494   :  { %2547 = vmatmul.mubr.f32.vlgmr.msra.gmra.mrb[18].mxu1 %v2199_v57  ;;  %2689 = vmatmul.mubr.f32.vlgmr.msra.gmra.mrb[14].mxu0 %v2199_v57  ;;  %v2383_v57 = vld [vmem:[#allocation10 + $0x5a0] sm:$0xff]  ;;  %v3876_v8 = vpack.c.bf16 %v2408_v1, %v2404_v0  ;;  %v2405_v10 = vld [vmem:[#allocation10 + $0x650] sm:$0xff] }
 0x495   :  { %3843 = vmatpush1.bf16.msra.mxu1 %v3842_v20  ;;  %3971 = vmatpush1.bf16.msra.mxu0 %v3970_v21  ;;  %v2377_v20 = vld [vmem:[#allocation10 + $0x570] sm:$0xff]  ;;  %v2380_v21 = vld [vmem:[#allocation10 + $0x588] sm:$0xff]  ;;  %v3866_v37 = vpack.c.bf16 %v2383_v57, %v2379_v26 }
 0x496   :  { %2617 = vmatprep.mubr.f32.mxu1 %v2202_v32  ;;  %2759 = vmatprep.mubr.f32.mxu0 %v2202_v32  ;;  %v3990_v25 = vpack.c.bf16 %v2377_v20, %v2373_v19  ;;  %v2392_v32 = vld [vmem:[#allocation10 + $0x5e8] sm:$0xff]  ;;  %v2409_v11 = vld [vmem:[#allocation10 + $0x670] sm:$0xff]  ;;  %v3880_v19 = vpack.c.bf16 %v2416_v13, %v2412_v12 }
 0x497   :  { %3845 = vmatprep.subr.bf16.mxu1 %v3844_v28  ;;  %3973 = vmatprep.subr.bf16.mxu0 %v3972_v29  ;;  %v3864_v28 = vpack.c.bf16 %v2384_v22, %v2380_v21  ;;  %v3992_v29 = vpack.c.bf16 %v2386_v24, %v2382_v23  ;;  %v3868_v41 = vpack.c.bf16 %v2392_v32, %v2388_v31  ;;  %v2413_v21 = vld [vmem:[#allocation10 + $0x690] sm:$0xff]  ;;  %v2420_v23 = vld [vmem:[#allocation10 + $0x6c8] sm:$0xff] }
 0x498   :  { %v4006_v16 = vpack.c.bf16 %v2409_v11, %v2405_v10  ;;  %v2417_v22 = vld [vmem:[#allocation10 + $0x6b0] sm:$0xff]  ;;  %v2424_v24 = vld [vmem:[#allocation10 + $0x6e8] sm:$0xff] }
 0x499   :  { %3847 = vmatpush1.bf16.msra.mxu1 %v3846_v33  ;;  %3975 = vmatpush1.bf16.msra.mxu0 %v3974_v36  ;;  %v2390_v33 = vld [vmem:[#allocation10 + $0x5d8] sm:$0xff]  ;;  %v4010_v57 = vpack.c.bf16 %v2417_v22, %v2413_v21  ;;  %v3884_v62 = vpack.c.bf16 %v2424_v24, %v2420_v23  ;;  %v2421_v31 = vld [vmem:[#allocation10 + $0x6d0] sm:$0xff] }
 0x49a   :  { %3849 = vmatprep.subr.bf16.mxu1 %v3848_v39  ;;  %3977 = vmatprep.subr.bf16.mxu0 %v3976_v40  ;;  %v2394_v36 = vld [vmem:[#allocation10 + $0x5f8] sm:$0xff]  ;;  %v2387_v39 = vld [vmem:[#allocation10 + $0x5c0] sm:$0xff]  ;;  %v2425_v32 = vld [vmem:[#allocation10 + $0x6f0] sm:$0xff] }
 0x49b   :  { %v2391_v40 = vld [vmem:[#allocation10 + $0x5e0] sm:$0xff]  ;;  %v3996_v42 = vpack.c.bf16 %v2394_v36, %v2390_v33  ;;  %v2428_v33 = vld [vmem:[#allocation10 + $0x708] sm:$0xff]  ;;  %v2433_v45 = vld [vmem:[#allocation10 + $0x730] sm:$0xff] }
 0x49c   :  { %v3870_v48 = vpack.c.bf16 %v2391_v40, %v2387_v39  ;;  %v2432_v36 = vld [vmem:[#allocation10 + $0x728] sm:$0xff]  ;;  %v4014_v40 = vpack.c.bf16 %v2425_v32, %v2421_v31  ;;  %v2437_v0 = vld [vmem:[#allocation10 + $0x750] sm:$0xff] }
 0x49d   :  { %3851 = vmatpush1.bf16.msra.mxu1 %v3850_v46  ;;  %3979 = vmatpush1.bf16.msra.mxu0 %v3978_v47  ;;  %v2398_v46 = vld [vmem:[#allocation10 + $0x618] sm:$0xff]  ;;  %v3888_v35 = vpack.c.bf16 %v2432_v36, %v2428_v33  ;;  %v2441_v1 = vld [vmem:[#allocation10 + $0x770] sm:$0xff]  ;;  %v2810_v33 = vld [vmem:[#allocation12 + $0x100] sm:$0xff] }
 0x49e   :  { %3853 = vmatprep.subr.bf16.mxu1 %v3852_v51  ;;  %3981 = vmatprep.subr.bf16.mxu0 %v3980_v34  ;;  %v2402_v47 = vld [vmem:[#allocation10 + $0x638] sm:$0xff]  ;;  %v2395_v51 = vld [vmem:[#allocation10 + $0x600] sm:$0xff]  ;;  %v2445_v12 = vld [vmem:[#allocation10 + $0x790] sm:$0xff] }
 0x49f   :  { %v2399_v34 = vld [vmem:[#allocation10 + $0x620] sm:$0xff]  ;;  %v4000_v53 = vpack.c.bf16 %v2402_v47, %v2398_v46  ;;  %v2436_v46 = vld [vmem:[#allocation10 + $0x748] sm:$0xff]  ;;  %v2449_v13 = vld [vmem:[#allocation10 + $0x7b0] sm:$0xff] }
 0x4a0   :  { %v3874_v3 = vpack.c.bf16 %v2399_v34, %v2395_v51  ;;  %v2440_v47 = vld [vmem:[#allocation10 + $0x768] sm:$0xff]  ;;  %v4018_v34 = vpack.c.bf16 %v2433_v45, %v2429_v44  ;;  %v2453_v23 = vld [vmem:[#allocation10 + $0x7d0] sm:$0xff]  ;;  %v2781_v44 = vld [vmem:[#allocation12 + $0x18] sm:$0xff] }
 0x4a1   :  { %3855 = vmatpush1.bf16.msra.mxu1 %v3854_v27  ;;  %3983 = vmatpush1.bf16.msra.mxu0 %v3982_v2  ;;  %v2406_v27 = vld [vmem:[#allocation10 + $0x658] sm:$0xff]  ;;  %v3892_v58 = vpack.c.bf16 %v2440_v47, %v2436_v46  ;;  %v2457_v24 = vld [vmem:[#allocation10 + $0x7f0] sm:$0xff]  ;;  %v2811_v36 = vld [vmem:[#allocation12 + $0x108] sm:$0xff] }
 0x4a2   :  { %3857 = vmatprep.subr.bf16.mxu1 %v3856_v6  ;;  %3985 = vmatprep.subr.bf16.mxu0 %v3984_v7  ;;  %v2410_v2 = vld [vmem:[#allocation10 + $0x678] sm:$0xff]  ;;  %v2403_v6 = vld [vmem:[#allocation10 + $0x640] sm:$0xff]  ;;  %v2812_v47 = vld [vmem:[#allocation12 + $0x110] sm:$0xff] }
 0x4a3   :  { %v2407_v7 = vld [vmem:[#allocation10 + $0x660] sm:$0xff]  ;;  %v4004_v9 = vpack.c.bf16 %v2410_v2, %v2406_v27  ;;  %v2444_v27 = vld [vmem:[#allocation10 + $0x788] sm:$0xff] }
 0x4a4   :  { %v3878_v15 = vpack.c.bf16 %v2407_v7, %v2403_v6  ;;  %v2448_v2 = vld [vmem:[#allocation10 + $0x7a8] sm:$0xff]  ;;  %v4022_v7 = vpack.c.bf16 %v2441_v1, %v2437_v0  ;;  %v2782_v0 = vld [vmem:[#allocation12 + $0x20] sm:$0xff] }
 0x4a5   :  { %3859 = vmatpush1.bf16.msra.mxu1 %v3858_v14  ;;  %3987 = vmatpush1.bf16.msra.mxu0 %v3986_v61  ;;  %v2414_v14 = vld [vmem:[#allocation10 + $0x698] sm:$0xff]  ;;  %v3896_v10 = vpack.c.bf16 %v2448_v2, %v2444_v27  ;;  %v2783_v1 = vld [vmem:[#allocation12 + $0x28] sm:$0xff] }
 0x4a6   :  { %3861 = vmatprep.subr.bf16.mxu1 %v3860_v17  ;;  %3989 = vmatprep.subr.bf16.mxu0 %v3988_v18  ;;  %v2418_v61 = vld [vmem:[#allocation10 + $0x6b8] sm:$0xff]  ;;  %v2411_v17 = vld [vmem:[#allocation10 + $0x680] sm:$0xff] }
 0x4a7   :  { %v2415_v18 = vld [vmem:[#allocation10 + $0x6a0] sm:$0xff]  ;;  %v4008_v20 = vpack.c.bf16 %v2418_v61, %v2414_v14  ;;  %v2452_v14 = vld [vmem:[#allocation10 + $0x7c8] sm:$0xff] }
 0x4a8   :  { %v3882_v26 = vpack.c.bf16 %v2415_v18, %v2411_v17  ;;  %v2456_v61 = vld [vmem:[#allocation10 + $0x7e8] sm:$0xff]  ;;  %v4026_v18 = vpack.c.bf16 %v2449_v13, %v2445_v12  ;;  %v2785_v12 = vld [vmem:[#allocation12 + $0x38] sm:$0xff] }
 0x4a9   :  { %3863 = vmatpush1.bf16.msra.mxu1 %v3862_v55  ;;  %3991 = vmatpush1.bf16.msra.mxu0 %v3990_v25  ;;  %v2422_v55 = vld [vmem:[#allocation10 + $0x6d8] sm:$0xff]  ;;  %v3900_v21 = vpack.c.bf16 %v2456_v61, %v2452_v14  ;;  %v2816_v61 = vld [vmem:[#allocation12 + $0x130] sm:$0xff] }
 0x4aa   :  { %3865 = vmatprep.subr.bf16.mxu1 %v3864_v28  ;;  %3993 = vmatprep.subr.bf16.mxu0 %v3992_v29  ;;  %v2426_v25 = vld [vmem:[#allocation10 + $0x6f8] sm:$0xff]  ;;  %v2419_v28 = vld [vmem:[#allocation10 + $0x6c0] sm:$0xff] }
 0x4ab   :  { %v2423_v29 = vld [vmem:[#allocation10 + $0x6e0] sm:$0xff]  ;;  %v4012_v30 = vpack.c.bf16 %v2426_v25, %v2422_v55  ;;  %v2795_v25 = vld [vmem:[#allocation12 + $0x88] sm:$0xff] }
 0x4ac   :  { %v3886_v39 = vpack.c.bf16 %v2423_v29, %v2419_v28  ;;  %v2794_v55 = vld [vmem:[#allocation12 + $0x80] sm:$0xff]  ;;  %v4030_v29 = vpack.c.bf16 %v2457_v24, %v2453_v23  ;;  %v2787_v23 = vld [vmem:[#allocation12 + $0x48] sm:$0xff] }
 0x4ad   :  { %3867 = vmatpush1.bf16.msra.mxu1 %v3866_v37  ;;  %3995 = vmatpush1.bf16.msra.mxu0 %v3994_v38  ;;  %v2430_v37 = vld [vmem:[#allocation10 + $0x718] sm:$0xff]  ;;  %v4032_v31 = vpack.c.bf16 %v2795_v25, %v2794_v55  ;;  %v2818_v25 = vld [vmem:[#allocation12 + $0x140] sm:$0xff] }
 0x4ae   :  { %3869 = vmatprep.subr.bf16.mxu1 %v3868_v41  ;;  %3997 = vmatprep.subr.bf16.mxu0 %v3996_v42  ;;  %v2434_v38 = vld [vmem:[#allocation10 + $0x738] sm:$0xff]  ;;  %v2427_v41 = vld [vmem:[#allocation10 + $0x700] sm:$0xff] }
 0x4af   :  { %v2431_v42 = vld [vmem:[#allocation10 + $0x720] sm:$0xff]  ;;  %v4016_v43 = vpack.c.bf16 %v2434_v38, %v2430_v37  ;;  %v2796_v37 = vld [vmem:[#allocation12 + $0x90] sm:$0xff]  ;;  %v2197_v38 = vmul.f32 0.01, %v4686_v5 }
 0x4b0   :  { %v3890_v51 = vpack.c.bf16 %v2431_v42, %v2427_v41  ;;  %v2829_v41 = vld [vmem:[#allocation12 + $0x198] sm:$0xff] }
 0x4b1   :  { %3871 = vmatpush1.bf16.msra.mxu1 %v3870_v48  ;;  %3999 = vmatpush1.bf16.msra.mxu0 %v3998_v49  ;;  %v2438_v48 = vld [vmem:[#allocation10 + $0x758] sm:$0xff] }
 0x4b2   :  { %3873 = vmatprep.subr.bf16.mxu1 %v3872_v52  ;;  %4001 = vmatprep.subr.bf16.mxu0 %v4000_v53  ;;  %v2442_v49 = vld [vmem:[#allocation10 + $0x778] sm:$0xff]  ;;  %v2435_v52 = vld [vmem:[#allocation10 + $0x740] sm:$0xff] }
 0x4b3   :  { %v2439_v53 = vld [vmem:[#allocation10 + $0x760] sm:$0xff]  ;;  %v4020_v63 = vpack.c.bf16 %v2442_v49, %v2438_v48  ;;  %v2813_v48 = vld [vmem:[#allocation12 + $0x118] sm:$0xff] }
 0x4b4   :  { %v3894_v6 = vpack.c.bf16 %v2439_v53, %v2435_v52  ;;  %v2798_v49 = vld [vmem:[#allocation12 + $0xa0] sm:$0xff]  ;;  %v2831_v53 = vld [vmem:[#allocation12 + $0x1a8] sm:$0xff] }
 0x4b5   :  { %3875 = vmatpush1.bf16.msra.mxu1 %v3874_v3  ;;  %4003 = vmatpush1.bf16.msra.mxu0 %v4002_v4  ;;  %v2446_v3 = vld [vmem:[#allocation10 + $0x798] sm:$0xff]  ;;  %v2830_v52 = vld [vmem:[#allocation12 + $0x1a0] sm:$0xff] }
 0x4b6   :  { %3877 = vmatprep.subr.bf16.mxu1 %v3876_v8  ;;  %4005 = vmatprep.subr.bf16.mxu0 %v4004_v9  ;;  %v2450_v4 = vld [vmem:[#allocation10 + $0x7b8] sm:$0xff]  ;;  %v2443_v8 = vld [vmem:[#allocation10 + $0x780] sm:$0xff]  ;;  %v4072_v2 = vpack.c.bf16 %v2831_v53, %v2830_v52  ;;  %v2808_v53 = vld [vmem:[#allocation12 + $0xf0] sm:$0xff] }
 0x4b7   :  { %v2447_v9 = vld [vmem:[#allocation10 + $0x7a0] sm:$0xff]  ;;  %v4024_v11 = vpack.c.bf16 %v2450_v4, %v2446_v3  ;;  %v2815_v4 = vld [vmem:[#allocation12 + $0x128] sm:$0xff] }
 0x4b8   :  { %v3898_v17 = vpack.c.bf16 %v2447_v9, %v2443_v8  ;;  %v2814_v3 = vld [vmem:[#allocation12 + $0x120] sm:$0xff]  ;;  %v2833_v8 = vld [vmem:[#allocation12 + $0x1b8] sm:$0xff]  ;;  %v4042_v9 = vpack.c.bf16 %v2783_v1, %v2782_v0 }
 0x4b9   :  { %3879 = vmatpush1.bf16.msra.mxu1 %v3878_v15  ;;  %4007 = vmatpush1.bf16.msra.mxu0 %v4006_v16  ;;  %v2454_v15 = vld [vmem:[#allocation10 + $0x7d8] sm:$0xff] }
 0x4ba   :  { %3881 = vmatprep.subr.bf16.mxu1 %v3880_v19  ;;  %4009 = vmatprep.subr.bf16.mxu0 %v4008_v20  ;;  %v2458_v16 = vld [vmem:[#allocation10 + $0x7f8] sm:$0xff]  ;;  %v2451_v19 = vld [vmem:[#allocation10 + $0x7c0] sm:$0xff] }
 0x4bb   :  { %v2455_v20 = vld [vmem:[#allocation10 + $0x7e0] sm:$0xff]  ;;  %v4028_v22 = vpack.c.bf16 %v2458_v16, %v2454_v15  ;;  %v2817_v15 = vld [vmem:[#allocation12 + $0x138] sm:$0xff] }
 0x4bc   :  { %v3902_v28 = vpack.c.bf16 %v2455_v20, %v2451_v19  ;;  %v2802_v16 = vld [vmem:[#allocation12 + $0xc0] sm:$0xff]  ;;  %v2835_v19 = vld [vmem:[#allocation12 + $0x1c8] sm:$0xff]  ;;  %v2841_v1 = vld [vmem:[#allocation12 + $0x1f8] sm:$0xff] }
 0x4bd   :  { %3883 = vmatpush1.bf16.msra.mxu1 %v3882_v26  ;;  %4011 = vmatpush1.bf16.msra.mxu0 %v4010_v57  ;;  %v2826_v26 = vld [vmem:[#allocation12 + $0x180] sm:$0xff]  ;;  %v2827_v57 = vld [vmem:[#allocation12 + $0x188] sm:$0xff] }
 0x4be   :  { %3885 = vmatprep.subr.bf16.mxu1 %v3884_v62  ;;  %4013 = vmatprep.subr.bf16.mxu0 %v4012_v30  ;;  %v2778_v62 = vld [vmem:[#allocation12] sm:$0xff]  ;;  %v2779_v30 = vld [vmem:[#allocation12 + $0x8] sm:$0xff]  ;;  %v4064_v32 = vpack.c.bf16 %v2827_v57, %v2826_v26  ;;  %v2804_v57 = vld [vmem:[#allocation12 + $0xd0] sm:$0xff] }
 0x4bf   :  { %v4034_v42 = vpack.c.bf16 %v2779_v30, %v2778_v62  ;;  %v2819_v26 = vld [vmem:[#allocation12 + $0x148] sm:$0xff]  ;;  %v2837_v62 = vld [vmem:[#allocation12 + $0x1d8] sm:$0xff] }
 0x4c1   :  { %3887 = vmatpush1.bf16.msra.mxu1 %v3886_v39  ;;  %4015 = vmatpush1.bf16.msra.mxu0 %v4014_v40  ;;  %v2797_v39 = vld [vmem:[#allocation12 + $0x98] sm:$0xff]  ;;  %v2828_v40 = vld [vmem:[#allocation12 + $0x190] sm:$0xff] }
 0x4c2   :  { %3889 = vmatprep.subr.bf16.mxu1 %v3888_v35  ;;  %4017 = vmatprep.subr.bf16.mxu0 %v4016_v43  ;;  %v4066_v35 = vpack.c.bf16 %v2811_v36, %v2810_v33  ;;  %v2780_v43 = vld [vmem:[#allocation12 + $0x10] sm:$0xff]  ;;  %v4036_v45 = vpack.c.bf16 %v2797_v39, %v2796_v37  ;;  %v4068_v46 = vpack.c.bf16 %v2829_v41, %v2828_v40  ;;  %v2789_v37 = vld [vmem:[#allocation12 + $0x58] sm:$0xff] }
 0x4c3   :  { %v2821_v39 = vld [vmem:[#allocation12 + $0x158] sm:$0xff] }
 0x4c5   :  { %3891 = vmatpush1.bf16.msra.mxu1 %v3890_v51  ;;  %4019 = vmatpush1.bf16.msra.mxu0 %v4018_v34  ;;  %v2201_v51 = vsel %vm2193_vm1, %v4686_v5, %v2197_v38  ;;  %v2799_v34 = vld [vmem:[#allocation12 + $0xa8] sm:$0xff]  ;;  %v2832_v5 = vld [vmem:[#allocation12 + $0x1b0] sm:$0xff] }
 0x4c6   :  { %3893 = vmatprep.subr.bf16.mxu1 %v3892_v58  ;;  %4021 = vmatprep.subr.bf16.mxu0 %v4020_v63  ;;  %v4038_v58 = vpack.c.bf16 %v2781_v44, %v2780_v43  ;;  %v4070_v63 = vpack.c.bf16 %v2813_v48, %v2812_v47  ;;  %v4040_v27 = vpack.c.bf16 %v2799_v34, %v2798_v49  ;;  %v2820_v38 = vld [vmem:[#allocation12 + $0x150] sm:$0xff]  ;;  %v2838_v43 = vld [vmem:[#allocation12 + $0x1e0] sm:$0xff]  ;;  %v2791_v47 = vld [vmem:[#allocation12 + $0x68] sm:$0xff] }
 0x4c7   :  { %v4076_v14 = vpack.c.bf16 %v2833_v8, %v2832_v5  ;;  %v4086_v41 = vpack.c.bf16 %v2821_v39, %v2820_v38  ;;  %v2823_v34 = vld [vmem:[#allocation12 + $0x168] sm:$0xff] }
 0x4c8   :  { %v3067_v8 = vld [vmem:[%s4717_s7 + $0x4] ss:$8 sm:$0xf] }
 0x4c9   :  { %3895 = vmatpush1.bf16.msra.mxu1 %v3894_v6  ;;  %4023 = vmatpush1.bf16.msra.mxu0 %v4022_v7  ;;  %v2800_v6 = vld [vmem:[#allocation12 + $0xb0] sm:$0xff]  ;;  %v2801_v7 = vld [vmem:[#allocation12 + $0xb8] sm:$0xff] }
 0x4ca   :  { %3897 = vmatprep.subr.bf16.mxu1 %v3896_v10  ;;  %4025 = vmatprep.subr.bf16.mxu0 %v4024_v11  ;;  %v4074_v10 = vpack.c.bf16 %v2815_v4, %v2814_v3  ;;  %v2784_v11 = vld [vmem:[#allocation12 + $0x30] sm:$0xff]  ;;  %v4044_v13 = vpack.c.bf16 %v2801_v7, %v2800_v6  ;;  %v2825_v7 = vld [vmem:[#allocation12 + $0x178] sm:$0xff] }
 0x4cb   :  { %v4046_v20 = vpack.c.bf16 %v2785_v12, %v2784_v11  ;;  %v2824_v6 = vld [vmem:[#allocation12 + $0x170] sm:$0xff]  ;;  %v2469_v11 = vrot.slane %v3067_v8, %v2173_v59  ;;  %v2477_v12 = vrot.slane %v3067_v8, %v2181_v60 }
 0x4cc   :  { %v4094_v5 = vpack.c.bf16 %v2825_v7, %v2824_v6 }
 0x4cd   :  { %3899 = vmatpush1.bf16.msra.mxu1 %v3898_v17  ;;  %4027 = vmatpush1.bf16.msra.mxu0 %v4026_v18  ;;  %v2803_v17 = vld [vmem:[#allocation12 + $0xc8] sm:$0xff]  ;;  %v2834_v18 = vld [vmem:[#allocation12 + $0x1c0] sm:$0xff] }
 0x4ce   :  { %3901 = vmatprep.subr.bf16.mxu1 %v3900_v21  ;;  %4029 = vmatprep.subr.bf16.mxu0 %v4028_v22  ;;  %v4078_v21 = vpack.c.bf16 %v2817_v15, %v2816_v61  ;;  %v2786_v22 = vld [vmem:[#allocation12 + $0x40] sm:$0xff]  ;;  %v4048_v24 = vpack.c.bf16 %v2803_v17, %v2802_v16  ;;  %v4080_v55 = vpack.c.bf16 %v2835_v19, %v2834_v18 }
 0x4cf   :  { %v4050_v30 = vpack.c.bf16 %v2787_v23, %v2786_v22 }
 0x4d1   :  { %3903 = vmatpush1.bf16.msra.mxu1 %v3902_v28  ;;  %4031 = vmatpush1.bf16.msra.mxu0 %v4030_v29  ;;  %v2805_v28 = vld [vmem:[#allocation12 + $0xd8] sm:$0xff]  ;;  %v2836_v29 = vld [vmem:[#allocation12 + $0x1d0] sm:$0xff] }
 0x4d2   :  { %4033 = vmatprep.subr.bf16.mxu1 %v4032_v31  ;;  %4065 = vmatprep.subr.bf16.mxu0 %v4064_v32  ;;  %v4082_v31 = vpack.c.bf16 %v2819_v26, %v2818_v25  ;;  %v2788_v32 = vld [vmem:[#allocation12 + $0x50] sm:$0xff]  ;;  %v4052_v33 = vpack.c.bf16 %v2805_v28, %v2804_v57  ;;  %v4084_v36 = vpack.c.bf16 %v2837_v62, %v2836_v29 }
 0x4d3   :  { %v4054_v40 = vpack.c.bf16 %v2789_v37, %v2788_v32 }
 0x4d4   :  { %2618 = vmatmul.mubr.f32.vlgmr.msra.gmra.mrb[18].mxu1 %v2201_v51  ;;  %2760 = vmatmul.mubr.f32.vlgmr.msra.gmra.mrb[14].mxu0 %v2201_v51  ;;  %v2822_v51 = vld [vmem:[#allocation12 + $0x160] sm:$0xff] }
 0x4d5   :  { %4035 = vmatpush3.bf16.msra.mxu1 %v4034_v42  ;;  %4067 = vmatpush3.bf16.msra.mxu0 %v4066_v35  ;;  %v2806_v42 = vld [vmem:[#allocation12 + $0xe0] sm:$0xff]  ;;  %v2807_v35 = vld [vmem:[#allocation12 + $0xe8] sm:$0xff]  ;;  %v4090_v52 = vpack.c.bf16 %v2823_v34, %v2822_v51 }
 0x4d6   :  { %4037 = vmatprep.subr.bf16.mxu1 %v4036_v45  ;;  %4069 = vmatprep.subr.bf16.mxu0 %v4068_v46  ;;  %v4056_v44 = vpack.c.bf16 %v2807_v35, %v2806_v42  ;;  %v2839_v45 = vld [vmem:[#allocation12 + $0x1e8] sm:$0xff]  ;;  %v2790_v46 = vld [vmem:[#allocation12 + $0x60] sm:$0xff] }
 0x4d7   :  { %v4088_v48 = vpack.c.bf16 %v2839_v45, %v2838_v43  ;;  %v4058_v49 = vpack.c.bf16 %v2791_v47, %v2790_v46 }
 0x4d9   :  { %4039 = vmatpush3.bf16.msra.mxu1 %v4038_v58  ;;  %4071 = vmatpush3.bf16.msra.mxu0 %v4070_v63  ;;  %v2809_v58 = vld [vmem:[#allocation12 + $0xf8] sm:$0xff]  ;;  %v2840_v63 = vld [vmem:[#allocation12 + $0x1f0] sm:$0xff] }
 0x4da   :  { %4041 = vmatprep.subr.bf16.mxu1 %v4040_v27  ;;  %4073 = vmatprep.subr.bf16.mxu0 %v4072_v2  ;;  %v4060_v0 = vpack.c.bf16 %v2809_v58, %v2808_v53  ;;  %v2792_v27 = vld [vmem:[#allocation12 + $0x70] sm:$0xff]  ;;  %v2793_v2 = vld [vmem:[#allocation12 + $0x78] sm:$0xff]  ;;  %v4092_v3 = vpack.c.bf16 %v2841_v1, %v2840_v63 }
 0x4db   :  { %v4062_v4 = vpack.c.bf16 %v2793_v2, %v2792_v27 }
 0x4dd   :  { %4043 = vmatpush3.bf16.msra.mxu1 %v4042_v9  ;;  %4075 = vmatpush3.bf16.msra.mxu0 %v4074_v10  ;;  %v2465_v9 = vrot.slane %v3067_v8, %v2169_v54  ;;  %v2473_v10 = vrot.slane %v3067_v8, %v2177_v56 }
 0x4de   :  { %4045 = vmatprep.subr.bf16.mxu1 %v4044_v13  ;;  %4077 = vmatprep.subr.bf16.mxu0 %v4076_v14 }
 0x4e1   :  { %4047 = vmatpush3.bf16.msra.mxu1 %v4046_v20  ;;  %4079 = vmatpush3.bf16.msra.mxu0 %v4078_v21 }
 0x4e2   :  { %4049 = vmatprep.subr.bf16.mxu1 %v4048_v24  ;;  %4081 = vmatprep.subr.bf16.mxu0 %v4080_v55  ;;  %v2842_v55 = vld [vmem:[%s4717_s7 + $0x5] ss:$0 sm:$0xff] }
 0x4e5   :  { %4051 = vmatpush3.bf16.msra.mxu1 %v4050_v30  ;;  %4083 = vmatpush3.bf16.msra.mxu0 %v4082_v31 }
 0x4e6   :  { %4053 = vmatprep.subr.bf16.mxu1 %v4052_v33  ;;  %4085 = vmatprep.subr.bf16.mxu0 %v4084_v36 }
 0x4e9   :  { %4055 = vmatpush3.bf16.msra.mxu1 %v4054_v40  ;;  %4087 = vmatpush3.bf16.msra.mxu0 %v4086_v41 }
 0x4ea   :  { %4057 = vmatprep.subr.bf16.mxu1 %v4056_v44  ;;  %4089 = vmatprep.subr.bf16.mxu0 %v4088_v48 }
 0x4ed   :  { %4059 = vmatpush3.bf16.msra.mxu1 %v4058_v49  ;;  %4091 = vmatpush3.bf16.msra.mxu0 %v4090_v52 }
 0x4ee   :  { %4061 = vmatprep.subr.bf16.mxu1 %v4060_v0  ;;  %4093 = vmatprep.subr.bf16.mxu0 %v4092_v3 }
 0x4f1   :  { %4063 = vmatpush3.bf16.msra.mxu1 %v4062_v4  ;;  %4095 = vmatpush3.bf16.msra.mxu0 %v4094_v5 }
 0x5a7   :  { %v2619_v13 = vpop.f32.mrb[18].mxu1  ;;  %v2761_v14 = vpop.f32.mrb[14].mxu0 }
 0x5a8   :  { %v4098_v61 = vadd.f32 %v2619_v13, %v2465_v9  ;;  %v4100_v15 = vadd.f32 %v2761_v14, %v2473_v10  ;;  %v2621_v16 = vpop.f32.mrb[19].mxu1  ;;  %v2763_v17 = vpop.f32.mrb[15].mxu0 }
 0x5a9   :  { %v4099_v18 = vadd.f32 %v2621_v16, %v2469_v11  ;;  %v4101_v19 = vadd.f32 %v2763_v17, %v2477_v12 }
 0x5aa   :  { %vm2766_vm2 = vcmp.ge.f32.partialorder %v4098_v61, 0.0  ;;  %v2770_v20 = vmul.f32 0.01, %v4098_v61  ;;  %vm2768_vm3 = vcmp.ge.f32.partialorder %v4100_v15, 0.0  ;;  %v2772_v54 = vmul.f32 0.01, %v4100_v15 }
 0x5ab   :  { %v2771_v21 = vmul.f32 0.01, %v4099_v18  ;;  %v2773_v56 = vmul.f32 0.01, %v4101_v19  ;;  %vm2767_vm5 = vcmp.ge.f32.partialorder %v4099_v18, 0.0  ;;  %vm2769_vm6 = vcmp.ge.f32.partialorder %v4101_v19, 0.0 }
 0x5ac   :  { %v2774_v50 = vsel %vm2766_vm2, %v4098_v61, %v2770_v20  ;;  %v2776_v60 = vsel %vm2768_vm3, %v4100_v15, %v2772_v54 }
 0x5ad   :  { %v2775_v59 = vsel %vm2767_vm5, %v4099_v18, %v2771_v21  ;;  %v2777_v22 = vsel %vm2769_vm6, %v4101_v19, %v2773_v56 }
 0x5ae   :  { %2907 = vmatprep.mubr.f32.mxu1 %v2775_v59  ;;  %2977 = vmatprep.mubr.f32.mxu0 %v2777_v22 }
 0x5af   :  { %2908 = vmatmul.mubr.f32.vlgmr.msra.gmra.mrb[20].mxu1 %v2774_v50  ;;  %2978 = vmatmul.mubr.f32.vlgmr.msra.gmra.mrb[16].mxu0 %v2776_v60 }
 0x682   :  { %v3202_v23 = vpop.f32.mrb[20].mxu1  ;;  %v3237_v24 = vpop.f32.mrb[16].mxu0 }
 0x683   :  { %v3203_v25 = vpop.f32.mrb[21].mxu1  ;;  %v3238_v26 = vpop.f32.mrb[17].mxu0 }
 0x684   :  { %v3204_v57 = vadd.f32 %v3203_v25, %v3202_v23  ;;  %v3239_v28 = vadd.f32 %v3238_v26, %v3237_v24 }
 0x686   :  { %v2910_v29 = vadd.f32 %v3204_v57, %v2842_v55 }
 0x688   :  { %v2980_v62 = vadd.f32 %v3239_v28, %v2910_v29 }
 0x68a   :  { %v2983_v30 = vsub.f32 0.0, %v2980_v62 }
 0x68c   :  { %v2984_v31 = vmul.f32 1.442695, %v2983_v30 }
 0x68e   :  { %4153 = vpow2.f32 %v2984_v31 }
 0x698   :  { %v4154_v32 = vpop.eup %4153 }
 0x699   :  { %v2986_v33 = vadd.f32 1.0, %v4154_v32 }
 0x69b   :  { %4155 = vrcp.f32 %v2986_v33 }
 0x6a5   :  { %v4156_v36 = vpop.eup %4155 }
 0x6a6   :  { %2989 = vst [vmem:[%s4718_s8] sm:$0xff] %v4156_v36 }
 0x6a7   :  { %2994 = vsyncpa [#allocation6], 1 }
 0x6a8   :  { %2995 = vsyncpa [#allocation8], 1 }
 0x6a9   :  { %2996 = vsyncpa [#allocation11], 1 }

</bundles_post_ra>
